<compile_context>
chip_gen: v7x
topology: tpu7x:2x2x1
jax: 0.10.0
libtpu: 0.0.40
codegen_flags: <defaults>
</compile_context>

<pallas_src>
import functools

import jax
import jax.numpy as jnp
from jax.experimental import pallas as pl
from jax.experimental.pallas import tpu as pltpu

MXU_DTYPE = jnp.bfloat16      # MXU operand dtype; accumulation is always f32
STORE_DTYPE = jnp.bfloat16    # dtype of the inter-kernel HBM intermediates


# ----------------------------------------------------------------------------
# Helpers
# ----------------------------------------------------------------------------
def bn_fold(gamma, beta, mean, var, eps=1e-5):
    scale = gamma / jnp.sqrt(var + eps)
    shift = beta - mean * scale
    return scale, shift


def _full_spec(shape):
    n = len(shape)
    return pl.BlockSpec(shape, lambda *_: (0,) * n)


def _vmem_budgets():
    """Generation-aware VMEM budget (guarded: falls back to v7x-safe defaults)."""
    phys = 64 << 20
    try:
        info = pltpu.get_tpu_info()
        for attr in ("vmem_capacity_bytes", "vmem_bytes", "vmem_size_bytes"):
            val = getattr(info, attr, None)
            if isinstance(val, (int, float)) and val > 0:
                phys = int(val)
                break
    except Exception:
        pass
    limit = int(min((phys * 3) // 4, 96 << 20))
    return limit, limit // 2


def _pick_tile_rows(n, cap):
    cap = max(1, min(n, cap))
    for d in range(cap, 0, -1):
        if n % d == 0 and d % 8 == 0:
            return d
    return n                      # single full-extent block (always legal)


# ----------------------------------------------------------------------------
# Kernel 1: whole Spatial_Basic_Block as one matmul + fused branch 1x1 convs
#   grid: tiles of the N*T row axis ("parallel")
# ----------------------------------------------------------------------------
def _spatial_kernel(x_ref, wbig_ref, sbig_ref, w1_ref, b1t_ref, mask_ref,
                    scn_ref, h_ref):
    # Folded (K 1x1 convs + adjacency + BN + residual) -> ReLU, one 2-D matmul.
    x = x_ref[...].astype(MXU_DTYPE)                                  # (tb, V*Cin)
    scn = jnp.maximum(
        jnp.dot(x, wbig_ref[...], preferred_element_type=jnp.float32)
        + sbig_ref[...], 0.0)                                         # (tb, V*Cout) f32
    scn_ref[...] = scn.astype(scn_ref.dtype)

    # Fused 4-branch TCN 1x1 convs (+BN1 scale folded into the weight), block-diagonal
    # per joint -> one 2-D matmul; per-branch ReLU via a single select.
    h = jnp.dot(scn.astype(MXU_DTYPE), w1_ref[...],
                preferred_element_type=jnp.float32) + b1t_ref[...]    # (tb, V*C)
    h_ref[...] = jnp.where(mask_ref[...] > 0.0,
                           jnp.maximum(h, 0.0), h).astype(h_ref.dtype)


# ----------------------------------------------------------------------------
# Kernel 2: Temporal_MultiScale_Block (temporal stage) + ST_Person_Attention
#   grid: one sample per step ("parallel"), zero T-halo built in VMEM (no HBM pad)
# ----------------------------------------------------------------------------
def _tcn_att_kernel(h_ref, scn_ref, wt_ref, s2_ref, t2_ref, qt_ref, wf_ref,
                    fsh_ref, watt_ref, batt_ref, jsel_ref, abn_s_ref, abn_t_ref,
                    out_ref, hp_s, tcn_s, *, dilations, ks, max_pad, n_branches):
    t_len, v, c = out_ref.shape
    cb = c // n_branches
    n_dil = len(dilations)

    # Build the zero T-padded slab in VMEM (removes the jnp.pad HBM round-trip).
    if max_pad > 0:
        halo = jnp.zeros((max_pad, v, c), hp_s.dtype)
        hp_s[:max_pad] = halo
        hp_s[max_pad + t_len:] = halo
    hp_s[max_pad:max_pad + t_len] = h_ref[...]                        # (T, V, C) bf16

    # Dilated temporal-conv branches: ks taps fused into ONE matmul via in-VMEM im2col.
    for bi, dil in enumerate(dilations):
        pad_b = (ks + (ks - 1) * (dil - 1) - 1) // 2
        base = max_pad - pad_b
        taps = [hp_s[base + dt * dil: base + dt * dil + t_len, :, bi * cb:(bi + 1) * cb]
                for dt in range(ks)]
        im2col = jnp.concatenate(taps, axis=-1)                       # (T, V, ks*Cb) bf16
        acc = jnp.einsum('tvk,kd->tvd', im2col, wt_ref[bi],
                         preferred_element_type=jnp.float32)
        tcn_s[:, :, bi * cb:(bi + 1) * cb] = (
            acc * s2_ref[:, :, bi * cb:(bi + 1) * cb]
            + t2_ref[:, :, bi * cb:(bi + 1) * cb])

    # 3-tap temporal max-pool branch (inputs >= 0 after the ReLU mask, so the zero halo
    # is equivalent to MaxPool2d's padding).
    mo = n_dil * cb
    m = jnp.maximum(
        jnp.maximum(hp_s[max_pad - 1:max_pad - 1 + t_len, :, mo:mo + cb],
                    hp_s[max_pad:max_pad + t_len, :, mo:mo + cb]),
        hp_s[max_pad + 1:max_pad + 1 + t_len, :, mo:mo + cb]).astype(jnp.float32)
    tcn_s[:, :, mo:mo + cb] = m * s2_ref[:, :, mo:] + t2_ref[:, :, mo:]

    # Plain 1x1+BN branch (already final inside h).
    po = (n_branches - 1) * cb
    tcn_s[:, :, po:] = hp_s[max_pad:max_pad + t_len, :, po:].astype(jnp.float32)

    tcn = tcn_s[...] + scn_ref[...].astype(jnp.float32)               # identity TCN residual

    # -------- ST_Person_Attention (fully fused, per sample) --------
    xt = jnp.mean(tcn, axis=1)                                        # (T, C)
    xm = jnp.mean(tcn, axis=0)                                        # (V, C)
    xp = jnp.dot(qt_ref[...], xm.astype(MXU_DTYPE),
                 preferred_element_type=jnp.float32)                  # (P, C)

    def fcn(z):                                                       # Conv1x1 + BN + ReLU
        return jnp.maximum(
            jnp.dot(z.astype(MXU_DTYPE), wf_ref[...],
                    preferred_element_type=jnp.float32) + fsh_ref[...], 0.0)

    hid_t = fcn(xt)                                                   # (T, Ci)
    hid_p = fcn(xp)                                                   # (P, Ci)
    t_att = jax.nn.sigmoid(
        jnp.dot(hid_t.astype(MXU_DTYPE), watt_ref[0],
                preferred_element_type=jnp.float32) + batt_ref[0:1])  # (T, C)
    p_att = jax.nn.sigmoid(
        jnp.dot(hid_p.astype(MXU_DTYPE), watt_ref[1],
                preferred_element_type=jnp.float32) + batt_ref[1:2])  # (P, C)
    v_att = jnp.dot(jsel_ref[...], p_att.astype(MXU_DTYPE),
                    preferred_element_type=jnp.float32)               # (V, C) joint gather

    att = t_att[:, None, :] * v_att[None, :, :]                       # (T, V, C)
    y = (tcn * att) * abn_s_ref[...] + abn_t_ref[...]
    out_ref[...] = jnp.maximum(y + tcn, 0.0)


# ----------------------------------------------------------------------------
# Forward pass
# ----------------------------------------------------------------------------
def basic_block_forward(x_nchw, params, cfg):
    N, Cin, T, V = x_nchw.shape
    Cout = cfg["out_channels"]
    K = cfg["K"]
    P = cfg["P"]
    Ci = cfg["inner"]
    ks = cfg["ks_t"]
    dilations = tuple(cfg["dilations"])
    nb = len(dilations) + 2
    n_dil = len(dilations)
    Cb = Cout // nb
    C = Cout
    NT = N * T
    f32 = jnp.float32
    mx = lambda a: a.astype(MXU_DTYPE)

    vmem_limit, block_budget = _vmem_budgets()

    # channels-last rows: row = (n, t), lane index = v*Cin + ci
    x2 = jnp.transpose(x_nchw, (0, 2, 3, 1)).reshape(NT, V * Cin)

    # ---------------- fold the whole spatial block into one (V*Cin, V*Cout) matmul ------
    A_eff = params["A"] * params["edge"]                               # (K, V, V)
    Wg = params["scn_gcn_w"].reshape(Cin, K, Cout)                     # [ci, k, c]
    ss, st = bn_fold(*params["scn_bn"])                                # (Cout,)
    core = jnp.einsum('kvw,ikc->viwc', A_eff, Wg) * ss[None, None, None, :]
    if Cin != Cout:                                                    # Conv1x1 + BN residual
        rs, rt = bn_fold(*params["scn_res_bn"])
        core = core + jnp.einsum('vw,ic->viwc', jnp.eye(V, dtype=f32),
                                 params["scn_res_w"] * rs[None, :])
        s_res = params["scn_res_b"] * rs + rt
    else:                                                              # identity residual
        core = core + jnp.einsum('vw,ic->viwc', jnp.eye(V, dtype=f32),
                                 jnp.eye(Cin, dtype=f32))
        s_res = jnp.zeros((Cout,), f32)
    bg = params["scn_gcn_b"].reshape(K, Cout)
    rowsum_a = jnp.sum(A_eff, axis=1)                                  # (K, V) = sum_v A[k,v,w]
    sbig = (st[None, :] + ss[None, :] * jnp.einsum('kw,kc->wc', rowsum_a, bg)
            + s_res[None, :]).reshape(1, V * Cout)                     # bias folded through A
    wbig = mx(core.reshape(V * Cin, V * Cout))

    # ---------------- fused branch 1x1 convs (+BN1 scale), per-joint block-diag ---------
    w1_cat = jnp.concatenate([params["tcn_branch"][b]["w1"] for b in range(nb)], axis=1)
    b1s_l, b1t_l = [], []
    for b in range(nb):
        pbr = params["tcn_branch"][b]
        s, sh = bn_fold(*pbr["bn1"])
        b1s_l.append(s)
        b1t_l.append(pbr["b1"] * s + sh)
    b1s = jnp.concatenate(b1s_l)
    b1t = jnp.concatenate(b1t_l)
    w1_big = mx(jnp.einsum('vw,cd->vcwd', jnp.eye(V, dtype=f32),
                           w1_cat * b1s[None, :]).reshape(V * Cout, V * C))
    b1t_big = jnp.tile(b1t, V).reshape(1, V * C)
    relu_mask = jnp.concatenate([jnp.ones(((nb - 1) * Cb,), f32),
                                 jnp.zeros((Cb,), f32)])
    mask_big = jnp.tile(relu_mask, V).reshape(1, V * C)

    # ---------------- kernel 1: spatial block + fused branch 1x1 ----------------
    weight_bytes = 2 * 2 * (wbig.size + w1_big.size)
    row_bytes = 2 * (V * Cin * 4 + V * Cout * 2 + V * C * 2)           # double-buffered rows
    cap_rows = max(8, (block_budget - weight_bytes) // row_bytes)
    tile_nt = _pick_tile_rows(NT, min(cap_rows, max(8, NT // 2)))      # >= 2 parallel steps
    grid1 = (NT // tile_nt,)

    scn2, h2 = pl.pallas_call(
        _spatial_kernel,
        grid=grid1,
        in_specs=[pl.BlockSpec((tile_nt, V * Cin), lambda i: (i, 0)),
                  _full_spec((V * Cin, V * Cout)), _full_spec((1, V * Cout)),
                  _full_spec((V * Cout, V * C)), _full_spec((1, V * C)),
                  _full_spec((1, V * C))],
        out_specs=(pl.BlockSpec((tile_nt, V * Cout), lambda i: (i, 0)),
                   pl.BlockSpec((tile_nt, V * C), lambda i: (i, 0))),
        out_shape=(jax.ShapeDtypeStruct((NT, V * Cout), STORE_DTYPE),
                   jax.ShapeDtypeStruct((NT, V * C), STORE_DTYPE)),
        compiler_params=pltpu.CompilerParams(
            dimension_semantics=("parallel",),
            vmem_limit_bytes=vmem_limit),
    )(x2, wbig, sbig, w1_big, b1t_big, mask_big)

    # ---------------- kernel 2: temporal multi-scale + attention ----------------
    pads = [(ks + (ks - 1) * (d - 1) - 1) // 2 for d in dilations]
    max_pad = max(pads)
    T2 = T + 2 * max_pad

    h3 = h2.reshape(NT, V, C)            # free reshapes (same HBM bytes), bf16
    scn3 = scn2.reshape(NT, V, Cout)

    wt_all = mx(jnp.stack([params["tcn_branch"][b]["wt"] for b in range(n_dil)]))
    s2_l, t2_l = [], []
    for b in range(n_dil):
        s, sh = bn_fold(*params["tcn_branch"][b]["bn2"])
        s2_l.append(s)
        t2_l.append(params["tcn_branch"][b]["bt"] * s + sh)
    s_mp, t_mp = bn_fold(*params["tcn_branch"][n_dil]["bn2"])
    s2_l.append(s_mp)
    t2_l.append(t_mp)
    s2 = jnp.concatenate(s2_l).reshape(1, 1, (nb - 1) * Cb)
    t2 = jnp.concatenate(t2_l).reshape(1, 1, (nb - 1) * Cb)

    qt = mx(params["att_qt"])                                          # (P, V)
    jsel = mx(jax.nn.one_hot(params["att_joints"], P, dtype=f32))      # (V, P)
    fs, fsh = bn_fold(*params["att_fcn_bn"])
    fsh = (params["att_fcn_b"] * fs + fsh).reshape(1, Ci)
    wf = mx(params["att_fcn_w"] * fs[None, :])                         # BN scale folded
    watt = mx(jnp.stack([params["att_convt_w"], params["att_convv_w"]]))   # (2, Ci, C)
    batt = jnp.stack([params["att_convt_b"], params["att_convv_b"]])       # (2, C)
    abn_s, abn_t = bn_fold(*params["att_bn"])
    abn_s = abn_s.reshape(1, 1, C)
    abn_t = abn_t.reshape(1, 1, C)

    out3 = pl.pallas_call(
        functools.partial(_tcn_att_kernel, dilations=dilations, ks=ks,
                          max_pad=max_pad, n_branches=nb),
        grid=(N,),
        in_specs=[pl.BlockSpec((T, V, C), lambda n: (n, 0, 0)),
                  pl.BlockSpec((T, V, Cout), lambda n: (n, 0, 0)),
                  _full_spec(tuple(wt_all.shape)),
                  _full_spec((1, 1, (nb - 1) * Cb)),
                  _full_spec((1, 1, (nb - 1) * Cb)),
                  _full_spec((P, V)),
                  _full_spec((C, Ci)), _full_spec((1, Ci)),
                  _full_spec((2, Ci, C)), _full_spec((2, C)),
                  _full_spec((V, P)),
                  _full_spec((1, 1, C)), _full_spec((1, 1, C))],
        out_specs=pl.BlockSpec((T, V, C), lambda n: (n, 0, 0)),
        out_shape=jax.ShapeDtypeStruct((NT, V, C), f32),
        scratch_shapes=[pltpu.VMEM((T2, V, C), STORE_DTYPE),
                        pltpu.VMEM((T, V, C), jnp.float32)],
        compiler_params=pltpu.CompilerParams(
            dimension_semantics=("parallel",),
            vmem_limit_bytes=vmem_limit),
    )(h3, scn3, wt_all, s2, t2, qt, wf, fsh, watt, batt, jsel, abn_s, abn_t)

    return jnp.transpose(out3.reshape(N, T, V, C), (0, 3, 1, 2))       # back to NCHW


# ----------------------------------------------------------------------------
# Deterministic parameter construction (synthetic, no checkpoint)
# ----------------------------------------------------------------------------
def build_params(key, Cin, Cout, cfg, parts, V):
    K = cfg["K"]
    Ci = cfg["inner"]
    ks = cfg["ks_t"]
    dilations = cfg["dilations"]
    Cb = Cout // (len(dilations) + 2)

    keys = iter(jax.random.split(key, 128))
    w = lambda shape: (0.3 * jax.random.normal(next(keys), shape)).astype(jnp.float32)
    b = lambda shape: (0.1 * jax.random.normal(next(keys), shape)).astype(jnp.float32)

    def bn(c):
        g = 1.0 + 0.1 * jax.random.normal(next(keys), (c,))
        be = 0.1 * jax.random.normal(next(keys), (c,))
        m = 0.1 * jax.random.normal(next(keys), (c,))
        v = 0.5 + 0.2 * jnp.abs(jax.random.normal(next(keys), (c,)))
        return (g.astype(jnp.float32), be.astype(jnp.float32),
                m.astype(jnp.float32), v.astype(jnp.float32))

    p = {}
    p["A"] = w((K, V, V))
    p["edge"] = jnp.ones((K, V, V), jnp.float32)

    p["scn_res_w"] = w((Cin, Cout)); p["scn_res_b"] = b((Cout,)); p["scn_res_bn"] = bn(Cout)
    p["scn_gcn_w"] = w((Cin, K * Cout)); p["scn_gcn_b"] = b((K * Cout,))
    p["scn_bn"] = bn(Cout)

    branches = []
    for _ in dilations:
        branches.append(dict(w1=w((Cout, Cb)), b1=b((Cb,)), bn1=bn(Cb),
                             wt=w((ks * Cb, Cb)), bt=b((Cb,)), bn2=bn(Cb)))
    branches.append(dict(w1=w((Cout, Cb)), b1=b((Cb,)), bn1=bn(Cb), bn2=bn(Cb)))  # maxpool
    branches.append(dict(w1=w((Cout, Cb)), b1=b((Cb,)), bn1=bn(Cb)))              # plain 1x1
    p["tcn_branch"] = branches

    num_joints = sum(len(part) for part in parts)
    joints = [j for i in range(num_joints) for j in range(len(parts)) if i in parts[j]]
    Q = jnp.zeros((num_joints, len(parts)), jnp.float32)
    for j, part in enumerate(parts):
        for joint in part:
            Q = Q.at[joint, j].set(1.0 / len(part))
    p["att_qt"] = jnp.transpose(Q)                                # (P, V)
    p["att_joints"] = jnp.array(joints, jnp.int32)
    p["att_fcn_w"] = w((Cout, Ci)); p["att_fcn_b"] = b((Ci,)); p["att_fcn_bn"] = bn(Ci)
    p["att_convt_w"] = w((Ci, Cout)); p["att_convt_b"] = b((Cout,))
    p["att_convv_w"] = w((Ci, Cout)); p["att_convv_b"] = b((Cout,))
    p["att_bn"] = bn(Cout)
    return p


# ----------------------------------------------------------------------------
if __name__ == "__main__":
    N, Cin, T, V = 2, 4, 16, 8
    out_channels = 8
    parts = [[0, 1], [2, 3], [4, 5], [6, 7]]          # P = 4 body parts over 8 joints
    reduct_ratio = 2
    cfg = dict(out_channels=out_channels,
               K=3,                                   # max_graph_distance=2 -> s_kernel_size=3
               P=len(parts),
               inner=out_channels // reduct_ratio,
               ks_t=9,                                # temporal window size
               dilations=[1, 2])

    key = jax.random.PRNGKey(0)
    kx, kp = jax.random.split(key)
    x = jax.random.normal(kx, (N, Cin, T, V), jnp.float32)
    params = build_params(kp, Cin, out_channels, cfg, parts, V)

    fwd = jax.jit(functools.partial(basic_block_forward, cfg=cfg))
    out = fwd(x, params)
    jax.block_until_ready(out)
    assert out.shape == (N, out_channels, T, V)
    assert bool(jnp.all(jnp.isfinite(out)))
    print("KERNEL_OK")
</pallas_src>

<mosaic_0001>
module attributes {stable_mosaic.version = 11 : i64} {
  func.func @_spatial_kernel(%arg0: i32, %arg1: memref<16x32xf32, #tpu.memory_space<vmem>>, %arg2: memref<32x64xbf16, #tpu.memory_space<vmem>>, %arg3: memref<1x64xf32, #tpu.memory_space<vmem>>, %arg4: memref<64x64xbf16, #tpu.memory_space<vmem>>, %arg5: memref<1x64xf32, #tpu.memory_space<vmem>>, %arg6: memref<1x64xf32, #tpu.memory_space<vmem>>, %arg7: memref<16x64xbf16, #tpu.memory_space<vmem>>, %arg8: memref<16x64xbf16, #tpu.memory_space<vmem>>) attributes {dimension_semantics = [#tpu.dimension_semantics<parallel>], iteration_bounds = array<i64: 2>, scalar_prefetch = 0 : i64, scratch_operands = 0 : i64, tpu.core_type = #tpu.core_type<tc>, window_params = [{transform_indices = @transform_0, window_bounds = array<i64: 16, 32>}, {pipeline_mode = #tpu.pipeline_mode<synchronous>, transform_indices = @transform_1, window_bounds = array<i64: 32, 64>}, {pipeline_mode = #tpu.pipeline_mode<synchronous>, transform_indices = @transform_2, window_bounds = array<i64: 1, 64>}, {pipeline_mode = #tpu.pipeline_mode<synchronous>, transform_indices = @transform_3, window_bounds = array<i64: 64, 64>}, {pipeline_mode = #tpu.pipeline_mode<synchronous>, transform_indices = @transform_4, window_bounds = array<i64: 1, 64>}, {pipeline_mode = #tpu.pipeline_mode<synchronous>, transform_indices = @transform_5, window_bounds = array<i64: 1, 64>}, {transform_indices = @transform_6, window_bounds = array<i64: 16, 64>}, {transform_indices = @transform_7, window_bounds = array<i64: 16, 64>}]} {
    %c0 = arith.constant 0 : index
    %c0_0 = arith.constant 0 : index
    %0 = vector.load %arg1[%c0, %c0_0] : memref<16x32xf32, #tpu.memory_space<vmem>>, vector<16x32xf32>
    %1 = arith.truncf %0 : vector<16x32xf32> to vector<16x32xbf16>
    %c0_1 = arith.constant 0 : index
    %c0_2 = arith.constant 0 : index
    %2 = vector.load %arg2[%c0_1, %c0_2] : memref<32x64xbf16, #tpu.memory_space<vmem>>, vector<32x64xbf16>
    %cst = arith.constant dense<0.000000e+00> : vector<16x64xf32>
    %3 = tpu.matmul %1, %2, %cst {dimension_numbers = #tpu.dot_dimension_numbers<[1], [0], [0], [1], [0, 0, 1, 1], [], []>} : vector<16x32xbf16>, vector<32x64xbf16>, vector<16x64xf32> -> vector<16x64xf32>
    %c0_3 = arith.constant 0 : index
    %c0_4 = arith.constant 0 : index
    %4 = vector.load %arg3[%c0_3, %c0_4] : memref<1x64xf32, #tpu.memory_space<vmem>>, vector<1x64xf32>
    %5 = vector.broadcast %4 : vector<1x64xf32> to vector<16x64xf32>
    %6 = arith.addf %3, %5 : vector<16x64xf32>
    %cst_5 = arith.constant 0.000000e+00 : f32
    %7 = vector.broadcast %cst_5 : f32 to vector<16x64xf32>
    %8 = arith.maximumf %6, %7 : vector<16x64xf32>
    %9 = arith.truncf %8 : vector<16x64xf32> to vector<16x64xbf16>
    %c0_6 = arith.constant 0 : index
    %c0_7 = arith.constant 0 : index
    %10 = vector.load %arg7[%c0_6, %c0_7] : memref<16x64xbf16, #tpu.memory_space<vmem>>, vector<16x64xbf16>
    tpu.vector_store %arg7[%c0_6, %c0_7], %9 {strides = array<i32>} : memref<16x64xbf16, #tpu.memory_space<vmem>>, vector<16x64xbf16>,
    %11 = arith.truncf %8 : vector<16x64xf32> to vector<16x64xbf16>
    %c0_8 = arith.constant 0 : index
    %c0_9 = arith.constant 0 : index
    %12 = vector.load %arg4[%c0_8, %c0_9] : memref<64x64xbf16, #tpu.memory_space<vmem>>, vector<64x64xbf16>
    %cst_10 = arith.constant dense<0.000000e+00> : vector<16x64xf32>
    %13 = tpu.matmul %11, %12, %cst_10 {dimension_numbers = #tpu.dot_dimension_numbers<[1], [0], [0], [1], [0, 0, 1, 1], [], []>} : vector<16x64xbf16>, vector<64x64xbf16>, vector<16x64xf32> -> vector<16x64xf32>
    %c0_11 = arith.constant 0 : index
    %c0_12 = arith.constant 0 : index
    %14 = vector.load %arg5[%c0_11, %c0_12] : memref<1x64xf32, #tpu.memory_space<vmem>>, vector<1x64xf32>
    %15 = vector.broadcast %14 : vector<1x64xf32> to vector<16x64xf32>
    %16 = arith.addf %13, %15 : vector<16x64xf32>
    %c0_13 = arith.constant 0 : index
    %c0_14 = arith.constant 0 : index
    %17 = vector.load %arg6[%c0_13, %c0_14] : memref<1x64xf32, #tpu.memory_space<vmem>>, vector<1x64xf32>
    %cst_15 = arith.constant 0.000000e+00 : f32
    %18 = vector.broadcast %cst_15 : f32 to vector<1x64xf32>
    %19 = arith.cmpf ogt, %17, %18 : vector<1x64xf32>
    %cst_16 = arith.constant 0.000000e+00 : f32
    %20 = vector.broadcast %cst_16 : f32 to vector<16x64xf32>
    %21 = arith.maximumf %16, %20 : vector<16x64xf32>
    %22 = vector.shape_cast %19 : vector<1x64xi1> to vector<1x64xi1>
    %23 = vector.broadcast %22 : vector<1x64xi1> to vector<16x64xi1>
    %24 = arith.select %23, %21, %16 : vector<16x64xi1>, vector<16x64xf32>
    %25 = arith.truncf %24 : vector<16x64xf32> to vector<16x64xbf16>
    %c0_17 = arith.constant 0 : index
    %c0_18 = arith.constant 0 : index
    %26 = vector.load %arg8[%c0_17, %c0_18] : memref<16x64xbf16, #tpu.memory_space<vmem>>, vector<16x64xbf16>
    tpu.vector_store %arg8[%c0_17, %c0_18], %25 {strides = array<i32>} : memref<16x64xbf16, #tpu.memory_space<vmem>>, vector<16x64xbf16>,
    return
  }
  func.func @transform_0(%arg0: i32) -> (i32, i32) {
    %c0_i32 = arith.constant 0 : i32
    %c0_i32_0 = arith.constant 0 : i32
    return %arg0, %c0_i32 : i32, i32
  }
  func.func @transform_1(%arg0: i32) -> (i32, i32) {
    %c0_i32 = arith.constant 0 : i32
    %c0_i32_0 = arith.constant 0 : i32
    %c0_i32_1 = arith.constant 0 : i32
    return %c0_i32, %c0_i32_0 : i32, i32
  }
  func.func @transform_2(%arg0: i32) -> (i32, i32) {
    %c0_i32 = arith.constant 0 : i32
    %c0_i32_0 = arith.constant 0 : i32
    %c0_i32_1 = arith.constant 0 : i32
    return %c0_i32, %c0_i32_0 : i32, i32
  }
  func.func @transform_3(%arg0: i32) -> (i32, i32) {
    %c0_i32 = arith.constant 0 : i32
    %c0_i32_0 = arith.constant 0 : i32
    %c0_i32_1 = arith.constant 0 : i32
    return %c0_i32, %c0_i32_0 : i32, i32
  }
  func.func @transform_4(%arg0: i32) -> (i32, i32) {
    %c0_i32 = arith.constant 0 : i32
    %c0_i32_0 = arith.constant 0 : i32
    %c0_i32_1 = arith.constant 0 : i32
    return %c0_i32, %c0_i32_0 : i32, i32
  }
  func.func @transform_5(%arg0: i32) -> (i32, i32) {
    %c0_i32 = arith.constant 0 : i32
    %c0_i32_0 = arith.constant 0 : i32
    %c0_i32_1 = arith.constant 0 : i32
    return %c0_i32, %c0_i32_0 : i32, i32
  }
  func.func @transform_6(%arg0: i32) -> (i32, i32) {
    %c0_i32 = arith.constant 0 : i32
    %c0_i32_0 = arith.constant 0 : i32
    return %arg0, %c0_i32 : i32, i32
  }
  func.func @transform_7(%arg0: i32) -> (i32, i32) {
    %c0_i32 = arith.constant 0 : i32
    %c0_i32_0 = arith.constant 0 : i32
    return %arg0, %c0_i32 : i32, i32
  }
}

module attributes {stable_mosaic.version = 11 : i64} {
  func.func @_tcn_att_kernel(%arg0: i32, %arg1: memref<16x8x8xbf16, #tpu.memory_space<vmem>>, %arg2: memref<16x8x8xbf16, #tpu.memory_space<vmem>>, %arg3: memref<2x18x2xbf16, #tpu.memory_space<vmem>>, %arg4: memref<1x1x6xf32, #tpu.memory_space<vmem>>, %arg5: memref<1x1x6xf32, #tpu.memory_space<vmem>>, %arg6: memref<4x8xbf16, #tpu.memory_space<vmem>>, %arg7: memref<8x4xbf16, #tpu.memory_space<vmem>>, %arg8: memref<1x4xf32, #tpu.memory_space<vmem>>, %arg9: memref<2x4x8xbf16, #tpu.memory_space<vmem>>, %arg10: memref<2x8xf32, #tpu.memory_space<vmem>>, %arg11: memref<8x4xbf16, #tpu.memory_space<vmem>>, %arg12: memref<1x1x8xf32, #tpu.memory_space<vmem>>, %arg13: memref<1x1x8xf32, #tpu.memory_space<vmem>>, %arg14: memref<16x8x8xf32, #tpu.memory_space<vmem>>, %arg15: memref<32x8x8xbf16, #tpu.memory_space<vmem>>, %arg16: memref<16x8x8xf32, #tpu.memory_space<vmem>>) attributes {dimension_semantics = [#tpu.dimension_semantics<parallel>], iteration_bounds = array<i64: 2>, scalar_prefetch = 0 : i64, scratch_operands = 2 : i64, tpu.core_type = #tpu.core_type<tc>, window_params = [{transform_indices = @transform_0, window_bounds = array<i64: 16, 8, 8>}, {transform_indices = @transform_1, window_bounds = array<i64: 16, 8, 8>}, {pipeline_mode = #tpu.pipeline_mode<synchronous>, transform_indices = @transform_2, window_bounds = array<i64: 2, 18, 2>}, {pipeline_mode = #tpu.pipeline_mode<synchronous>, transform_indices = @transform_3, window_bounds = array<i64: 1, 1, 6>}, {pipeline_mode = #tpu.pipeline_mode<synchronous>, transform_indices = @transform_4, window_bounds = array<i64: 1, 1, 6>}, {pipeline_mode = #tpu.pipeline_mode<synchronous>, transform_indices = @transform_5, window_bounds = array<i64: 4, 8>}, {pipeline_mode = #tpu.pipeline_mode<synchronous>, transform_indices = @transform_6, window_bounds = array<i64: 8, 4>}, {pipeline_mode = #tpu.pipeline_mode<synchronous>, transform_indices = @transform_7, window_bounds = array<i64: 1, 4>}, {pipeline_mode = #tpu.pipeline_mode<synchronous>, transform_indices = @transform_8, window_bounds = array<i64: 2, 4, 8>}, {pipeline_mode = #tpu.pipeline_mode<synchronous>, transform_indices = @transform_9, window_bounds = array<i64: 2, 8>}, {pipeline_mode = #tpu.pipeline_mode<synchronous>, transform_indices = @transform_10, window_bounds = array<i64: 8, 4>}, {pipeline_mode = #tpu.pipeline_mode<synchronous>, transform_indices = @transform_11, window_bounds = array<i64: 1, 1, 8>}, {pipeline_mode = #tpu.pipeline_mode<synchronous>, transform_indices = @transform_12, window_bounds = array<i64: 1, 1, 8>}, {transform_indices = @transform_13, window_bounds = array<i64: 16, 8, 8>}]} {
    %cst = arith.constant 0.000000e+00 : bf16
    %0 = vector.broadcast %cst : bf16 to vector<8x8x8xbf16>
    %c0 = arith.constant 0 : index
    %c0_0 = arith.constant 0 : index
    %c0_1 = arith.constant 0 : index
    %1 = vector.load %arg15[%c0, %c0_0, %c0_1] : memref<32x8x8xbf16, #tpu.memory_space<vmem>>, vector<8x8x8xbf16>
    tpu.vector_store %arg15[%c0, %c0_0, %c0_1], %0 {strides = array<i32>} : memref<32x8x8xbf16, #tpu.memory_space<vmem>>, vector<8x8x8xbf16>,
    %c24 = arith.constant 24 : index
    %c0_2 = arith.constant 0 : index
    %c0_3 = arith.constant 0 : index
    %2 = vector.load %arg15[%c24, %c0_2, %c0_3] : memref<32x8x8xbf16, #tpu.memory_space<vmem>>, vector<8x8x8xbf16>
    tpu.vector_store %arg15[%c24, %c0_2, %c0_3], %0 {strides = array<i32>} : memref<32x8x8xbf16, #tpu.memory_space<vmem>>, vector<8x8x8xbf16>,
    %c0_4 = arith.constant 0 : index
    %c0_5 = arith.constant 0 : index
    %c0_6 = arith.constant 0 : index
    %3 = vector.load %arg1[%c0_4, %c0_5, %c0_6] : memref<16x8x8xbf16, #tpu.memory_space<vmem>>, vector<16x8x8xbf16>
    %c8 = arith.constant 8 : index
    %c0_7 = arith.constant 0 : index
    %c0_8 = arith.constant 0 : index
    %4 = vector.load %arg15[%c8, %c0_7, %c0_8] : memref<32x8x8xbf16, #tpu.memory_space<vmem>>, vector<16x8x8xbf16>
    tpu.vector_store %arg15[%c8, %c0_7, %c0_8], %3 {strides = array<i32>} : memref<32x8x8xbf16, #tpu.memory_space<vmem>>, vector<16x8x8xbf16>,
    %c4 = arith.constant 4 : index
    %c0_9 = arith.constant 0 : index
    %c0_10 = arith.constant 0 : index
    %5 = vector.load %arg15[%c4, %c0_9, %c0_10] : memref<32x8x8xbf16, #tpu.memory_space<vmem>>, vector<16x8x2xbf16>
    %c5 = arith.constant 5 : index
    %c0_11 = arith.constant 0 : index
    %c0_12 = arith.constant 0 : index
    %6 = vector.load %arg15[%c5, %c0_11, %c0_12] : memref<32x8x8xbf16, #tpu.memory_space<vmem>>, vector<16x8x2xbf16>
    %c6 = arith.constant 6 : index
    %c0_13 = arith.constant 0 : index
    %c0_14 = arith.constant 0 : index
    %7 = vector.load %arg15[%c6, %c0_13, %c0_14] : memref<32x8x8xbf16, #tpu.memory_space<vmem>>, vector<16x8x2xbf16>
    %c7 = arith.constant 7 : index
    %c0_15 = arith.constant 0 : index
    %c0_16 = arith.constant 0 : index
    %8 = vector.load %arg15[%c7, %c0_15, %c0_16] : memref<32x8x8xbf16, #tpu.memory_space<vmem>>, vector<16x8x2xbf16>
    %c8_17 = arith.constant 8 : index
    %c0_18 = arith.constant 0 : index
    %c0_19 = arith.constant 0 : index
    %9 = vector.load %arg15[%c8_17, %c0_18, %c0_19] : memref<32x8x8xbf16, #tpu.memory_space<vmem>>, vector<16x8x2xbf16>
    %c9 = arith.constant 9 : index
    %c0_20 = arith.constant 0 : index
    %c0_21 = arith.constant 0 : index
    %10 = vector.load %arg15[%c9, %c0_20, %c0_21] : memref<32x8x8xbf16, #tpu.memory_space<vmem>>, vector<16x8x2xbf16>
    %c10 = arith.constant 10 : index
    %c0_22 = arith.constant 0 : index
    %c0_23 = arith.constant 0 : index
    %11 = vector.load %arg15[%c10, %c0_22, %c0_23] : memref<32x8x8xbf16, #tpu.memory_space<vmem>>, vector<16x8x2xbf16>
    %c11 = arith.constant 11 : index
    %c0_24 = arith.constant 0 : index
    %c0_25 = arith.constant 0 : index
    %12 = vector.load %arg15[%c11, %c0_24, %c0_25] : memref<32x8x8xbf16, #tpu.memory_space<vmem>>, vector<16x8x2xbf16>
    %c12 = arith.constant 12 : index
    %c0_26 = arith.constant 0 : index
    %c0_27 = arith.constant 0 : index
    %13 = vector.load %arg15[%c12, %c0_26, %c0_27] : memref<32x8x8xbf16, #tpu.memory_space<vmem>>, vector<16x8x2xbf16>
    %14 = tpu.concatenate %5, %6, %7, %8, %9, %10, %11, %12, %13 in 2 : vector<16x8x2xbf16>, vector<16x8x2xbf16>, vector<16x8x2xbf16>, vector<16x8x2xbf16>, vector<16x8x2xbf16>, vector<16x8x2xbf16>, vector<16x8x2xbf16>, vector<16x8x2xbf16>, vector<16x8x2xbf16> -> vector<16x8x18xbf16>
    %c0_28 = arith.constant 0 : index
    %c0_29 = arith.constant 0 : index
    %c0_30 = arith.constant 0 : index
    %15 = vector.load %arg3[%c0_28, %c0_29, %c0_30] : memref<2x18x2xbf16, #tpu.memory_space<vmem>>, vector<1x18x2xbf16>
    %16 = vector.shape_cast %15 : vector<1x18x2xbf16> to vector<18x2xbf16>
    "tpu.trace_start"() <{level = 10 : i32, message = "tvk,kd->tvd"}> : () -> ()
    %cst_31 = arith.constant dense<0.000000e+00> : vector<16x8x2xf32>
    %17 = tpu.matmul %14, %16, %cst_31 {dimension_numbers = #tpu.dot_dimension_numbers<[2], [0], [0, 1], [1], [0, 0, 0, 1, 1, 1], [], []>} : vector<16x8x18xbf16>, vector<18x2xbf16>, vector<16x8x2xf32> -> vector<16x8x2xf32>
    "tpu.trace_stop"() : () -> ()
    %c0_32 = arith.constant 0 : index
    %c0_33 = arith.constant 0 : index
    %c0_34 = arith.constant 0 : index
    %18 = vector.load %arg4[%c0_32, %c0_33, %c0_34] : memref<1x1x6xf32, #tpu.memory_space<vmem>>, vector<1x1x2xf32>
    %19 = vector.broadcast %18 : vector<1x1x2xf32> to vector<16x8x2xf32>
    %20 = arith.mulf %17, %19 : vector<16x8x2xf32>
    %c0_35 = arith.constant 0 : index
    %c0_36 = arith.constant 0 : index
    %c0_37 = arith.constant 0 : index
    %21 = vector.load %arg5[%c0_35, %c0_36, %c0_37] : memref<1x1x6xf32, #tpu.memory_space<vmem>>, vector<1x1x2xf32>
    %22 = vector.broadcast %21 : vector<1x1x2xf32> to vector<16x8x2xf32>
    %23 = arith.addf %20, %22 : vector<16x8x2xf32>
    %c0_38 = arith.constant 0 : index
    %c0_39 = arith.constant 0 : index
    %c0_40 = arith.constant 0 : index
    %24 = vector.load %arg16[%c0_38, %c0_39, %c0_40] : memref<16x8x8xf32, #tpu.memory_space<vmem>>, vector<16x8x2xf32>
    tpu.vector_store %arg16[%c0_38, %c0_39, %c0_40], %23 {strides = array<i32>} : memref<16x8x8xf32, #tpu.memory_space<vmem>>, vector<16x8x2xf32>,
    %c0_41 = arith.constant 0 : index
    %c0_42 = arith.constant 0 : index
    %c2 = arith.constant 2 : index
    %25 = vector.load %arg15[%c0_41, %c0_42, %c2] : memref<32x8x8xbf16, #tpu.memory_space<vmem>>, vector<16x8x2xbf16>
    %c2_43 = arith.constant 2 : index
    %c0_44 = arith.constant 0 : index
    %c2_45 = arith.constant 2 : index
    %26 = vector.load %arg15[%c2_43, %c0_44, %c2_45] : memref<32x8x8xbf16, #tpu.memory_space<vmem>>, vector<16x8x2xbf16>
    %c4_46 = arith.constant 4 : index
    %c0_47 = arith.constant 0 : index
    %c2_48 = arith.constant 2 : index
    %27 = vector.load %arg15[%c4_46, %c0_47, %c2_48] : memref<32x8x8xbf16, #tpu.memory_space<vmem>>, vector<16x8x2xbf16>
    %c6_49 = arith.constant 6 : index
    %c0_50 = arith.constant 0 : index
    %c2_51 = arith.constant 2 : index
    %28 = vector.load %arg15[%c6_49, %c0_50, %c2_51] : memref<32x8x8xbf16, #tpu.memory_space<vmem>>, vector<16x8x2xbf16>
    %c8_52 = arith.constant 8 : index
    %c0_53 = arith.constant 0 : index
    %c2_54 = arith.constant 2 : index
    %29 = vector.load %arg15[%c8_52, %c0_53, %c2_54] : memref<32x8x8xbf16, #tpu.memory_space<vmem>>, vector<16x8x2xbf16>
    %c10_55 = arith.constant 10 : index
    %c0_56 = arith.constant 0 : index
    %c2_57 = arith.constant 2 : index
    %30 = vector.load %arg15[%c10_55, %c0_56, %c2_57] : memref<32x8x8xbf16, #tpu.memory_space<vmem>>, vector<16x8x2xbf16>
    %c12_58 = arith.constant 12 : index
    %c0_59 = arith.constant 0 : index
    %c2_60 = arith.constant 2 : index
    %31 = vector.load %arg15[%c12_58, %c0_59, %c2_60] : memref<32x8x8xbf16, #tpu.memory_space<vmem>>, vector<16x8x2xbf16>
    %c14 = arith.constant 14 : index
    %c0_61 = arith.constant 0 : index
    %c2_62 = arith.constant 2 : index
    %32 = vector.load %arg15[%c14, %c0_61, %c2_62] : memref<32x8x8xbf16, #tpu.memory_space<vmem>>, vector<16x8x2xbf16>
    %c16 = arith.constant 16 : index
    %c0_63 = arith.constant 0 : index
    %c2_64 = arith.constant 2 : index
    %33 = vector.load %arg15[%c16, %c0_63, %c2_64] : memref<32x8x8xbf16, #tpu.memory_space<vmem>>, vector<16x8x2xbf16>
    %34 = tpu.concatenate %25, %26, %27, %28, %29, %30, %31, %32, %33 in 2 : vector<16x8x2xbf16>, vector<16x8x2xbf16>, vector<16x8x2xbf16>, vector<16x8x2xbf16>, vector<16x8x2xbf16>, vector<16x8x2xbf16>, vector<16x8x2xbf16>, vector<16x8x2xbf16>, vector<16x8x2xbf16> -> vector<16x8x18xbf16>
    %c1 = arith.constant 1 : index
    %c0_65 = arith.constant 0 : index
    %c0_66 = arith.constant 0 : index
    %35 = vector.load %arg3[%c1, %c0_65, %c0_66] : memref<2x18x2xbf16, #tpu.memory_space<vmem>>, vector<1x18x2xbf16>
    %36 = vector.shape_cast %35 : vector<1x18x2xbf16> to vector<18x2xbf16>
    "tpu.trace_start"() <{level = 10 : i32, message = "tvk,kd->tvd"}> : () -> ()
    %cst_67 = arith.constant dense<0.000000e+00> : vector<16x8x2xf32>
    %37 = tpu.matmul %34, %36, %cst_67 {dimension_numbers = #tpu.dot_dimension_numbers<[2], [0], [0, 1], [1], [0, 0, 0, 1, 1, 1], [], []>} : vector<16x8x18xbf16>, vector<18x2xbf16>, vector<16x8x2xf32> -> vector<16x8x2xf32>
    "tpu.trace_stop"() : () -> ()
    %c0_68 = arith.constant 0 : index
    %c0_69 = arith.constant 0 : index
    %c2_70 = arith.constant 2 : index
    %38 = vector.load %arg4[%c0_68, %c0_69, %c2_70] : memref<1x1x6xf32, #tpu.memory_space<vmem>>, vector<1x1x2xf32>
    %39 = vector.broadcast %38 : vector<1x1x2xf32> to vector<16x8x2xf32>
    %40 = arith.mulf %37, %39 : vector<16x8x2xf32>
    %c0_71 = arith.constant 0 : index
    %c0_72 = arith.constant 0 : index
    %c2_73 = arith.constant 2 : index
    %41 = vector.load %arg5[%c0_71, %c0_72, %c2_73] : memref<1x1x6xf32, #tpu.memory_space<vmem>>, vector<1x1x2xf32>
    %42 = vector.broadcast %41 : vector<1x1x2xf32> to vector<16x8x2xf32>
    %43 = arith.addf %40, %42 : vector<16x8x2xf32>
    %c0_74 = arith.constant 0 : index
    %c0_75 = arith.constant 0 : index
    %c2_76 = arith.constant 2 : index
    %44 = vector.load %arg16[%c0_74, %c0_75, %c2_76] : memref<16x8x8xf32, #tpu.memory_space<vmem>>, vector<16x8x2xf32>
    tpu.vector_store %arg16[%c0_74, %c0_75, %c2_76], %43 {strides = array<i32>} : memref<16x8x8xf32, #tpu.memory_space<vmem>>, vector<16x8x2xf32>,
    %c7_77 = arith.constant 7 : index
    %c0_78 = arith.constant 0 : index
    %c4_79 = arith.constant 4 : index
    %45 = vector.load %arg15[%c7_77, %c0_78, %c4_79] : memref<32x8x8xbf16, #tpu.memory_space<vmem>>, vector<16x8x2xbf16>
    %c8_80 = arith.constant 8 : index
    %c0_81 = arith.constant 0 : index
    %c4_82 = arith.constant 4 : index
    %46 = vector.load %arg15[%c8_80, %c0_81, %c4_82] : memref<32x8x8xbf16, #tpu.memory_space<vmem>>, vector<16x8x2xbf16>
    %47 = arith.maximumf %45, %46 : vector<16x8x2xbf16>
    %c9_83 = arith.constant 9 : index
    %c0_84 = arith.constant 0 : index
    %c4_85 = arith.constant 4 : index
    %48 = vector.load %arg15[%c9_83, %c0_84, %c4_85] : memref<32x8x8xbf16, #tpu.memory_space<vmem>>, vector<16x8x2xbf16>
    %49 = arith.maximumf %47, %48 : vector<16x8x2xbf16>
    %50 = arith.extf %49 : vector<16x8x2xbf16> to vector<16x8x2xf32>
    %c0_86 = arith.constant 0 : index
    %c0_87 = arith.constant 0 : index
    %c4_88 = arith.constant 4 : index
    %51 = vector.load %arg4[%c0_86, %c0_87, %c4_88] : memref<1x1x6xf32, #tpu.memory_space<vmem>>, vector<1x1x2xf32>
    %52 = vector.broadcast %51 : vector<1x1x2xf32> to vector<16x8x2xf32>
    %53 = arith.mulf %50, %52 : vector<16x8x2xf32>
    %c0_89 = arith.constant 0 : index
    %c0_90 = arith.constant 0 : index
    %c4_91 = arith.constant 4 : index
    %54 = vector.load %arg5[%c0_89, %c0_90, %c4_91] : memref<1x1x6xf32, #tpu.memory_space<vmem>>, vector<1x1x2xf32>
    %55 = vector.broadcast %54 : vector<1x1x2xf32> to vector<16x8x2xf32>
    %56 = arith.addf %53, %55 : vector<16x8x2xf32>
    %c0_92 = arith.constant 0 : index
    %c0_93 = arith.constant 0 : index
    %c4_94 = arith.constant 4 : index
    %57 = vector.load %arg16[%c0_92, %c0_93, %c4_94] : memref<16x8x8xf32, #tpu.memory_space<vmem>>, vector<16x8x2xf32>
    tpu.vector_store %arg16[%c0_92, %c0_93, %c4_94], %56 {strides = array<i32>} : memref<16x8x8xf32, #tpu.memory_space<vmem>>, vector<16x8x2xf32>,
    %c8_95 = arith.constant 8 : index
    %c0_96 = arith.constant 0 : index
    %c6_97 = arith.constant 6 : index
    %58 = vector.load %arg15[%c8_95, %c0_96, %c6_97] : memref<32x8x8xbf16, #tpu.memory_space<vmem>>, vector<16x8x2xbf16>
    %59 = arith.extf %58 : vector<16x8x2xbf16> to vector<16x8x2xf32>
    %c0_98 = arith.constant 0 : index
    %c0_99 = arith.constant 0 : index
    %c6_100 = arith.constant 6 : index
    %60 = vector.load %arg16[%c0_98, %c0_99, %c6_100] : memref<16x8x8xf32, #tpu.memory_space<vmem>>, vector<16x8x2xf32>
    tpu.vector_store %arg16[%c0_98, %c0_99, %c6_100], %59 {strides = array<i32>} : memref<16x8x8xf32, #tpu.memory_space<vmem>>, vector<16x8x2xf32>,
    %c0_101 = arith.constant 0 : index
    %c0_102 = arith.constant 0 : index
    %c0_103 = arith.constant 0 : index
    %61 = vector.load %arg16[%c0_101, %c0_102, %c0_103] : memref<16x8x8xf32, #tpu.memory_space<vmem>>, vector<16x8x8xf32>
    %c0_104 = arith.constant 0 : index
    %c0_105 = arith.constant 0 : index
    %c0_106 = arith.constant 0 : index
    %62 = vector.load %arg2[%c0_104, %c0_105, %c0_106] : memref<16x8x8xbf16, #tpu.memory_space<vmem>>, vector<16x8x8xbf16>
    %63 = arith.extf %62 : vector<16x8x8xbf16> to vector<16x8x8xf32>
    %64 = arith.addf %61, %63 : vector<16x8x8xf32>
    %cst_107 = arith.constant dense<0.000000e+00> : vector<16x8xf32>
    %65 = vector.multi_reduction <add>, %64, %cst_107 [1] : vector<16x8x8xf32> to vector<16x8xf32>
    %cst_108 = arith.constant 8.000000e+00 : f32
    %66 = vector.broadcast %cst_108 : f32 to vector<16x8xf32>
    %67 = arith.divf %65, %66 : vector<16x8xf32>
    %cst_109 = arith.constant dense<0.000000e+00> : vector<8x8xf32>
    %68 = vector.multi_reduction <add>, %64, %cst_109 [0] : vector<16x8x8xf32> to vector<8x8xf32>
    %cst_110 = arith.constant 1.600000e+01 : f32
    %69 = vector.broadcast %cst_110 : f32 to vector<8x8xf32>
    %70 = arith.divf %68, %69 : vector<8x8xf32>
    %c0_111 = arith.constant 0 : index
    %c0_112 = arith.constant 0 : index
    %71 = vector.load %arg6[%c0_111, %c0_112] : memref<4x8xbf16, #tpu.memory_space<vmem>>, vector<4x8xbf16>
    %72 = arith.truncf %70 : vector<8x8xf32> to vector<8x8xbf16>
    %cst_113 = arith.constant dense<0.000000e+00> : vector<4x8xf32>
    %73 = tpu.matmul %71, %72, %cst_113 {dimension_numbers = #tpu.dot_dimension_numbers<[1], [0], [0], [1], [0, 0, 1, 1], [], []>} : vector<4x8xbf16>, vector<8x8xbf16>, vector<4x8xf32> -> vector<4x8xf32>
    %74 = arith.truncf %67 : vector<16x8xf32> to vector<16x8xbf16>
    %c0_114 = arith.constant 0 : index
    %c0_115 = arith.constant 0 : index
    %75 = vector.load %arg7[%c0_114, %c0_115] : memref<8x4xbf16, #tpu.memory_space<vmem>>, vector<8x4xbf16>
    %cst_116 = arith.constant dense<0.000000e+00> : vector<16x4xf32>
    %76 = tpu.matmul %74, %75, %cst_116 {dimension_numbers = #tpu.dot_dimension_numbers<[1], [0], [0], [1], [0, 0, 1, 1], [], []>} : vector<16x8xbf16>, vector<8x4xbf16>, vector<16x4xf32> -> vector<16x4xf32>
    %c0_117 = arith.constant 0 : index
    %c0_118 = arith.constant 0 : index
    %77 = vector.load %arg8[%c0_117, %c0_118] : memref<1x4xf32, #tpu.memory_space<vmem>>, vector<1x4xf32>
    %78 = vector.broadcast %77 : vector<1x4xf32> to vector<16x4xf32>
    %79 = arith.addf %76, %78 : vector<16x4xf32>
    %cst_119 = arith.constant 0.000000e+00 : f32
    %80 = vector.broadcast %cst_119 : f32 to vector<16x4xf32>
    %81 = arith.maximumf %79, %80 : vector<16x4xf32>
    %82 = arith.truncf %73 : vector<4x8xf32> to vector<4x8xbf16>
    %c0_120 = arith.constant 0 : index
    %c0_121 = arith.constant 0 : index
    %83 = vector.load %arg7[%c0_120, %c0_121] : memref<8x4xbf16, #tpu.memory_space<vmem>>, vector<8x4xbf16>
    %cst_122 = arith.constant dense<0.000000e+00> : vector<4x4xf32>
    %84 = tpu.matmul %82, %83, %cst_122 {dimension_numbers = #tpu.dot_dimension_numbers<[1], [0], [0], [1], [0, 0, 1, 1], [], []>} : vector<4x8xbf16>, vector<8x4xbf16>, vector<4x4xf32> -> vector<4x4xf32>
    %c0_123 = arith.constant 0 : index
    %c0_124 = arith.constant 0 : index
    %85 = vector.load %arg8[%c0_123, %c0_124] : memref<1x4xf32, #tpu.memory_space<vmem>>, vector<1x4xf32>
    %86 = vector.broadcast %85 : vector<1x4xf32> to vector<4x4xf32>
    %87 = arith.addf %84, %86 : vector<4x4xf32>
    %cst_125 = arith.constant 0.000000e+00 : f32
    %88 = vector.broadcast %cst_125 : f32 to vector<4x4xf32>
    %89 = arith.maximumf %87, %88 : vector<4x4xf32>
    %90 = arith.truncf %81 : vector<16x4xf32> to vector<16x4xbf16>
    %c0_126 = arith.constant 0 : index
    %c0_127 = arith.constant 0 : index
    %c0_128 = arith.constant 0 : index
    %91 = vector.load %arg9[%c0_126, %c0_127, %c0_128] : memref<2x4x8xbf16, #tpu.memory_space<vmem>>, vector<1x4x8xbf16>
    %92 = vector.shape_cast %91 : vector<1x4x8xbf16> to vector<4x8xbf16>
    %cst_129 = arith.constant dense<0.000000e+00> : vector<16x8xf32>
    %93 = tpu.matmul %90, %92, %cst_129 {dimension_numbers = #tpu.dot_dimension_numbers<[1], [0], [0], [1], [0, 0, 1, 1], [], []>} : vector<16x4xbf16>, vector<4x8xbf16>, vector<16x8xf32> -> vector<16x8xf32>
    %c0_130 = arith.constant 0 : index
    %c0_131 = arith.constant 0 : index
    %94 = vector.load %arg10[%c0_130, %c0_131] : memref<2x8xf32, #tpu.memory_space<vmem>>, vector<1x8xf32>
    %95 = vector.broadcast %94 : vector<1x8xf32> to vector<16x8xf32>
    %96 = arith.addf %93, %95 : vector<16x8xf32>
    %97 = arith.negf %96 : vector<16x8xf32>
    %98 = math.exp %97 : vector<16x8xf32>
    %cst_132 = arith.constant 1.000000e+00 : f32
    %99 = vector.broadcast %cst_132 : f32 to vector<16x8xf32>
    %100 = arith.addf %99, %98 : vector<16x8xf32>
    %101 = arith.divf %99, %100 : vector<16x8xf32>
    %102 = arith.truncf %89 : vector<4x4xf32> to vector<4x4xbf16>
    %c1_133 = arith.constant 1 : index
    %c0_134 = arith.constant 0 : index
    %c0_135 = arith.constant 0 : index
    %103 = vector.load %arg9[%c1_133, %c0_134, %c0_135] : memref<2x4x8xbf16, #tpu.memory_space<vmem>>, vector<1x4x8xbf16>
    %104 = vector.shape_cast %103 : vector<1x4x8xbf16> to vector<4x8xbf16>
    %cst_136 = arith.constant dense<0.000000e+00> : vector<4x8xf32>
    %105 = tpu.matmul %102, %104, %cst_136 {dimension_numbers = #tpu.dot_dimension_numbers<[1], [0], [0], [1], [0, 0, 1, 1], [], []>} : vector<4x4xbf16>, vector<4x8xbf16>, vector<4x8xf32> -> vector<4x8xf32>
    %c1_137 = arith.constant 1 : index
    %c0_138 = arith.constant 0 : index
    %106 = vector.load %arg10[%c1_137, %c0_138] : memref<2x8xf32, #tpu.memory_space<vmem>>, vector<1x8xf32>
    %107 = vector.broadcast %106 : vector<1x8xf32> to vector<4x8xf32>
    %108 = arith.addf %105, %107 : vector<4x8xf32>
    %109 = arith.negf %108 : vector<4x8xf32>
    %110 = math.exp %109 : vector<4x8xf32>
    %cst_139 = arith.constant 1.000000e+00 : f32
    %111 = vector.broadcast %cst_139 : f32 to vector<4x8xf32>
    %112 = arith.addf %111, %110 : vector<4x8xf32>
    %113 = arith.divf %111, %112 : vector<4x8xf32>
    %c0_140 = arith.constant 0 : index
    %c0_141 = arith.constant 0 : index
    %114 = vector.load %arg11[%c0_140, %c0_141] : memref<8x4xbf16, #tpu.memory_space<vmem>>, vector<8x4xbf16>
    %115 = arith.truncf %113 : vector<4x8xf32> to vector<4x8xbf16>
    %cst_142 = arith.constant dense<0.000000e+00> : vector<8x8xf32>
    %116 = tpu.matmul %114, %115, %cst_142 {dimension_numbers = #tpu.dot_dimension_numbers<[1], [0], [0], [1], [0, 0, 1, 1], [], []>} : vector<8x4xbf16>, vector<4x8xbf16>, vector<8x8xf32> -> vector<8x8xf32>
    %117 = vector.shape_cast %101 : vector<16x8xf32> to vector<16x1x8xf32>
    %118 = vector.shape_cast %116 : vector<8x8xf32> to vector<1x8x8xf32>
    %119 = vector.broadcast %117 : vector<16x1x8xf32> to vector<16x8x8xf32>
    %120 = vector.broadcast %118 : vector<1x8x8xf32> to vector<16x8x8xf32>
    %121 = arith.mulf %119, %120 : vector<16x8x8xf32>
    %122 = arith.mulf %64, %121 : vector<16x8x8xf32>
    %c0_143 = arith.constant 0 : index
    %c0_144 = arith.constant 0 : index
    %c0_145 = arith.constant 0 : index
    %123 = vector.load %arg12[%c0_143, %c0_144, %c0_145] : memref<1x1x8xf32, #tpu.memory_space<vmem>>, vector<1x1x8xf32>
    %124 = vector.broadcast %123 : vector<1x1x8xf32> to vector<16x8x8xf32>
    %125 = arith.mulf %122, %124 : vector<16x8x8xf32>
    %c0_146 = arith.constant 0 : index
    %c0_147 = arith.constant 0 : index
    %c0_148 = arith.constant 0 : index
    %126 = vector.load %arg13[%c0_146, %c0_147, %c0_148] : memref<1x1x8xf32, #tpu.memory_space<vmem>>, vector<1x1x8xf32>
    %127 = vector.broadcast %126 : vector<1x1x8xf32> to vector<16x8x8xf32>
    %128 = arith.addf %125, %127 : vector<16x8x8xf32>
    %129 = arith.addf %128, %64 : vector<16x8x8xf32>
    %cst_149 = arith.constant 0.000000e+00 : f32
    %130 = vector.broadcast %cst_149 : f32 to vector<16x8x8xf32>
    %131 = arith.maximumf %129, %130 : vector<16x8x8xf32>
    %c0_150 = arith.constant 0 : index
    %c0_151 = arith.constant 0 : index
    %c0_152 = arith.constant 0 : index
    %132 = vector.load %arg14[%c0_150, %c0_151, %c0_152] : memref<16x8x8xf32, #tpu.memory_space<vmem>>, vector<16x8x8xf32>
    tpu.vector_store %arg14[%c0_150, %c0_151, %c0_152], %131 {strides = array<i32>} : memref<16x8x8xf32, #tpu.memory_space<vmem>>, vector<16x8x8xf32>,
    return
  }
  func.func @transform_0(%arg0: i32) -> (i32, i32, i32) {
    %c0_i32 = arith.constant 0 : i32
    %c0_i32_0 = arith.constant 0 : i32
    %c0_i32_1 = arith.constant 0 : i32
    return %arg0, %c0_i32, %c0_i32_0 : i32, i32, i32
  }
  func.func @transform_1(%arg0: i32) -> (i32, i32, i32) {
    %c0_i32 = arith.constant 0 : i32
    %c0_i32_0 = arith.constant 0 : i32
    %c0_i32_1 = arith.constant 0 : i32
    return %arg0, %c0_i32, %c0_i32_0 : i32, i32, i32
  }
  func.func @transform_2(%arg0: i32) -> (i32, i32, i32) {
    %c0_i32 = arith.constant 0 : i32
    %c0_i32_0 = arith.constant 0 : i32
    %c0_i32_1 = arith.constant 0 : i32
    %c0_i32_2 = arith.constant 0 : i32
    return %c0_i32, %c0_i32_0, %c0_i32_1 : i32, i32, i32
  }
  func.func @transform_3(%arg0: i32) -> (i32, i32, i32) {
    %c0_i32 = arith.constant 0 : i32
    %c0_i32_0 = arith.constant 0 : i32
    %c0_i32_1 = arith.constant 0 : i32
    %c0_i32_2 = arith.constant 0 : i32
    return %c0_i32, %c0_i32_0, %c0_i32_1 : i32, i32, i32
  }
  func.func @transform_4(%arg0: i32) -> (i32, i32, i32) {
    %c0_i32 = arith.constant 0 : i32
    %c0_i32_0 = arith.constant 0 : i32
    %c0_i32_1 = arith.constant 0 : i32
    %c0_i32_2 = arith.constant 0 : i32
    return %c0_i32, %c0_i32_0, %c0_i32_1 : i32, i32, i32
  }
  func.func @transform_5(%arg0: i32) -> (i32, i32) {
    %c0_i32 = arith.constant 0 : i32
    %c0_i32_0 = arith.constant 0 : i32
    %c0_i32_1 = arith.constant 0 : i32
    return %c0_i32, %c0_i32_0 : i32, i32
  }
  func.func @transform_6(%arg0: i32) -> (i32, i32) {
    %c0_i32 = arith.constant 0 : i32
    %c0_i32_0 = arith.constant 0 : i32
    %c0_i32_1 = arith.constant 0 : i32
    return %c0_i32, %c0_i32_0 : i32, i32
  }
  func.func @transform_7(%arg0: i32) -> (i32, i32) {
    %c0_i32 = arith.constant 0 : i32
    %c0_i32_0 = arith.constant 0 : i32
    %c0_i32_1 = arith.constant 0 : i32
    return %c0_i32, %c0_i32_0 : i32, i32
  }
  func.func @transform_8(%arg0: i32) -> (i32, i32, i32) {
    %c0_i32 = arith.constant 0 : i32
    %c0_i32_0 = arith.constant 0 : i32
    %c0_i32_1 = arith.constant 0 : i32
    %c0_i32_2 = arith.constant 0 : i32
    return %c0_i32, %c0_i32_0, %c0_i32_1 : i32, i32, i32
  }
  func.func @transform_9(%arg0: i32) -> (i32, i32) {
    %c0_i32 = arith.constant 0 : i32
    %c0_i32_0 = arith.constant 0 : i32
    %c0_i32_1 = arith.constant 0 : i32
    return %c0_i32, %c0_i32_0 : i32, i32
  }
  func.func @transform_10(%arg0: i32) -> (i32, i32) {
    %c0_i32 = arith.constant 0 : i32
    %c0_i32_0 = arith.constant 0 : i32
    %c0_i32_1 = arith.constant 0 : i32
    return %c0_i32, %c0_i32_0 : i32, i32
  }
  func.func @transform_11(%arg0: i32) -> (i32, i32, i32) {
    %c0_i32 = arith.constant 0 : i32
    %c0_i32_0 = arith.constant 0 : i32
    %c0_i32_1 = arith.constant 0 : i32
    %c0_i32_2 = arith.constant 0 : i32
    return %c0_i32, %c0_i32_0, %c0_i32_1 : i32, i32, i32
  }
  func.func @transform_12(%arg0: i32) -> (i32, i32, i32) {
    %c0_i32 = arith.constant 0 : i32
    %c0_i32_0 = arith.constant 0 : i32
    %c0_i32_1 = arith.constant 0 : i32
    %c0_i32_2 = arith.constant 0 : i32
    return %c0_i32, %c0_i32_0, %c0_i32_1 : i32, i32, i32
  }
  func.func @transform_13(%arg0: i32) -> (i32, i32, i32) {
    %c0_i32 = arith.constant 0 : i32
    %c0_i32_0 = arith.constant 0 : i32
    %c0_i32_1 = arith.constant 0 : i32
    return %arg0, %c0_i32, %c0_i32_0 : i32, i32, i32
  }
}

</mosaic_0001>

<bundles_post_ra>
// kernel: tile.12
= control target key start
LH: loop header
LB: loop body
LE: loop exit
PB: predicated region body
PF: predicated region fallthrough
CT: control target
= control target key end

     0   :  { %s22_s0 = inlined_call_operand.vmem [shape: f32[8], index: 0, kind: input, shape index: {}]   ;;  %s23_s1 = inlined_call_operand.vmem [shape: f32[8,8], index: 1, kind: output, shape index: {}]  }
   0x1   :  { %v4_v0 = vld [vmem:[%s22_s0] ss:$0 sm:$0xff] }
   0x2   :  { %5 = vst [vmem:[%s23_s1] sm:$0xff] %v4_v0 }

// kernel: basic_block_forward.2
= control target key start
LH: loop header
LB: loop body
LE: loop exit
PB: predicated region body
PF: predicated region fallthrough
CT: control target
= control target key end

     0   :  { %s704_s24 = smov 0   ;;  %s763_s0 = inlined_call_operand.vmem [shape: f32[32,32], index: 0, kind: input, shape index: {}]   ;;  %s764_s1 = inlined_call_operand.vmem [shape: bf16[32,64], index: 1, kind: input, shape index: {}]   ;;  %s765_s2 = inlined_call_operand.vmem [shape: f32[1,64], index: 2, kind: input, shape index: {}]   ;;  %s766_s3 = inlined_call_operand.vmem [shape: bf16[64,64], index: 3, kind: input, shape index: {}]   ;;  %s767_s4 = inlined_call_operand.vmem [shape: f32[1,64], index: 4, kind: input, shape index: {}]   ;;  %s768_s5 = inlined_call_operand.vmem [shape: f32[1,64], index: 5, kind: input, shape index: {}]   ;;  %s769_s6 = inlined_call_operand.vmem [shape: bf16[32,64], index: 6, kind: output, shape index: {0}]   ;;  %s770_s7 = inlined_call_operand.vmem [shape: bf16[32,64], index: 7, kind: output, shape index: {1}]  }
   0x1 LB: > { %s577_s25 = sadd.s32 4294967295, %s659_s24   ;;  %p581_p0 = scmp.ge.s32.totalorder %s659_s24, 1  ;;  %s659_s24 = sphi %s704_s24, %s18_s24  }
   0x2   : > { %p241_p1 = scmp.lt.s32.totalorder %s659_s24, 3 }
   0x4   : > { %p242_p2 = pnand %p581_p0, %p241_p1 }
   0x5   : > { %v647_v0 = vld [vmem:[%s764_s1] sm:$0xff] (!%p242_p2)   ;;  %v661_v1 = vmov (!%p242_p2), 0.0   ;;  %v648_v2 = vld [vmem:[%s764_s1 + $0x8] sm:$0xff] (!%p242_p2)   ;;  %vm662_vm0 = vmmov (!%p242_p2), 0   ;;  %s582_s30 = sshll.u32 (!%p242_p2), %s577_s25, 1  ;;  %vm323_vm1 = vcmask (!%p242_p2), 261120   ;;  %v470_v22 = vlaneseq (!%p242_p2) }
   0x6   : > { %245 = sbr.rel (%p242_p2) target bundleno = 461 (0x1cd), region = 44  ;;  %616 = vmatprep.subr.bf16.mxu0 (!%p242_p2), %v661_v1  ;;  %624 = vmatprep.subr.bf16.mxu1 (!%p242_p2), %v661_v1  ;;  %p279_p3 = scmp.lt.s32.totalorder (!%p242_p2), %s582_s30, 3  ;;  %v649_v3 = vld [vmem:[%s766_s3] sm:$0xff] (!%p242_p2)   ;;  %v650_v4 = vld [vmem:[%s766_s3 + $0x8] sm:$0xff] (!%p242_p2)   ;;  %v651_v8 = vld [vmem:[%s766_s3 + $0x10] sm:$0xff] (!%p242_p2)   ;;  %vm378_vm2 = vcmask (!%p242_p2), 519168  }
   0x7   : > { %617 = vmatpush3.bf16.msra.mxu0 (!%p242_p2), %v647_v0  ;;  %620 = vmatprep.mubr.msk.bf16.mxu0 (!%p242_p2), %vm662_vm0, %v661_v1  ;;  %v652_v9 = vld [vmem:[%s766_s3 + $0x18] sm:$0xff] (!%p242_p2)   ;;  %v588_v10 = vld [vmem:[%s765_s2] ss:$0 sm:$0xff] (!%p242_p2)  ;;  %vm420_vm3 = vcmask (!%p242_p2), 523264   ;;  %v471_v24 = vshrl.u32 (!%p242_p2), %v470_v22, 7  ;;  %v663_v26 = vmov (!%p242_p2), 0  }
   0x8   : > { %618 = vmatprep.subr.bf16.mxu0 (!%p242_p2), %v661_v1  ;;  %632 = vmatprep.mubr.msk.bf16.mxu1 (!%p242_p2), %vm662_vm0, %v661_v1  ;;  %v465_v23 = vld [vmem:[%s768_s5] sm:$0x1] (!%p242_p2) }
   0x9   : > { %625 = vmatpush3.bf16.msra.mxu1 (!%p242_p2), %v649_v3  ;;  %vm466_vm4 = vcmp.gt.f32.partialorder (!%p242_p2), %v465_v23, 0.0  ;;  %v472_v25 = vsub.s32 (!%p242_p2), 0, %v471_v24  ;;  %v594_v28 = vld [vmem:[%s767_s4] ss:$0 sm:$0xff] (!%p242_p2) }
   0xa   : > { %626 = vmatprep.subr.bf16.mxu1 (!%p242_p2), %v661_v1  ;;  %v469_v27 = vsel (!%p242_p2), %vm466_vm4, 1, %v663_v26 }
   0xb   : > { %619 = vmatpush3.bf16.msra.mxu0 (!%p242_p2), %v648_v2  ;;  %v473_v29 = vrot.slane (!%p242_p2), %v469_v27, %v472_v25 }
   0xd   : > { %s772_s30 = smov (!%p279_p3, %s582_s30), 3  ;;  %627 = vmatpush3.bf16.msra.mxu1 %v650_v4  ;;  %vm474_vm5 = vcmp.eq.s32.totalorder %v473_v29, 1 }
   0xe   : > { %s583_s12 = sshll.u32 %s772_s30, 3  ;;  %628 = vmatprep.subr.bf16.mxu1 %v661_v1  ;;  %s585_s22 = sshll.u32 %s772_s30, 2 }
   0xf   : > { %s282_s15 = scalar_lea.vmem %s763_s0, %s583_s12  ;;  %s288_s26 = scalar_lea.vmem %s769_s6, %s585_s22 }
  0x10   : > { %v297_v5 = vld [vmem:[%s282_s15] sm:$0xff]  ;;  %v298_v6 = vld [vmem:[%s282_s15 + $0x8] sm:$0xff]  ;;  %s294_s11 = scalar_lea.vmem %s770_s7, %s585_s22 }
  0x11   : > { %v299_v7 = vpack.c.bf16 %v298_v6, %v297_v5  ;;  %629 = vmatpush3.bf16.msra.mxu1 %v651_v8 }
  0x12   : > { %630 = vmatprep.subr.bf16.mxu1 %v661_v1 }
  0x13   : > { %621 = vmatmul.mubr.msk.bf16.vlgmr.msra.gmra.mrb[0].mxu0 %vm323_vm1, %v299_v7 }
  0x15   : > { %631 = vmatpush3.bf16.msra.mxu1 %v652_v9 }
  0xe6   : > { %v361_v11 = vpop.f32.mrb[0].mxu0 }
  0xe7   : > { %v362_v12 = vadd.f32 %v588_v10, %v361_v11  ;;  %v622_v13 = vpop.f32.mrb[1].mxu0 }
  0xe8   : > { %v364_v14 = vpop.f32.mrb[2].mxu0 }
  0xe9   : > { %v368_v15 = vmax.f32 %v362_v12, 0.0  ;;  %v365_v16 = vadd.f32 %v588_v10, %v364_v14  ;;  %v623_v17 = vpop.f32.mrb[3].mxu0 }
  0xeb   : > { %v604_v18 = vpack.c.bf16 %v368_v15, %v368_v15  ;;  %v369_v19 = vmax.f32 %v365_v16, 0.0 }
  0xed   : > { %379 = vst.msk [vmem:[%s288_s26] sm:$0xf] %vm378_vm2, %v604_v18  ;;  %v370_v20 = vpack.c.bf16 %v369_v19, %v368_v15  ;;  %v605_v21 = vpack.c.bf16 %v369_v19, %v369_v19 }
  0xef   : > { %380 = vst.msk [vmem:[%s288_s26 + $0x4] sm:$0xf] %vm378_vm2, %v605_v21  ;;  %633 = vmatmul.mubr.msk.bf16.vlgmr.msra.gmra.mrb[0].mxu1 %vm420_vm3, %v370_v20 }
 0x1c2   : > { %v458_v30 = vpop.f32.mrb[0].mxu1 }
 0x1c3   : > { %v459_v31 = vadd.f32 %v594_v28, %v458_v30  ;;  %v634_v32 = vpop.f32.mrb[1].mxu1 }
 0x1c4   : > { %v461_v33 = vpop.f32.mrb[2].mxu1 }
 0x1c5   : > { %v467_v34 = vmax.f32 %v459_v31, 0.0  ;;  %v462_v35 = vadd.f32 %v594_v28, %v461_v33  ;;  %v635_v36 = vpop.f32.mrb[3].mxu1 }
 0x1c7   : > { %v475_v37 = vsel %vm474_vm5, %v467_v34, %v459_v31  ;;  %v468_v38 = vmax.f32 %v462_v35, 0.0 }
 0x1c8   : > { %v606_v39 = vpack.c.bf16 %v475_v37, %v475_v37 }
 0x1c9   : > { %v476_v40 = vsel %vm474_vm5, %v468_v38, %v462_v35 }
 0x1ca   : > { %485 = vst.msk [vmem:[%s294_s11] sm:$0xf] %vm378_vm2, %v606_v39  ;;  %v607_v41 = vpack.c.bf16 %v476_v40, %v476_v40 }
 0x1cc   : > { %486 = vst.msk [vmem:[%s294_s11 + $0x4] sm:$0xf] %vm378_vm2, %v607_v41 }
 0x1cd PF: > { %s18_s24 = sadd.s32 1, %s659_s24  }
 0x1ce   : > { %p15_p4 = scmp.ge.s32.totalorder %s18_s24, 4  }
 0x1d0   :  { %17 = sbr.rel (!%p15_p4) target bundleno = 1 (0x1), region = 86 }

// kernel: basic_block_forward.3
= control target key start
LH: loop header
LB: loop body
LE: loop exit
PB: predicated region body
PF: predicated region fallthrough
CT: control target
= control target key end

     0   :  { %s5288_s25 = smov 0   ;;  %s6707_s0 = inlined_call_operand.vmem [shape: bf16[32,8,8], index: 0, kind: input, shape index: {}]   ;;  %s6708_s1 = inlined_call_operand.vmem [shape: bf16[32,8,8], index: 1, kind: input, shape index: {}]   ;;  %s6709_s2 = inlined_call_operand.vmem [shape: bf16[2,18,2], index: 2, kind: input, shape index: {}]   ;;  %s6710_s3 = inlined_call_operand.vmem [shape: f32[1,1,6], index: 3, kind: input, shape index: {}]   ;;  %s6711_s4 = inlined_call_operand.vmem [shape: f32[1,1,6], index: 4, kind: input, shape index: {}]   ;;  %s6712_s5 = inlined_call_operand.vmem [shape: bf16[4,8], index: 5, kind: input, shape index: {}]   ;;  %s6713_s6 = inlined_call_operand.vmem [shape: bf16[8,4], index: 6, kind: input, shape index: {}]   ;;  %s6714_s7 = inlined_call_operand.vmem [shape: f32[1,4], index: 7, kind: input, shape index: {}]   ;;  %s6715_s8 = inlined_call_operand.vmem [shape: bf16[2,4,8], index: 8, kind: input, shape index: {}]   ;;  %s6716_s9 = inlined_call_operand.vmem [shape: f32[2,8], index: 9, kind: input, shape index: {}]   ;;  %s6717_s10 = inlined_call_operand.vmem [shape: bf16[8,4], index: 10, kind: input, shape index: {}]   ;;  %s6718_s11 = inlined_call_operand.vmem [shape: f32[1,1,8], index: 11, kind: input, shape index: {}]   ;;  %s6719_s12 = inlined_call_operand.vmem [shape: f32[1,1,8], index: 12, kind: input, shape index: {}]   ;;  %s6720_s13 = inlined_call_operand.vmem [shape: f32[32,8,8], index: 13, kind: output, shape index: {}]  }
   0x1 LB: > { %s4385_s26 = sadd.s32 4294967295, %s5203_s25   ;;  %p4389_p0 = scmp.ge.s32.totalorder %s5203_s25, 1  ;;  %s5203_s25 = sphi %s5288_s25, %s23_s25  }
   0x2   : > { %p399_p1 = scmp.lt.s32.totalorder %s5203_s25, 3 }
   0x4   : > { %p400_p2 = pnand %p4389_p0, %p399_p1 }
   0x5   : > { %vm467_vm0 = vcmask (!%p400_p2), 60416   ;;  %v5205_v0 = vmov (!%p400_p2), 0   ;;  %s4390_s27 = sshll.u32 (!%p400_p2), %s4385_s26, 4  ;;  %s5206_s29 = smov (!%p400_p2), 126   ;;  %v5011_v52 = vld [vmem:[%s6709_s2 + $0xc] sm:$0xff] (!%p400_p2)   ;;  %vm1667_vm1 = vcmask (!%p400_p2), 1040384  }
   0x6   : > { %403 = sbr.rel (%p400_p2) target bundleno = 1814 (0x716), region = 72  ;;  %470 = vst.msk [vmem:[#allocation2 + $0x8] sm:$0xf] (!%p400_p2), %vm467_vm0, %v5205_v0  ;;  %468 = vst.msk [vmem:[#allocation2] sm:$0xf] (!%p400_p2), %vm467_vm0, %v5205_v0  ;;  %p449_p3 = scmp.lt.s32.totalorder (!%p400_p2), %s4390_s27, 31  ;;  %4844 = vmatprep.subr.bf16.mxu1 (!%p400_p2), %v5011_v52 }
   0x7   : > { %469 = vst.msk [vmem:[#allocation2 + $0x4] sm:$0xf] (!%p400_p2), %vm467_vm0, %v5205_v0  ;;  %471 = vst.msk [vmem:[#allocation2 + $0xc] sm:$0xf] (!%p400_p2), %vm467_vm0, %v5205_v0  ;;  %s5207_s16 = smov (!%p400_p2), 2   ;;  %s5208_s17 = smov (!%p400_p2), 4   ;;  %4845 = vmatpush3.bf16.msra.mxu1 (!%p400_p2), %v5011_v52 }
   0x8   : > { %472 = vst.msk [vmem:[#allocation2 + $0x10] sm:$0xf] (!%p400_p2), %vm467_vm0, %v5205_v0  ;;  %473 = vst.msk [vmem:[#allocation2 + $0x14] sm:$0xf] (!%p400_p2), %vm467_vm0, %v5205_v0  ;;  %s5209_s18 = smov (!%p400_p2), 6   ;;  %s5210_s19 = smov (!%p400_p2), 8  }
   0x9   : > { %474 = vst.msk [vmem:[#allocation2 + $0x18] sm:$0xf] (!%p400_p2), %vm467_vm0, %v5205_v0  ;;  %475 = vst.msk [vmem:[#allocation2 + $0x1c] sm:$0xf] (!%p400_p2), %vm467_vm0, %v5205_v0  ;;  %s5211_s20 = smov (!%p400_p2), 10   ;;  %s5212_s21 = smov (!%p400_p2), 12  }
   0xa   : > { %477 = vst.msk [vmem:[#allocation2 + $0x60] sm:$0xf] (!%p400_p2), %vm467_vm0, %v5205_v0  ;;  %478 = vst.msk [vmem:[#allocation2 + $0x64] sm:$0xf] (!%p400_p2), %vm467_vm0, %v5205_v0  ;;  %s5213_s22 = smov (!%p400_p2), 14   ;;  %vm1310_vm2 = vcmask (!%p400_p2), 15360  }
   0xb   : > { %479 = vst.msk [vmem:[#allocation2 + $0x68] sm:$0xf] (!%p400_p2), %vm467_vm0, %v5205_v0  ;;  %480 = vst.msk [vmem:[#allocation2 + $0x6c] sm:$0xf] (!%p400_p2), %vm467_vm0, %v5205_v0  ;;  %vm1359_vm3 = vcmask (!%p400_p2), 31744   ;;  %vm1392_vm4 = vcmask (!%p400_p2), 48128  }
   0xc   : > { %481 = vst.msk [vmem:[#allocation2 + $0x70] sm:$0xf] (!%p400_p2), %vm467_vm0, %v5205_v0  ;;  %482 = vst.msk [vmem:[#allocation2 + $0x74] sm:$0xf] (!%p400_p2), %vm467_vm0, %v5205_v0  ;;  %vm1425_vm5 = vcmask (!%p400_p2), 64512   ;;  %vm1458_vm6 = vcmask (!%p400_p2), 80896  }
   0xd   : > { %483 = vst.msk [vmem:[#allocation2 + $0x78] sm:$0xf] %vm467_vm0, %v5205_v0  ;;  %484 = vst.msk [vmem:[#allocation2 + $0x7c] sm:$0xf] %vm467_vm0, %v5205_v0  ;;  %s6722_s27 = smov (!%p449_p3, %s4390_s27), 31  ;;  %vm1491_vm7 = vcmask 97280  }
   0xe   : > { %s4391_s28 = sshll.u32 %s6722_s27, 2  ;;  %v4923_v1 = vld [vmem:[#allocation2 + $0x8] ss:$0 sps:$4 sm:$0xff]   ;;  %v4924_v2 = vld [vmem:[#allocation2] ss:$0 sps:$4 sm:$0xff]   ;;  %vm1524_vm8 = vcmask 113664  }
   0xf   : > { %2029 = vrot.lane.b32.xlu1 %v4923_v1, %s5206_s29  ;;  %v4925_v3 = vld [vmem:[#allocation2 + $0xc] ss:$0 sps:$4 sm:$0xff]   ;;  %2025 = vrot.lane.b32.xlu0 %v4924_v2, %s5206_s29  ;;  %v4926_v4 = vld [vmem:[#allocation2 + $0x4] ss:$0 sps:$4 sm:$0xff]   ;;  %s5322_s15 = scalar_lea.vmem %s6707_s0, %s4391_s28  ;;  %v4927_v5 = vld [vmem:[#allocation2 + $0x14] ss:$0 sps:$4 sm:$0xff]  }
  0x10   : > { %v4928_v6 = vld [vmem:[#allocation2 + $0x10] ss:$0 sps:$4 sm:$0xff]   ;;  %v486_v7 = vld [vmem:[%s5322_s15 + $0x4] sm:$0xf]  ;;  %v485_v8 = vld [vmem:[%s5322_s15] sm:$0xf] }
  0x11   : > { %503 = vst.msk [vmem:[#allocation2 + $0x24] sm:$0xf] %vm467_vm0, %v486_v7  ;;  %v488_v9 = vld [vmem:[%s5322_s15 + $0xc] sm:$0xf]  ;;  %v487_v10 = vld [vmem:[%s5322_s15 + $0x8] sm:$0xf] }
  0x12   : > { %502 = vst.msk [vmem:[#allocation2 + $0x20] sm:$0xf] %vm467_vm0, %v485_v8  ;;  %505 = vst.msk [vmem:[#allocation2 + $0x2c] sm:$0xf] %vm467_vm0, %v488_v9  ;;  %v490_v11 = vld [vmem:[%s5322_s15 + $0x14] sm:$0xf] }
  0x13   : > { %2031 = vrot.lane.b32.xlu1 %v4925_v3, %s5206_s29  ;;  %2027 = vrot.lane.b32.xlu0 %v4926_v4, %s5206_s29  ;;  %504 = vst.msk [vmem:[#allocation2 + $0x28] sm:$0xf] %vm467_vm0, %v487_v10  ;;  %v489_v12 = vld [vmem:[%s5322_s15 + $0x10] sm:$0xf]  ;;  %v492_v13 = vld [vmem:[%s5322_s15 + $0x1c] sm:$0xf] }
  0x14   : > { %507 = vst.msk [vmem:[#allocation2 + $0x34] sm:$0xf] %vm467_vm0, %v490_v11  ;;  %506 = vst.msk [vmem:[#allocation2 + $0x30] sm:$0xf] %vm467_vm0, %v489_v12  ;;  %v491_v14 = vld [vmem:[%s5322_s15 + $0x18] sm:$0xf] }
  0x15   : > { %509 = vst.msk [vmem:[#allocation2 + $0x3c] sm:$0xf] %vm467_vm0, %v492_v13  ;;  %v494_v15 = vld [vmem:[%s5322_s15 + $0x24] sm:$0xf]  ;;  %v493_v16 = vld [vmem:[%s5322_s15 + $0x20] sm:$0xf] }
  0x16   : > { %v4929_v17 = vld [vmem:[#allocation2 + $0x1c] ss:$0 sps:$4 sm:$0xff]   ;;  %508 = vst.msk [vmem:[#allocation2 + $0x38] sm:$0xf] %vm467_vm0, %v491_v14  ;;  %511 = vst.msk [vmem:[#allocation2 + $0x44] sm:$0xf] %vm467_vm0, %v494_v15 }
  0x17   : > { %2107 = vrot.lane.b32.xlu1 %v4927_v5, %s5207_s16  ;;  %510 = vst.msk [vmem:[#allocation2 + $0x40] sm:$0xf] %vm467_vm0, %v493_v16  ;;  %2105 = vrot.lane.b32.xlu0 %v4928_v6, %s5207_s16  ;;  %v4930_v18 = vld [vmem:[#allocation2 + $0x18] ss:$0 sps:$4 sm:$0xff]   ;;  %v496_v19 = vld [vmem:[%s5322_s15 + $0x2c] sm:$0xf] }
  0x18   : > { %v495_v20 = vld [vmem:[%s5322_s15 + $0x28] sm:$0xf]  ;;  %513 = vst.msk [vmem:[#allocation2 + $0x4c] sm:$0xf] %vm467_vm0, %v496_v19  ;;  %v4931_v21 = vld [vmem:[#allocation2 + $0x1c] ss:$0 sps:$4 sm:$0xff]  }
  0x19   : > { %512 = vst.msk [vmem:[#allocation2 + $0x48] sm:$0xf] %vm467_vm0, %v495_v20  ;;  %v4932_v22 = vld [vmem:[#allocation2 + $0x18] ss:$0 sps:$4 sm:$0xff]   ;;  %v4933_v23 = vld [vmem:[#allocation2 + $0x24] ss:$0 sps:$4 sm:$0xff]  }
  0x1a   : > { %v4934_v24 = vld [vmem:[#allocation2 + $0x20] ss:$0 sps:$4 sm:$0xff]   ;;  %v4935_v25 = vld [vmem:[#allocation2 + $0x24] ss:$0 sps:$4 sm:$0xff]   ;;  %v4937_v27 = vld [vmem:[#allocation2 + $0x2c] ss:$0 sps:$4 sm:$0xff]  }
  0x1b   : > { %2111 = vrot.lane.b32.xlu1 %v4929_v17, %s5207_s16  ;;  %2109 = vrot.lane.b32.xlu0 %v4930_v18, %s5207_s16  ;;  %v4936_v26 = vld [vmem:[#allocation2 + $0x20] ss:$0 sps:$4 sm:$0xff]   ;;  %v4938_v28 = vld [vmem:[#allocation2 + $0x28] ss:$0 sps:$4 sm:$0xff]   ;;  %v4939_v29 = vld [vmem:[#allocation2 + $0x2c] ss:$0 sps:$4 sm:$0xff]  }
  0x1c   : > { %v4940_v30 = vld [vmem:[#allocation2 + $0x28] ss:$0 sps:$4 sm:$0xff]   ;;  %v4941_v31 = vld [vmem:[#allocation2 + $0x34] ss:$0 sps:$4 sm:$0xff]   ;;  %v4942_v32 = vld [vmem:[#allocation2 + $0x30] ss:$0 sps:$4 sm:$0xff]  }
  0x1d   : > { %v4943_v33 = vld [vmem:[#allocation2 + $0x34] ss:$0 sps:$4 sm:$0xff]   ;;  %v4944_v34 = vld [vmem:[#allocation2 + $0x30] ss:$0 sps:$4 sm:$0xff]   ;;  %v4945_v35 = vld [vmem:[#allocation2 + $0x3c] ss:$0 sps:$4 sm:$0xff]  }
  0x1e   : > { %v4946_v36 = vld [vmem:[#allocation2 + $0x38] ss:$0 sps:$4 sm:$0xff]   ;;  %v498_v37 = vld [vmem:[%s5322_s15 + $0x34] sm:$0xf]  ;;  %v497_v38 = vld [vmem:[%s5322_s15 + $0x30] sm:$0xf] }
  0x1f   : > { %2187 = vrot.lane.b32.xlu1 %v4931_v21, %s5208_s17  ;;  %2185 = vrot.lane.b32.xlu0 %v4932_v22, %s5208_s17  ;;  %515 = vst.msk [vmem:[#allocation2 + $0x54] sm:$0xf] %vm467_vm0, %v498_v37  ;;  %514 = vst.msk [vmem:[#allocation2 + $0x50] sm:$0xf] %vm467_vm0, %v497_v38  ;;  %v4947_v39 = vld [vmem:[#allocation2 + $0x3c] ss:$0 sps:$4 sm:$0xff]  }
  0x20   : > { %v500_v40 = vld [vmem:[%s5322_s15 + $0x3c] sm:$0xf]  ;;  %v499_v41 = vld [vmem:[%s5322_s15 + $0x38] sm:$0xf]  ;;  %v4949_v43 = vld [vmem:[#allocation2 + $0x44] ss:$0 sps:$4 sm:$0xff]  }
  0x21   : > { %v4948_v42 = vld [vmem:[#allocation2 + $0x38] ss:$0 sps:$4 sm:$0xff]   ;;  %517 = vst.msk [vmem:[#allocation2 + $0x5c] sm:$0xf] %vm467_vm0, %v500_v40  ;;  %516 = vst.msk [vmem:[#allocation2 + $0x58] sm:$0xf] %vm467_vm0, %v499_v41 }
  0x22   : > { %v4950_v44 = vld [vmem:[#allocation2 + $0x40] ss:$0 sps:$4 sm:$0xff]   ;;  %v4951_v45 = vld [vmem:[#allocation2 + $0x44] ss:$0 sps:$4 sm:$0xff]   ;;  %v4953_v47 = vld [vmem:[#allocation2 + $0x14] ss:$0 sps:$4 sm:$0xff]  }
  0x23   : > { %2191 = vrot.lane.b32.xlu1 %v4933_v23, %s5208_s17  ;;  %2189 = vrot.lane.b32.xlu0 %v4934_v24, %s5208_s17  ;;  %v4952_v46 = vld [vmem:[#allocation2 + $0x40] ss:$0 sps:$4 sm:$0xff]   ;;  %v4954_v48 = vld [vmem:[#allocation2 + $0x10] ss:$0 sps:$4 sm:$0xff]   ;;  %v4955_v49 = vld [vmem:[#allocation2 + $0x4c] ss:$0 sps:$4 sm:$0xff]  }
  0x24   : > { %v4956_v50 = vld [vmem:[#allocation2 + $0x48] ss:$0 sps:$4 sm:$0xff]   ;;  %v4957_v51 = vld [vmem:[#allocation2 + $0x1c] ss:$0 sps:$4 sm:$0xff]   ;;  %v4958_v53 = vld [vmem:[#allocation2 + $0x18] ss:$0 sps:$4 sm:$0xff]  }
  0x25   : > { %v5014_v54 = vld [vmem:[%s6709_s2 + $0x14] ss:$0 sps:$4 sm:$0x11]   ;;  %v4959_v55 = vld [vmem:[#allocation2 + $0x24] ss:$0 sps:$4 sm:$0xff]   ;;  %vm1557_vm9 = vcmask 130048  }
  0x26   : > { %v4960_v56 = vld [vmem:[#allocation2 + $0x20] ss:$0 sps:$4 sm:$0xff]   ;;  %4901 = vmatprep.subr.msk.bf16.mxu1 %vm1667_vm1, %v5014_v54  ;;  %v2967_v57 = vsel %vm1667_vm1, %v5014_v54, 0  ;;  %v4961_v58 = vld [vmem:[#allocation2 + $0x2c] ss:$0 sps:$4 sm:$0xff]   ;;  %vm1642_vm10 = vcmask 146432  }
  0x27   : > { %2267 = vrot.lane.b32.xlu1 %v4935_v25, %s5209_s18  ;;  %2265 = vrot.lane.b32.xlu0 %v4936_v26, %s5209_s18  ;;  %v4962_v59 = vld [vmem:[#allocation2 + $0x28] ss:$0 sps:$4 sm:$0xff]   ;;  %v4963_v60 = vld [vmem:[#allocation2 + $0x2c] ss:$0 sps:$4 sm:$0xff]   ;;  %v4965_v62 = vld [vmem:[#allocation2 + $0x34] ss:$0 sps:$4 sm:$0xff]  }
  0x28   : > { %4847 = vmatpush3.bf16.msra.mxu1 %v2967_v57  ;;  %v4964_v61 = vld [vmem:[#allocation2 + $0x28] ss:$0 sps:$4 sm:$0xff]   ;;  %v4966_v63 = vld [vmem:[#allocation2 + $0x30] ss:$0 sps:$4 sm:$0xff]   ;;  %v4967_v0 = vld [vmem:[#allocation2 + $0x34] ss:$0 sps:$4 sm:$0xff]  }
  0x29   : > { %v4968_v1 = vld [vmem:[#allocation2 + $0x30] ss:$0 sps:$4 sm:$0xff]   ;;  %v4969_v2 = vld [vmem:[#allocation2 + $0x3c] ss:$0 sps:$4 sm:$0xff]   ;;  %v4970_v3 = vld [vmem:[#allocation2 + $0x38] ss:$0 sps:$4 sm:$0xff]  }
  0x2a   : > { %v4971_v4 = vld [vmem:[#allocation2 + $0x3c] ss:$0 sps:$4 sm:$0xff]   ;;  %v4972_v5 = vld [vmem:[#allocation2 + $0x38] ss:$0 sps:$4 sm:$0xff]   ;;  %v4973_v6 = vld [vmem:[#allocation2 + $0x44] ss:$0 sps:$4 sm:$0xff]  }
  0x2b   : > { %2271 = vrot.lane.b32.xlu1 %v4937_v27, %s5209_s18  ;;  %2269 = vrot.lane.b32.xlu0 %v4938_v28, %s5209_s18  ;;  %v4974_v7 = vld [vmem:[#allocation2 + $0x40] ss:$0 sps:$4 sm:$0xff]   ;;  %v4975_v8 = vld [vmem:[#allocation2 + $0x44] ss:$0 sps:$4 sm:$0xff]   ;;  %v4977_v10 = vld [vmem:[#allocation2 + $0x4c] ss:$0 sps:$4 sm:$0xff]  }
  0x2c   : > { %v4976_v9 = vld [vmem:[#allocation2 + $0x40] ss:$0 sps:$4 sm:$0xff]   ;;  %v4978_v11 = vld [vmem:[#allocation2 + $0x48] ss:$0 sps:$4 sm:$0xff]   ;;  %v4979_v12 = vld [vmem:[#allocation2 + $0x4c] ss:$0 sps:$4 sm:$0xff]  }
  0x2d   : > { %v4980_v13 = vld [vmem:[#allocation2 + $0x48] ss:$0 sps:$4 sm:$0xff]   ;;  %v4981_v14 = vld [vmem:[#allocation2 + $0x54] ss:$0 sps:$4 sm:$0xff]   ;;  %v4982_v15 = vld [vmem:[#allocation2 + $0x50] ss:$0 sps:$4 sm:$0xff]  }
  0x2e   : > { %v4983_v18 = vld [vmem:[#allocation2 + $0x54] ss:$0 sps:$4 sm:$0xff]   ;;  %v4984_v19 = vld [vmem:[#allocation2 + $0x50] ss:$0 sps:$4 sm:$0xff]   ;;  %v4985_v22 = vld [vmem:[#allocation2 + $0x24] ss:$0 sps:$4 sm:$0xff]  }
  0x2f   : > { %2347 = vrot.lane.b32.xlu1 %v4939_v29, %s5210_s19  ;;  %2345 = vrot.lane.b32.xlu0 %v4940_v30, %s5210_s19  ;;  %v4986_v23 = vld [vmem:[#allocation2 + $0x20] ss:$0 sps:$4 sm:$0xff]   ;;  %v4987_v26 = vld [vmem:[#allocation2 + $0x5c] ss:$0 sps:$4 sm:$0xff]   ;;  %v4988_v27 = vld [vmem:[#allocation2 + $0x58] ss:$0 sps:$4 sm:$0xff]  }
  0x30   : > { %v4989_v30 = vld [vmem:[#allocation2 + $0x2c] ss:$0 sps:$4 sm:$0xff]   ;;  %v4993_v38 = vld [vmem:[#allocation2 + $0x3c] ss:$0 sps:$4 sm:$0xff]   ;;  %s5214_s26 = smov 16   ;;  %vm3180_vm11 = vcmask 31760  }
  0x31   : > { %v5001_v54 = vld [vmem:[#allocation2 + $0x4c] ss:$0 sps:$4 sm:$0xff]   ;;  %vm3339_vm12 = vcmask 48160   ;;  %vm3388_vm13 = vcmask 64560   ;;  %vm5216_vm14 = vmmov 0   ;;  %vm3620_vm15 = vcmask 1043456  }
  0x32   : > { %vm3720_vm0 = vcmask 1041409  }
  0x33   : > { %2351 = vrot.lane.b32.xlu1 %v4941_v31, %s5210_s19  ;;  %2349 = vrot.lane.b32.xlu0 %v4942_v32, %s5210_s19  ;;  %v4990_v31 = vld [vmem:[#allocation2 + $0x28] ss:$0 sps:$4 sm:$0xff]  }
  0x37   : > { %2427 = vrot.lane.b32.xlu1 %v4943_v33, %s5211_s20  ;;  %2425 = vrot.lane.b32.xlu0 %v4944_v34, %s5211_s20  ;;  %v4991_v34 = vld [vmem:[#allocation2 + $0x34] ss:$0 sps:$4 sm:$0xff]  }
  0x3b   : > { %2431 = vrot.lane.b32.xlu1 %v4945_v35, %s5211_s20  ;;  %2429 = vrot.lane.b32.xlu0 %v4946_v36, %s5211_s20  ;;  %v4992_v35 = vld [vmem:[#allocation2 + $0x30] ss:$0 sps:$4 sm:$0xff]  }
  0x3f   : > { %2507 = vrot.lane.b32.xlu1 %v4947_v39, %s5212_s21  ;;  %2505 = vrot.lane.b32.xlu0 %v4948_v42, %s5212_s21  ;;  %v4994_v39 = vld [vmem:[#allocation2 + $0x38] ss:$0 sps:$4 sm:$0xff]   ;;  %v4995_v42 = vld [vmem:[#allocation2 + $0x3c] ss:$0 sps:$4 sm:$0xff]  }
  0x43   : > { %2511 = vrot.lane.b32.xlu1 %v4949_v43, %s5212_s21  ;;  %2509 = vrot.lane.b32.xlu0 %v4950_v44, %s5212_s21  ;;  %v4996_v43 = vld [vmem:[#allocation2 + $0x38] ss:$0 sps:$4 sm:$0xff]  }
  0x47   : > { %2587 = vrot.lane.b32.xlu1 %v4951_v45, %s5213_s22  ;;  %2585 = vrot.lane.b32.xlu0 %v4952_v46, %s5213_s22  ;;  %v4997_v46 = vld [vmem:[#allocation2 + $0x44] ss:$0 sps:$4 sm:$0xff]  }
  0x4b   : > { %2035 = vrot.lane.b32.xlu1 %v4953_v47, %s5206_s29  ;;  %2033 = vrot.lane.b32.xlu0 %v4954_v48, %s5206_s29  ;;  %v4998_v47 = vld [vmem:[#allocation2 + $0x40] ss:$0 sps:$4 sm:$0xff]  }
  0x4f   : > { %2591 = vrot.lane.b32.xlu1 %v4955_v49, %s5213_s22  ;;  %2589 = vrot.lane.b32.xlu0 %v4956_v50, %s5213_s22  ;;  %v4999_v50 = vld [vmem:[#allocation2 + $0x44] ss:$0 sps:$4 sm:$0xff]  }
  0x53   : > { %2039 = vrot.lane.b32.xlu1 %v4957_v51, %s5206_s29  ;;  %2037 = vrot.lane.b32.xlu0 %v4958_v53, %s5206_s29  ;;  %v5000_v51 = vld [vmem:[#allocation2 + $0x40] ss:$0 sps:$4 sm:$0xff]  }
  0x57   : > { %2115 = vrot.lane.b32.xlu1 %v4959_v55, %s5207_s16  ;;  %2113 = vrot.lane.b32.xlu0 %v4960_v56, %s5207_s16  ;;  %v5002_v55 = vld [vmem:[#allocation2 + $0x48] ss:$0 sps:$4 sm:$0xff]  }
  0x5b   : > { %2119 = vrot.lane.b32.xlu1 %v4961_v58, %s5207_s16  ;;  %2117 = vrot.lane.b32.xlu0 %v4962_v59, %s5207_s16  ;;  %v5003_v58 = vld [vmem:[#allocation2 + $0x4c] ss:$0 sps:$4 sm:$0xff]   ;;  %v5004_v59 = vld [vmem:[#allocation2 + $0x48] ss:$0 sps:$4 sm:$0xff]  }
  0x5f   : > { %2195 = vrot.lane.b32.xlu1 %v4963_v60, %s5208_s17  ;;  %2193 = vrot.lane.b32.xlu0 %v4964_v61, %s5208_s17 }
  0x63   : > { %2199 = vrot.lane.b32.xlu1 %v4965_v62, %s5208_s17  ;;  %2197 = vrot.lane.b32.xlu0 %v4966_v63, %s5208_s17  ;;  %v5005_v62 = vld [vmem:[#allocation2 + $0x54] ss:$0 sps:$4 sm:$0xff]   ;;  %v1848_v63 = vld [vmem:[#allocation2 + $0xc] sm:$0xf] }
  0x67   : > { %2275 = vrot.lane.b32.xlu1 %v4967_v0, %s5209_s18  ;;  %2273 = vrot.lane.b32.xlu0 %v4968_v1, %s5209_s18  ;;  %v5006_v0 = vld [vmem:[#allocation2 + $0x50] ss:$0 sps:$4 sm:$0xff]   ;;  %v1847_v1 = vld [vmem:[#allocation2 + $0x8] sm:$0xf] }
  0x6b   : > { %2279 = vrot.lane.b32.xlu1 %v4969_v2, %s5209_s18  ;;  %2277 = vrot.lane.b32.xlu0 %v4970_v3, %s5209_s18 }
  0x6f   : > { %2355 = vrot.lane.b32.xlu1 %v4971_v4, %s5210_s19  ;;  %2353 = vrot.lane.b32.xlu0 %v4972_v5, %s5210_s19  ;;  %v5007_v5 = vld [vmem:[#allocation2 + $0x54] ss:$0 sps:$4 sm:$0xff]  }
  0x73   : > { %2359 = vrot.lane.b32.xlu1 %v4973_v6, %s5210_s19  ;;  %2357 = vrot.lane.b32.xlu0 %v4974_v7, %s5210_s19 }
  0x77   : > { %2435 = vrot.lane.b32.xlu1 %v4975_v8, %s5211_s20  ;;  %2433 = vrot.lane.b32.xlu0 %v4976_v9, %s5211_s20  ;;  %v5008_v8 = vld [vmem:[#allocation2 + $0x50] ss:$0 sps:$4 sm:$0xff]  }
  0x7b   : > { %2439 = vrot.lane.b32.xlu1 %v4977_v10, %s5211_s20  ;;  %2437 = vrot.lane.b32.xlu0 %v4978_v11, %s5211_s20 }
  0x7f   : > { %2515 = vrot.lane.b32.xlu1 %v4979_v12, %s5212_s21  ;;  %2513 = vrot.lane.b32.xlu0 %v4980_v13, %s5212_s21 }
  0x81   : > { %v5420_v16 = vpop.permute.xlu1 %2029  ;;  %v5422_v17 = vpop.permute.xlu0 %2025 }
  0x82   : > { %v2619_v6 = vsel %vm1310_vm2, %v5422_v17, %v1847_v1  ;;  %v5022_v1 = vld [vmem:[#allocation2 + $0x68] ss:$0 sps:$4 sm:$0xff]  }
  0x83   : > { %2519 = vrot.lane.b32.xlu1 %v4981_v14, %s5212_s21  ;;  %2517 = vrot.lane.b32.xlu0 %v4982_v15, %s5212_s21 }
  0x85   : > { %v5426_v20 = vpop.permute.xlu1 %2031  ;;  %v5428_v21 = vpop.permute.xlu0 %2027 }
  0x86   : > { %v2622_v4 = vsel %vm1310_vm2, %v5428_v21, %v1848_v63 }
  0x87   : > { %2595 = vrot.lane.b32.xlu1 %v4983_v18, %s5213_s22  ;;  %2593 = vrot.lane.b32.xlu0 %v4984_v19, %s5213_s22  ;;  %v5009_v18 = vld [vmem:[#allocation2 + $0x5c] ss:$0 sps:$4 sm:$0xff]   ;;  %v1850_v19 = vld [vmem:[#allocation2 + $0x14] sm:$0xf] }
  0x89   : > { %v5432_v24 = vpop.permute.xlu1 %2107  ;;  %v5434_v25 = vpop.permute.xlu0 %2105 }
  0x8a   : > { %v2668_v7 = vsel %vm1359_vm3, %v2622_v4, %v5432_v24  ;;  %v2666_v9 = vsel %vm1359_vm3, %v2619_v6, %v5434_v25  ;;  %v1849_v24 = vld [vmem:[#allocation2 + $0x10] sm:$0xf]  ;;  %v5023_v4 = vld [vmem:[#allocation2 + $0x3c] ss:$0 sps:$4 sm:$0xff]  }
  0x8b   : > { %2043 = vrot.lane.b32.xlu1 %v4985_v22, %s5206_s29  ;;  %2041 = vrot.lane.b32.xlu0 %v4986_v23, %s5206_s29  ;;  %v5010_v23 = vld [vmem:[#allocation2 + $0x58] ss:$0 sps:$4 sm:$0xff]  }
  0x8d   : > { %v5438_v28 = vpop.permute.xlu1 %2111  ;;  %v5440_v29 = vpop.permute.xlu0 %2109 }
  0x8f   : > { %2599 = vrot.lane.b32.xlu1 %v4987_v26, %s5213_s22  ;;  %2597 = vrot.lane.b32.xlu0 %v4988_v27, %s5213_s22 }
  0x91   : > { %v5444_v32 = vpop.permute.xlu1 %2187  ;;  %v5446_v33 = vpop.permute.xlu0 %2185 }
  0x92   : > { %v2700_v10 = vsel %vm1392_vm4, %v2668_v7, %v5444_v32  ;;  %v2698_v12 = vsel %vm1392_vm4, %v2666_v9, %v5446_v33  ;;  %v2628_v33 = vsel %vm1310_vm2, %v5426_v20, %v1850_v19  ;;  %v5026_v9 = vld [vmem:[#allocation2 + $0x40] ss:$0 sps:$4 sm:$0xff]  }
  0x93   : > { %2047 = vrot.lane.b32.xlu1 %v4989_v30, %s5206_s29  ;;  %2045 = vrot.lane.b32.xlu0 %v4990_v31, %s5206_s29 }
  0x95   : > { %v5450_v36 = vpop.permute.xlu1 %2191  ;;  %v5452_v37 = vpop.permute.xlu0 %2189 }
  0x97   : > { %2123 = vrot.lane.b32.xlu1 %v4991_v34, %s5207_s16  ;;  %2121 = vrot.lane.b32.xlu0 %v4992_v35, %s5207_s16  ;;  %v5012_v35 = vld [vmem:[#allocation2 + $0x5c] ss:$0 sps:$4 sm:$0xff]  }
  0x99   : > { %v2268_v40 = vpop.permute.xlu1 %2267  ;;  %v2266_v41 = vpop.permute.xlu0 %2265 }
  0x9a   : > { %v2732_v13 = vsel %vm1425_vm5, %v2700_v10, %v2268_v40  ;;  %v2730_v15 = vsel %vm1425_vm5, %v2698_v12, %v2266_v41  ;;  %v5013_v41 = vld [vmem:[#allocation2 + $0x58] ss:$0 sps:$4 sm:$0xff]   ;;  %v5027_v12 = vld [vmem:[#allocation2 + $0x4c] ss:$0 sps:$4 sm:$0xff]  }
  0x9b   : > { %2127 = vrot.lane.b32.xlu1 %v4993_v38, %s5207_s16  ;;  %2125 = vrot.lane.b32.xlu0 %v4994_v39, %s5207_s16  ;;  %v2625_v38 = vsel %vm1310_vm2, %v5420_v16, %v1849_v24  ;;  %v2672_v39 = vsel %vm1359_vm3, %v2628_v33, %v5438_v28  ;;  %v5036_v33 = vld [vmem:[#allocation2 + $0x58] ss:$0 sps:$4 sm:$0xff]  }
  0x9c   : > { %v2704_v20 = vsel %vm1392_vm4, %v2672_v39, %v5450_v36  ;;  %v5015_v36 = vld [vmem:[#allocation2 + $0x64] ss:$0 sps:$4 sm:$0xff]   ;;  %v5038_v39 = vld [vmem:[#allocation2 + $0x58] ss:$0 sps:$4 sm:$0xff]  }
  0x9d   : > { %v5458_v44 = vpop.permute.xlu1 %2271  ;;  %v5460_v45 = vpop.permute.xlu0 %2269 }
  0x9e   : > { %v2736_v16 = vsel %vm1425_vm5, %v2704_v20, %v5458_v44  ;;  %v5016_v44 = vld [vmem:[#allocation2 + $0x60] ss:$0 sps:$4 sm:$0xff]   ;;  %v1852_v20 = vld [vmem:[#allocation2 + $0x1c] sm:$0xf] }
  0x9f   : > { %2203 = vrot.lane.b32.xlu1 %v4995_v42, %s5208_s17  ;;  %2201 = vrot.lane.b32.xlu0 %v4996_v43, %s5208_s17  ;;  %v2670_v42 = vsel %vm1359_vm3, %v2625_v38, %v5440_v29  ;;  %v5037_v38 = vld [vmem:[#allocation2 + $0x5c] ss:$0 sps:$4 sm:$0xff]  }
  0xa1   : > { %v2348_v48 = vpop.permute.xlu1 %2347  ;;  %v2346_v49 = vpop.permute.xlu0 %2345 }
  0xa2   : > { %v2764_v17 = vsel %vm1458_vm6, %v2732_v13, %v2348_v48  ;;  %v2762_v21 = vsel %vm1458_vm6, %v2730_v15, %v2346_v49  ;;  %v5028_v13 = vld [vmem:[#allocation2 + $0x48] ss:$0 sps:$4 sm:$0xff]  }
  0xa3   : > { %2207 = vrot.lane.b32.xlu1 %v4997_v46, %s5208_s17  ;;  %2205 = vrot.lane.b32.xlu0 %v4998_v47, %s5208_s17  ;;  %v2702_v46 = vsel %vm1392_vm4, %v2670_v42, %v5452_v37  ;;  %v5039_v42 = vld [vmem:[#allocation2 + $0x64] ss:$0 sps:$4 sm:$0xff]  }
  0xa4   : > { %v2734_v47 = vsel %vm1425_vm5, %v2702_v46, %v5460_v45  ;;  %v5040_v46 = vld [vmem:[#allocation2 + $0x60] ss:$0 sps:$4 sm:$0xff]  }
  0xa5   : > { %v5466_v52 = vpop.permute.xlu1 %2351  ;;  %v5468_v53 = vpop.permute.xlu0 %2349 }
  0xa6   : > { %v2768_v29 = vsel %vm1458_vm6, %v2736_v16, %v5466_v52  ;;  %v2766_v48 = vsel %vm1458_vm6, %v2734_v47, %v5468_v53  ;;  %v5017_v53 = vld [vmem:[#allocation2 + $0x64] ss:$0 sps:$4 sm:$0xff]   ;;  %v1851_v16 = vld [vmem:[#allocation2 + $0x18] sm:$0xf] }
  0xa7   : > { %2283 = vrot.lane.b32.xlu1 %v4999_v50, %s5209_s18  ;;  %2281 = vrot.lane.b32.xlu0 %v5000_v51, %s5209_s18 }
  0xa9   : > { %v2428_v56 = vpop.permute.xlu1 %2427  ;;  %v2426_v57 = vpop.permute.xlu0 %2425 }
  0xaa   : > { %v2796_v22 = vsel %vm1491_vm7, %v2764_v17, %v2428_v56  ;;  %v2794_v25 = vsel %vm1491_vm7, %v2762_v21, %v2426_v57  ;;  %v5018_v57 = vld [vmem:[#allocation2 + $0x60] ss:$0 sps:$4 sm:$0xff]   ;;  %v5029_v17 = vld [vmem:[#allocation2 + $0x4c] ss:$0 sps:$4 sm:$0xff]  }
  0xab   : > { %2287 = vrot.lane.b32.xlu1 %v5001_v54, %s5209_s18  ;;  %2285 = vrot.lane.b32.xlu0 %v5002_v55, %s5209_s18 }
  0xad   : > { %v5474_v60 = vpop.permute.xlu1 %2431  ;;  %v5476_v61 = vpop.permute.xlu0 %2429 }
  0xae   : > { %v2800_v37 = vsel %vm1491_vm7, %v2768_v29, %v5474_v60  ;;  %v2798_v49 = vsel %vm1491_vm7, %v2766_v48, %v5476_v61  ;;  %v5019_v60 = vld [vmem:[#allocation2 + $0x34] ss:$0 sps:$4 sm:$0xff]   ;;  %v5020_v61 = vld [vmem:[#allocation2 + $0x30] ss:$0 sps:$4 sm:$0xff]   ;;  %v5041_v48 = vld [vmem:[#allocation2 + $0x64] ss:$0 sps:$4 sm:$0xff]  }
  0xaf   : > { %2363 = vrot.lane.b32.xlu1 %v5003_v58, %s5210_s19  ;;  %2361 = vrot.lane.b32.xlu0 %v5004_v59, %s5210_s19 }
  0xb1   : > { %v2508_v2 = vpop.permute.xlu1 %2507  ;;  %v2506_v3 = vpop.permute.xlu0 %2505 }
  0xb2   : > { %v2828_v26 = vsel %vm1524_vm8, %v2796_v22, %v2508_v2  ;;  %v2826_v30 = vsel %vm1524_vm8, %v2794_v25, %v2506_v3  ;;  %v5031_v22 = vld [vmem:[#allocation2 + $0x54] ss:$0 sps:$4 sm:$0xff]  }
  0xb3   : > { %2367 = vrot.lane.b32.xlu1 %v5005_v62, %s5210_s19  ;;  %2365 = vrot.lane.b32.xlu0 %v5006_v0, %s5210_s19  ;;  %v5021_v0 = vld [vmem:[#allocation2 + $0x6c] ss:$0 sps:$4 sm:$0xff]  }
  0xb5   : > { %v2512_v11 = vpop.permute.xlu1 %2511  ;;  %v2510_v14 = vpop.permute.xlu0 %2509 }
  0xb6   : > { %v2832_v45 = vsel %vm1524_vm8, %v2800_v37, %v2512_v11  ;;  %v2830_v51 = vsel %vm1524_vm8, %v2798_v49, %v2510_v14  ;;  %v5042_v49 = vld [vmem:[#allocation2 + $0x60] ss:$0 sps:$4 sm:$0xff]  }
  0xb7   : > { %2443 = vrot.lane.b32.xlu1 %v5007_v5, %s5211_s20  ;;  %2441 = vrot.lane.b32.xlu0 %v5008_v8, %s5211_s20  ;;  %v5024_v5 = vld [vmem:[#allocation2 + $0x38] ss:$0 sps:$4 sm:$0xff]   ;;  %v5025_v8 = vld [vmem:[#allocation2 + $0x44] ss:$0 sps:$4 sm:$0xff]  }
  0xb9   : > { %v2588_v27 = vpop.permute.xlu1 %2587  ;;  %v2586_v32 = vpop.permute.xlu0 %2585 }
  0xba   : > { %v2860_v31 = vsel %vm1557_vm9, %v2828_v26, %v2588_v27  ;;  %v2858_v34 = vsel %vm1557_vm9, %v2826_v30, %v2586_v32  ;;  %v5033_v26 = vld [vmem:[#allocation2 + $0x54] ss:$0 sps:$4 sm:$0xff]   ;;  %v5034_v27 = vld [vmem:[#allocation2 + $0x50] ss:$0 sps:$4 sm:$0xff]   ;;  %v5035_v32 = vld [vmem:[#allocation2 + $0x5c] ss:$0 sps:$4 sm:$0xff]  }
  0xbb   : > { %2447 = vrot.lane.b32.xlu1 %v5009_v18, %s5211_s20  ;;  %2445 = vrot.lane.b32.xlu0 %v5010_v23, %s5211_s20  ;;  %v4675_v40 = vcombine.low %v2858_v34, %v2860_v31  ;;  %v5030_v18 = vld [vmem:[#allocation2 + $0x48] ss:$0 sps:$4 sm:$0xff]   ;;  %v5032_v23 = vld [vmem:[#allocation2 + $0x50] ss:$0 sps:$4 sm:$0xff]  }
  0xbd   : > { %v5518_v43 = vpop.permute.xlu1 %2035  ;;  %4848 = vmatprep.mubr.msk.bf16.mxu1 %vm1642_vm10, %v4675_v40  ;;  %v5525_v28 = vpop.permute.xlu0 %2033 }
  0xbe   : > { %v2631_v37 = vsel %vm1310_vm2, %v5525_v28, %v1851_v16  ;;  %v5054_v16 = vld [vmem:[#allocation2 + $0x14] ss:$0 sps:$4 sm:$0xff]  }
  0xbf   : > { %2523 = vrot.lane.b32.xlu1 %v5012_v35, %s5212_s21  ;;  %2521 = vrot.lane.b32.xlu0 %v5013_v41, %s5212_s21 }
  0xc1   : > { %v2592_v50 = vpop.permute.xlu1 %2591  ;;  %v2590_v54 = vpop.permute.xlu0 %2589 }
  0xc2   : > { %v2864_v52 = vsel %vm1557_vm9, %v2832_v45, %v2592_v50  ;;  %v2862_v55 = vsel %vm1557_vm9, %v2830_v51, %v2590_v54 }
  0xc3   : > { %2527 = vrot.lane.b32.xlu1 %v5015_v36, %s5212_s21  ;;  %v4676_v56 = vcombine.low %v2862_v55, %v2864_v52  ;;  %2525 = vrot.lane.b32.xlu0 %v5016_v44, %s5212_s21  ;;  %v2634_v36 = vsel %vm1310_vm2, %v5518_v43, %v1852_v20 }
  0xc5   : > { %v5545_v58 = vpop.permute.xlu1 %2039  ;;  %4849 = vmatmul.mubr.msk.bf16.vlgmr.msra.gmra.mrb[0].mxu1 %vm1642_vm10, %v4676_v56  ;;  %v5548_v59 = vpop.permute.xlu0 %2037  ;;  %v1854_v56 = vld [vmem:[#allocation2 + $0x24] sm:$0xf] }
  0xc7   : > { %2603 = vrot.lane.b32.xlu1 %v5017_v53, %s5213_s22  ;;  %2601 = vrot.lane.b32.xlu0 %v5018_v57, %s5213_s22  ;;  %v5043_v53 = vld [vmem:[#allocation2 + $0x6c] ss:$0 sps:$4 sm:$0xff]  }
  0xc9   : > { %v5552_v62 = vpop.permute.xlu1 %2115  ;;  %v5554_v63 = vpop.permute.xlu0 %2113 }
  0xca   : > { %v2676_v44 = vsel %vm1359_vm3, %v2634_v36, %v5552_v62  ;;  %v2674_v45 = vsel %vm1359_vm3, %v2631_v37, %v5554_v63  ;;  %v1853_v62 = vld [vmem:[#allocation2 + $0x20] sm:$0xf] }
  0xcb   : > { %2051 = vrot.lane.b32.xlu1 %v5019_v60, %s5206_s29  ;;  %2049 = vrot.lane.b32.xlu0 %v5020_v61, %s5206_s29  ;;  %v5044_v61 = vld [vmem:[#allocation2 + $0x68] ss:$0 sps:$4 sm:$0xff]   ;;  %v5056_v36 = vld [vmem:[#allocation2 + $0x20] ss:$0 sps:$4 sm:$0xff]  }
  0xcd   : > { %v5558_v2 = vpop.permute.xlu1 %2119  ;;  %v5560_v3 = vpop.permute.xlu0 %2117 }
  0xcf   : > { %2607 = vrot.lane.b32.xlu1 %v5021_v0, %s5213_s22  ;;  %2605 = vrot.lane.b32.xlu0 %v5022_v1, %s5213_s22 }
  0xd1   : > { %v2196_v6 = vpop.permute.xlu1 %2195  ;;  %v2194_v7 = vpop.permute.xlu0 %2193 }
  0xd2   : > { %v2708_v50 = vsel %vm1392_vm4, %v2676_v44, %v2196_v6  ;;  %v2706_v43 = vsel %vm1392_vm4, %v2674_v45, %v2194_v7  ;;  %v2640_v7 = vsel %vm1310_vm2, %v5545_v58, %v1854_v56  ;;  %v5057_v45 = vld [vmem:[#allocation2 + $0x18] ss:$0 sps:$4 sm:$0xff]  }
  0xd3   : > { %2055 = vrot.lane.b32.xlu1 %v5023_v4, %s5206_s29  ;;  %2053 = vrot.lane.b32.xlu0 %v5024_v5, %s5206_s29 }
  0xd5   : > { %v5566_v10 = vpop.permute.xlu1 %2199  ;;  %v5568_v11 = vpop.permute.xlu0 %2197 }
  0xd7   : > { %2131 = vrot.lane.b32.xlu1 %v5025_v8, %s5207_s16  ;;  %2129 = vrot.lane.b32.xlu0 %v5026_v9, %s5207_s16  ;;  %v5045_v9 = vld [vmem:[#allocation2 + $0x6c] ss:$0 sps:$4 sm:$0xff]  }
  0xd9   : > { %v2276_v14 = vpop.permute.xlu1 %2275  ;;  %v2274_v15 = vpop.permute.xlu0 %2273 }
  0xda   : > { %v2740_v52 = vsel %vm1425_vm5, %v2708_v50, %v2276_v14  ;;  %v2738_v55 = vsel %vm1425_vm5, %v2706_v43, %v2274_v15  ;;  %v5046_v15 = vld [vmem:[#allocation2 + $0x68] ss:$0 sps:$4 sm:$0xff]   ;;  %v5060_v43 = vld [vmem:[#allocation2 + $0x24] ss:$0 sps:$4 sm:$0xff]  }
  0xdb   : > { %2135 = vrot.lane.b32.xlu1 %v5027_v12, %s5207_s16  ;;  %2133 = vrot.lane.b32.xlu0 %v5028_v13, %s5207_s16  ;;  %v2637_v12 = vsel %vm1310_vm2, %v5548_v59, %v1853_v62  ;;  %v2680_v13 = vsel %vm1359_vm3, %v2640_v7, %v5558_v2  ;;  %v5067_v7 = vld [vmem:[#allocation2 + $0x28] ss:$0 sps:$4 sm:$0xff]  }
  0xdc   : > { %v2712_v58 = vsel %vm1392_vm4, %v2680_v13, %v5566_v10  ;;  %v5047_v10 = vld [vmem:[#allocation2 + $0x74] ss:$0 sps:$4 sm:$0xff]   ;;  %v5069_v13 = vld [vmem:[#allocation2 + $0x24] ss:$0 sps:$4 sm:$0xff]  }
  0xdd   : > { %v5574_v19 = vpop.permute.xlu1 %2279  ;;  %v5576_v21 = vpop.permute.xlu0 %2277 }
  0xde   : > { %v2744_v59 = vsel %vm1425_vm5, %v2712_v58, %v5574_v19  ;;  %v5048_v19 = vld [vmem:[#allocation2 + $0x70] ss:$0 sps:$4 sm:$0xff]   ;;  %v1856_v58 = vld [vmem:[#allocation2 + $0x2c] sm:$0xf] }
  0xdf   : > { %2211 = vrot.lane.b32.xlu1 %v5029_v17, %s5208_s17  ;;  %2209 = vrot.lane.b32.xlu0 %v5030_v18, %s5208_s17  ;;  %v2678_v17 = vsel %vm1359_vm3, %v2637_v12, %v5560_v3  ;;  %v5070_v12 = vld [vmem:[#allocation2 + $0x28] ss:$0 sps:$4 sm:$0xff]  }
  0xe1   : > { %v2356_v24 = vpop.permute.xlu1 %2355  ;;  %v2354_v25 = vpop.permute.xlu0 %2353 }
  0xe2   : > { %v2772_v28 = vsel %vm1458_vm6, %v2740_v52, %v2356_v24  ;;  %v2770_v57 = vsel %vm1458_vm6, %v2738_v55, %v2354_v25  ;;  %v5059_v52 = vld [vmem:[#allocation2 + $0x20] ss:$0 sps:$4 sm:$0xff]  }
  0xe3   : > { %2215 = vrot.lane.b32.xlu1 %v5031_v22, %s5208_s17  ;;  %2213 = vrot.lane.b32.xlu0 %v5032_v23, %s5208_s17  ;;  %v2710_v22 = vsel %vm1392_vm4, %v2678_v17, %v5568_v11  ;;  %v5072_v17 = vld [vmem:[#allocation2 + $0x30] ss:$0 sps:$4 sm:$0xff]  }
  0xe4   : > { %v2742_v23 = vsel %vm1425_vm5, %v2710_v22, %v5576_v21  ;;  %v5071_v22 = vld [vmem:[#allocation2 + $0x2c] ss:$0 sps:$4 sm:$0xff]  }
  0xe5   : > { %v5582_v30 = vpop.permute.xlu1 %2359  ;;  %v5584_v31 = vpop.permute.xlu0 %2357 }
  0xe6   : > { %v2776_v3 = vsel %vm1458_vm6, %v2744_v59, %v5582_v30  ;;  %v2774_v24 = vsel %vm1458_vm6, %v2742_v23, %v5584_v31  ;;  %v5049_v31 = vld [vmem:[#allocation2 + $0x74] ss:$0 sps:$4 sm:$0xff]   ;;  %v1855_v59 = vld [vmem:[#allocation2 + $0x28] sm:$0xf] }
  0xe7   : > { %2291 = vrot.lane.b32.xlu1 %v5033_v26, %s5209_s18  ;;  %2289 = vrot.lane.b32.xlu0 %v5034_v27, %s5209_s18 }
  0xe9   : > { %v2436_v34 = vpop.permute.xlu1 %2435  ;;  %v2434_v35 = vpop.permute.xlu0 %2433 }
  0xea   : > { %v2804_v60 = vsel %vm1491_vm7, %v2772_v28, %v2436_v34  ;;  %v2802_v63 = vsel %vm1491_vm7, %v2770_v57, %v2434_v35  ;;  %v5050_v35 = vld [vmem:[#allocation2 + $0x70] ss:$0 sps:$4 sm:$0xff]   ;;  %v5062_v28 = vld [vmem:[#allocation2 + $0x20] ss:$0 sps:$4 sm:$0xff]  }
  0xeb   : > { %2295 = vrot.lane.b32.xlu1 %v5035_v32, %s5209_s18  ;;  %2293 = vrot.lane.b32.xlu0 %v5036_v33, %s5209_s18 }
  0xed   : > { %v2440_v40 = vpop.permute.xlu1 %2439  ;;  %v5590_v41 = vpop.permute.xlu0 %2437 }
  0xee   : > { %v2808_v11 = vsel %vm1491_vm7, %v2776_v3, %v2440_v40  ;;  %v2806_v25 = vsel %vm1491_vm7, %v2774_v24, %v5590_v41  ;;  %v5051_v40 = vld [vmem:[#allocation2 + $0x7c] ss:$0 sps:$4 sm:$0xff]   ;;  %v5052_v41 = vld [vmem:[#allocation2 + $0x78] ss:$0 sps:$4 sm:$0xff]   ;;  %v5074_v24 = vld [vmem:[#allocation2 + $0x2c] ss:$0 sps:$4 sm:$0xff]  }
  0xef   : > { %2371 = vrot.lane.b32.xlu1 %v5037_v38, %s5210_s19  ;;  %2369 = vrot.lane.b32.xlu0 %v5038_v39, %s5210_s19 }
  0xf1   : > { %v2516_v47 = vpop.permute.xlu1 %2515  ;;  %v2514_v29 = vpop.permute.xlu0 %2513 }
  0xf2   : > { %v2836_v0 = vsel %vm1524_vm8, %v2804_v60, %v2516_v47  ;;  %v2834_v4 = vsel %vm1524_vm8, %v2802_v63, %v2514_v29  ;;  %v5064_v60 = vld [vmem:[#allocation2 + $0x28] ss:$0 sps:$4 sm:$0xff]  }
  0xf3   : > { %2375 = vrot.lane.b32.xlu1 %v5039_v42, %s5210_s19  ;;  %2373 = vrot.lane.b32.xlu0 %v5040_v46, %s5210_s19  ;;  %v5053_v46 = vld [vmem:[#allocation2 + $0x18] ss:$0 sps:$4 sm:$0xff]  }
  0xf5   : > { %v2520_v51 = vpop.permute.xlu1 %2519  ;;  %v2518_v54 = vpop.permute.xlu0 %2517 }
  0xf6   : > { %v2840_v26 = vsel %vm1524_vm8, %v2808_v11, %v2520_v51  ;;  %v2838_v27 = vsel %vm1524_vm8, %v2806_v25, %v2518_v54  ;;  %v5073_v25 = vld [vmem:[#allocation2 + $0x28] ss:$0 sps:$4 sm:$0xff]  }
  0xf7   : > { %2451 = vrot.lane.b32.xlu1 %v5041_v48, %s5211_s20  ;;  %2449 = vrot.lane.b32.xlu0 %v5042_v49, %s5211_s20  ;;  %v5055_v48 = vld [vmem:[#allocation2 + $0x1c] ss:$0 sps:$4 sm:$0xff]  }
  0xf8   : > { %v5058_v49 = vld [vmem:[#allocation2 + $0x1c] ss:$0 sps:$4 sm:$0xff]  }
  0xf9   : > { %v2596_v1 = vpop.permute.xlu1 %2595  ;;  %v2594_v6 = vpop.permute.xlu0 %2593 }
  0xfa   : > { %v2868_v5 = vsel %vm1557_vm9, %v2836_v0, %v2596_v1  ;;  %v2866_v8 = vsel %vm1557_vm9, %v2834_v4, %v2594_v6  ;;  %v5066_v0 = vld [vmem:[#allocation2 + $0x24] ss:$0 sps:$4 sm:$0xff]   ;;  %v5065_v1 = vld [vmem:[#allocation2 + $0x20] ss:$0 sps:$4 sm:$0xff]   ;;  %v5068_v6 = vld [vmem:[#allocation2 + $0x2c] ss:$0 sps:$4 sm:$0xff]  }
  0xfb   : > { %2455 = vrot.lane.b32.xlu1 %v5043_v53, %s5211_s20  ;;  %v4677_v14 = vcombine.low %v2866_v8, %v2868_v5  ;;  %2453 = vrot.lane.b32.xlu0 %v5044_v61, %s5211_s20  ;;  %v5061_v53 = vld [vmem:[#allocation2 + $0x1c] ss:$0 sps:$4 sm:$0xff]   ;;  %v5063_v61 = vld [vmem:[#allocation2 + $0x24] ss:$0 sps:$4 sm:$0xff]  }
  0xfd   : > { %v5630_v18 = vpop.permute.xlu1 %2043  ;;  %4852 = vmatprep.mubr.msk.bf16.mxu1 %vm1642_vm10, %v4677_v14  ;;  %v5637_v2 = vpop.permute.xlu0 %2041 }
  0xfe   : > { %v2643_v11 = vsel %vm1310_vm2, %v5637_v2, %v1855_v59 }
  0xff   : > { %2531 = vrot.lane.b32.xlu1 %v5045_v9, %s5212_s21  ;;  %2529 = vrot.lane.b32.xlu0 %v5046_v15, %s5212_s21 }
 0x101   : > { %v2600_v21 = vpop.permute.xlu1 %2599  ;;  %v2598_v32 = vpop.permute.xlu0 %2597 }
 0x102   : > { %v2872_v30 = vsel %vm1557_vm9, %v2840_v26, %v2600_v21  ;;  %v2870_v33 = vsel %vm1557_vm9, %v2838_v27, %v2598_v32 }
 0x103   : > { %2535 = vrot.lane.b32.xlu1 %v5047_v10, %s5212_s21  ;;  %v4678_v34 = vcombine.low %v2870_v33, %v2872_v30  ;;  %2533 = vrot.lane.b32.xlu0 %v5048_v19, %s5212_s21  ;;  %v2646_v10 = vsel %vm1310_vm2, %v5630_v18, %v1856_v58  ;;  %v5084_v58 = vld [vmem:[#allocation2 + $0x28] ss:$0 sps:$4 sm:$0xff]  }
 0x105   : > { %v5656_v38 = vpop.permute.xlu1 %2047  ;;  %4853 = vmatmul.mubr.msk.bf16.gmra.mrb[4].mxu1 %vm1642_vm10, %v4678_v34  ;;  %v5659_v39 = vpop.permute.xlu0 %2045  ;;  %v1858_v34 = vld [vmem:[#allocation2 + $0x34] sm:$0xf] }
 0x107   : > { %2611 = vrot.lane.b32.xlu1 %v5049_v31, %s5213_s22  ;;  %2609 = vrot.lane.b32.xlu0 %v5050_v35, %s5213_s22  ;;  %v5076_v31 = vld [vmem:[#allocation2 + $0x34] ss:$0 sps:$4 sm:$0xff]  }
 0x109   : > { %v5663_v42 = vpop.permute.xlu1 %2123  ;;  %v5665_v20 = vpop.permute.xlu0 %2121 }
 0x10a   : > { %v2684_v19 = vsel %vm1359_vm3, %v2646_v10, %v5663_v42  ;;  %v2682_v26 = vsel %vm1359_vm3, %v2643_v11, %v5665_v20  ;;  %v1857_v42 = vld [vmem:[#allocation2 + $0x30] sm:$0xf]  ;;  %v5085_v10 = vld [vmem:[#allocation2 + $0x38] ss:$0 sps:$4 sm:$0xff]  }
 0x10b   : > { %2615 = vrot.lane.b32.xlu1 %v5051_v40, %s5213_s22  ;;  %2613 = vrot.lane.b32.xlu0 %v5052_v41, %s5213_s22  ;;  %v5075_v41 = vld [vmem:[#allocation2 + $0x30] ss:$0 sps:$4 sm:$0xff]  }
 0x10d   : > { %v5669_v47 = vpop.permute.xlu1 %2127  ;;  %v5671_v29 = vpop.permute.xlu0 %2125 }
 0x10f   : > { %720 = vrot.lane.b32.xlu1 %v5053_v46, %s5207_s16  ;;  %718 = vrot.lane.b32.xlu0 %v5054_v16, %s5207_s16 }
 0x111   : > { %v2204_v37 = vpop.permute.xlu1 %2203  ;;  %v2202_v44 = vpop.permute.xlu0 %2201 }
 0x112   : > { %v2716_v21 = vsel %vm1392_vm4, %v2684_v19, %v2204_v37  ;;  %v2714_v18 = vsel %vm1392_vm4, %v2682_v26, %v2202_v44  ;;  %v2652_v44 = vsel %vm1310_vm2, %v5656_v38, %v1858_v34  ;;  %v5088_v19 = vld [vmem:[#allocation2 + $0x30] ss:$0 sps:$4 sm:$0xff]  }
 0x113   : > { %724 = vrot.lane.b32.xlu1 %v5056_v36, %s5207_s16  ;;  %722 = vrot.lane.b32.xlu0 %v5055_v48, %s5207_s16 }
 0x115   : > { %v5677_v50 = vpop.permute.xlu1 %2207  ;;  %v5679_v51 = vpop.permute.xlu0 %2205 }
 0x117   : > { %800 = vrot.lane.b32.xlu1 %v5058_v49, %s5208_s17  ;;  %798 = vrot.lane.b32.xlu0 %v5057_v45, %s5208_s17  ;;  %v5078_v45 = vld [vmem:[#allocation2 + $0x30] ss:$0 sps:$4 sm:$0xff]  }
 0x119   : > { %v2284_v54 = vpop.permute.xlu1 %2283  ;;  %v2282_v55 = vpop.permute.xlu0 %2281 }
 0x11a   : > { %v2748_v30 = vsel %vm1425_vm5, %v2716_v21, %v2284_v54  ;;  %v2746_v33 = vsel %vm1425_vm5, %v2714_v18, %v2282_v55  ;;  %v5077_v55 = vld [vmem:[#allocation2 + $0x2c] ss:$0 sps:$4 sm:$0xff]   ;;  %v5089_v18 = vld [vmem:[#allocation2 + $0x28] ss:$0 sps:$4 sm:$0xff]  }
 0x11b   : > { %804 = vrot.lane.b32.xlu1 %v5060_v43, %s5208_s17  ;;  %802 = vrot.lane.b32.xlu0 %v5059_v52, %s5208_s17  ;;  %v2649_v43 = vsel %vm1310_vm2, %v5659_v39, %v1857_v42  ;;  %v2688_v52 = vsel %vm1359_vm3, %v2652_v44, %v5669_v47 }
 0x11c   : > { %v2686_v38 = vsel %vm1359_vm3, %v2649_v43, %v5671_v29  ;;  %v5099_v43 = vld [vmem:[#allocation2 + $0x38] ss:$0 sps:$4 sm:$0xff]  }
 0x11d   : > { %v5685_v56 = vpop.permute.xlu1 %2287  ;;  %v5687_v57 = vpop.permute.xlu0 %2285  ;;  %v2718_v39 = vsel %vm1392_vm4, %v2686_v38, %v5679_v51 }
 0x11f   : > { %880 = vrot.lane.b32.xlu1 %v5062_v28, %s5209_s18  ;;  %878 = vrot.lane.b32.xlu0 %v5061_v53, %s5209_s18  ;;  %v5141_v28 = vld [vmem:[%s6709_s2] sm:$0xff]   ;;  %v2720_v53 = vsel %vm1392_vm4, %v2688_v52, %v5677_v50  ;;  %v5080_v50 = vld [vmem:[#allocation2 + $0x38] ss:$0 sps:$4 sm:$0xff]  }
 0x120   : > { %v2752_v47 = vsel %vm1425_vm5, %v2720_v53, %v5685_v56  ;;  %4824 = vmatprep.subr.bf16.mxu0 %v5141_v28 }
 0x121   : > { %v2364_v62 = vpop.permute.xlu1 %2363  ;;  %v2362_v63 = vpop.permute.xlu0 %2361  ;;  %4825 = vmatpush3.bf16.msra.mxu0 %v5141_v28  ;;  %v5101_v28 = vld [vmem:[#allocation2 + $0x34] ss:$0 sps:$4 sm:$0xff]  }
 0x122   : > { %v2780_v2 = vsel %vm1458_vm6, %v2748_v30, %v2364_v62  ;;  %v2778_v35 = vsel %vm1458_vm6, %v2746_v33, %v2362_v63  ;;  %v2750_v62 = vsel %vm1425_vm5, %v2718_v39, %v5687_v57  ;;  %v5079_v63 = vld [vmem:[#allocation2 + $0x34] ss:$0 sps:$4 sm:$0xff]   ;;  %v5144_v57 = vld [vmem:[%s6709_s2 + $0x8] ss:$0 sps:$4 sm:$0x11]  }
 0x123   : > { %884 = vrot.lane.b32.xlu1 %v5064_v60, %s5209_s18  ;;  %882 = vrot.lane.b32.xlu0 %v5063_v61, %s5209_s18  ;;  %v5092_v33 = vld [vmem:[#allocation2 + $0x34] ss:$0 sps:$4 sm:$0xff]   ;;  %v5104_v39 = vld [vmem:[#allocation2 + $0x40] ss:$0 sps:$4 sm:$0xff]  }
 0x124   : > { %4900 = vmatprep.subr.msk.bf16.mxu0 %vm1667_vm1, %v5144_v57 }
 0x125   : > { %v5693_v4 = vpop.permute.xlu1 %2367  ;;  %v5695_v5 = vpop.permute.xlu0 %2365 }
 0x126   : > { %v2784_v29 = vsel %vm1458_vm6, %v2752_v47, %v5693_v4  ;;  %v2782_v51 = vsel %vm1458_vm6, %v2750_v62, %v5695_v5  ;;  %v1860_v47 = vld [vmem:[#allocation2 + $0x3c] sm:$0xf] }
 0x127   : > { %960 = vrot.lane.b32.xlu1 %v5066_v0, %s5210_s19  ;;  %958 = vrot.lane.b32.xlu0 %v5065_v1, %s5210_s19  ;;  %v5103_v62 = vld [vmem:[#allocation2 + $0x3c] ss:$0 sps:$4 sm:$0xff]  }
 0x129   : > { %v2444_v8 = vpop.permute.xlu1 %2443  ;;  %v2442_v9 = vpop.permute.xlu0 %2441 }
 0x12a   : > { %v2812_v40 = vsel %vm1491_vm7, %v2780_v2, %v2444_v8  ;;  %v2810_v20 = vsel %vm1491_vm7, %v2778_v35, %v2442_v9  ;;  %v1669_v8 = vsel %vm1667_vm1, %v5144_v57, 0  ;;  %v5091_v2 = vld [vmem:[#allocation2 + $0x30] ss:$0 sps:$4 sm:$0xff]   ;;  %vm3722_vm1 = vcmask 1042434  }
 0x12b   : > { %964 = vrot.lane.b32.xlu1 %v5068_v6, %s5210_s19  ;;  %962 = vrot.lane.b32.xlu0 %v5067_v7, %s5210_s19  ;;  %v5094_v35 = vld [vmem:[#allocation2 + $0x30] ss:$0 sps:$4 sm:$0xff]  }
 0x12c   : > { %4827 = vmatpush3.bf16.msra.mxu0 %v1669_v8 }
 0x12d   : > { %v5701_v14 = vpop.permute.xlu1 %2447  ;;  %v5703_v15 = vpop.permute.xlu0 %2445 }
 0x12e   : > { %v2816_v56 = vsel %vm1491_vm7, %v2784_v29, %v5701_v14  ;;  %v2814_v0 = vsel %vm1491_vm7, %v2782_v51, %v5703_v15  ;;  %v5081_v14 = vld [vmem:[#allocation2 + $0x30] ss:$0 sps:$4 sm:$0xff]   ;;  %v1859_v29 = vld [vmem:[#allocation2 + $0x38] sm:$0xf] }
 0x12f   : > { %1040 = vrot.lane.b32.xlu1 %v5070_v12, %s5211_s20  ;;  %1038 = vrot.lane.b32.xlu0 %v5069_v13, %s5211_s20  ;;  %v5082_v12 = vld [vmem:[#allocation2 + $0x34] ss:$0 sps:$4 sm:$0xff]  }
 0x131   : > { %v2524_v23 = vpop.permute.xlu1 %2523  ;;  %v2522_v3 = vpop.permute.xlu0 %2521 }
 0x132   : > { %v2844_v46 = vsel %vm1524_vm8, %v2812_v40, %v2524_v23  ;;  %v2842_v36 = vsel %vm1524_vm8, %v2810_v20, %v2522_v3  ;;  %v5086_v3 = vld [vmem:[#allocation2 + $0x3c] ss:$0 sps:$4 sm:$0xff]   ;;  %v5093_v40 = vld [vmem:[#allocation2 + $0x2c] ss:$0 sps:$4 sm:$0xff]   ;;  %v5096_v20 = vld [vmem:[#allocation2 + $0x38] ss:$0 sps:$4 sm:$0xff]  }
 0x133   : > { %1044 = vrot.lane.b32.xlu1 %v5072_v17, %s5211_s20  ;;  %1042 = vrot.lane.b32.xlu0 %v5071_v22, %s5211_s20  ;;  %v5083_v22 = vld [vmem:[#allocation2 + $0x24] ss:$0 sps:$4 sm:$0xff]  }
 0x135   : > { %v2528_v27 = vpop.permute.xlu1 %2527  ;;  %v2526_v32 = vpop.permute.xlu0 %2525 }
 0x136   : > { %v2848_v1 = vsel %vm1524_vm8, %v2816_v56, %v2528_v27  ;;  %v2846_v6 = vsel %vm1524_vm8, %v2814_v0, %v2526_v32  ;;  %v5090_v27 = vld [vmem:[#allocation2 + $0x2c] ss:$0 sps:$4 sm:$0xff]   ;;  %v1862_v0 = vld [vmem:[#allocation2 + $0x44] sm:$0xf] }
 0x137   : > { %1120 = vrot.lane.b32.xlu1 %v5074_v24, %s5212_s21  ;;  %1118 = vrot.lane.b32.xlu0 %v5073_v25, %s5212_s21  ;;  %v5087_v25 = vld [vmem:[#allocation2 + $0x2c] ss:$0 sps:$4 sm:$0xff]  }
 0x139   : > { %v2604_v16 = vpop.permute.xlu1 %2603  ;;  %v2602_v37 = vpop.permute.xlu0 %2601 }
 0x13a   : > { %v2876_v48 = vsel %vm1557_vm9, %v2844_v46, %v2604_v16  ;;  %v2874_v49 = vsel %vm1557_vm9, %v2842_v36, %v2602_v37  ;;  %v5095_v46 = vld [vmem:[#allocation2 + $0x34] ss:$0 sps:$4 sm:$0xff]   ;;  %v5097_v37 = vld [vmem:[#allocation2 + $0x30] ss:$0 sps:$4 sm:$0xff]  }
 0x13b   : > { %1124 = vrot.lane.b32.xlu1 %v5076_v31, %s5212_s21  ;;  %v4679_v54 = vcombine.low %v2874_v49, %v2876_v48  ;;  %1122 = vrot.lane.b32.xlu0 %v5075_v41, %s5212_s21  ;;  %v5098_v48 = vld [vmem:[#allocation2 + $0x34] ss:$0 sps:$4 sm:$0xff]  }
 0x13d   : > { %v5746_v60 = vpop.permute.xlu1 %2051  ;;  %4856 = vmatprep.mubr.msk.bf16.mxu1 %vm1642_vm10, %v4679_v54  ;;  %v5753_v61 = vpop.permute.xlu0 %2049 }
 0x13e   : > { %v2658_v56 = vsel %vm1310_vm2, %v5746_v60, %v1860_v47  ;;  %v2655_v57 = vsel %vm1310_vm2, %v5753_v61, %v1859_v29  ;;  %v5117_v29 = vld [vmem:[#allocation2 + $0x48] ss:$0 sps:$4 sm:$0xff]  }
 0x13f   : > { %1200 = vrot.lane.b32.xlu1 %v5078_v45, %s5213_s22  ;;  %1198 = vrot.lane.b32.xlu0 %v5077_v55, %s5213_s22  ;;  %v5100_v45 = vld [vmem:[#allocation2 + $0x3c] ss:$0 sps:$4 sm:$0xff]   ;;  %v5102_v55 = vld [vmem:[#allocation2 + $0x38] ss:$0 sps:$4 sm:$0xff]  }
 0x141   : > { %v2608_v4 = vpop.permute.xlu1 %2607  ;;  %v2606_v7 = vpop.permute.xlu0 %2605 }
 0x142   : > { %v2880_v5 = vsel %vm1557_vm9, %v2848_v1, %v2608_v4  ;;  %v2878_v9 = vsel %vm1557_vm9, %v2846_v6, %v2606_v7  ;;  %v5105_v4 = vld [vmem:[#allocation2 + $0x38] ss:$0 sps:$4 sm:$0xff]   ;;  %v1861_v6 = vld [vmem:[#allocation2 + $0x40] sm:$0xf] }
 0x143   : > { %1204 = vrot.lane.b32.xlu1 %v5080_v50, %s5213_s22  ;;  %v4680_v13 = vcombine.low %v2878_v9, %v2880_v5  ;;  %1202 = vrot.lane.b32.xlu0 %v5079_v63, %s5213_s22  ;;  %v5106_v63 = vld [vmem:[#allocation2 + $0x3c] ss:$0 sps:$4 sm:$0xff]  }
 0x145   : > { %v5778_v15 = vpop.permute.xlu1 %2055  ;;  %4857 = vmatmul.mubr.msk.bf16.gmra.mrb[8].mxu1 %vm1642_vm10, %v4680_v13  ;;  %v5781_v17 = vpop.permute.xlu0 %2053 }
 0x147   : > { %1280 = vrot.lane.b32.xlu1 %v5082_v12, %s5214_s26  ;;  %1278 = vrot.lane.b32.xlu0 %v5081_v14, %s5214_s26  ;;  %v2664_v12 = vsel %vm1310_vm2, %v5778_v15, %v1862_v0  ;;  %v5107_v15 = vld [vmem:[#allocation2 + $0x40] ss:$0 sps:$4 sm:$0xff]  }
 0x149   : > { %v5785_v59 = vpop.permute.xlu1 %2131  ;;  %v5787_v23 = vpop.permute.xlu0 %2129 }
 0x14a   : > { %v2692_v1 = vsel %vm1359_vm3, %v2658_v56, %v5785_v59  ;;  %v2690_v5 = vsel %vm1359_vm3, %v2655_v57, %v5787_v23  ;;  %v5120_v56 = vld [vmem:[#allocation2 + $0x40] ss:$0 sps:$4 sm:$0xff]  }
 0x14b   : > { %728 = vrot.lane.b32.xlu1 %v5084_v58, %s5207_s16  ;;  %726 = vrot.lane.b32.xlu0 %v5083_v22, %s5207_s16  ;;  %v5108_v58 = vld [vmem:[#allocation2 + $0x44] ss:$0 sps:$4 sm:$0xff]   ;;  %v2661_v22 = vsel %vm1310_vm2, %v5781_v17, %v1861_v6 }
 0x14d   : > { %v5791_v24 = vpop.permute.xlu1 %2135  ;;  %v5793_v11 = vpop.permute.xlu0 %2133 }
 0x14e   : > { %v2696_v59 = vsel %vm1359_vm3, %v2664_v12, %v5791_v24 }
 0x14f   : > { %1284 = vrot.lane.b32.xlu1 %v5086_v3, %s5214_s26  ;;  %1282 = vrot.lane.b32.xlu0 %v5085_v10, %s5214_s26  ;;  %v2694_v10 = vsel %vm1359_vm3, %v2661_v22, %v5793_v11  ;;  %v5125_v22 = vld [vmem:[#allocation2 + $0x3c] ss:$0 sps:$4 sm:$0xff]  }
 0x151   : > { %v5797_v26 = vpop.permute.xlu1 %2211  ;;  %v5799_v21 = vpop.permute.xlu0 %2209 }
 0x152   : > { %v2724_v60 = vsel %vm1392_vm4, %v2692_v1, %v5797_v26  ;;  %v2722_v8 = vsel %vm1392_vm4, %v2690_v5, %v5799_v21  ;;  %v5122_v1 = vld [vmem:[#allocation2 + $0x3c] ss:$0 sps:$4 sm:$0xff]  }
 0x153   : > { %732 = vrot.lane.b32.xlu1 %v5088_v19, %s5207_s16  ;;  %730 = vrot.lane.b32.xlu0 %v5087_v25, %s5207_s16 }
 0x155   : > { %v5803_v30 = vpop.permute.xlu1 %2215  ;;  %v5805_v32 = vpop.permute.xlu0 %2213 }
 0x156   : > { %v2728_v19 = vsel %vm1392_vm4, %v2696_v59, %v5803_v30  ;;  %v2726_v24 = vsel %vm1392_vm4, %v2694_v10, %v5805_v32 }
 0x157   : > { %808 = vrot.lane.b32.xlu1 %v5090_v27, %s5208_s17  ;;  %806 = vrot.lane.b32.xlu0 %v5089_v18, %s5208_s17 }
 0x159   : > { %v2292_v31 = vpop.permute.xlu1 %2291  ;;  %v2290_v34 = vpop.permute.xlu0 %2289 }
 0x15a   : > { %v2756_v61 = vsel %vm1425_vm5, %v2724_v60, %v2292_v31  ;;  %v2754_v13 = vsel %vm1425_vm5, %v2722_v8, %v2290_v34  ;;  %v5110_v31 = vld [vmem:[#allocation2 + $0x40] ss:$0 sps:$4 sm:$0xff]   ;;  %v5124_v60 = vld [vmem:[#allocation2 + $0x44] ss:$0 sps:$4 sm:$0xff]  }
 0x15b   : > { %812 = vrot.lane.b32.xlu1 %v5092_v33, %s5208_s17  ;;  %810 = vrot.lane.b32.xlu0 %v5091_v2, %s5208_s17 }
 0x15d   : > { %v5811_v41 = vpop.permute.xlu1 %2295  ;;  %v5813_v42 = vpop.permute.xlu0 %2293 }
 0x15e   : > { %v2760_v21 = vsel %vm1425_vm5, %v2728_v19, %v5811_v41  ;;  %v2758_v11 = vsel %vm1425_vm5, %v2726_v24, %v5813_v42 }
 0x15f   : > { %888 = vrot.lane.b32.xlu1 %v5094_v35, %s5209_s18  ;;  %886 = vrot.lane.b32.xlu0 %v5093_v40, %s5209_s18  ;;  %v5109_v40 = vld [vmem:[#allocation2 + $0x3c] ss:$0 sps:$4 sm:$0xff]  }
 0x161   : > { %v2372_v16 = vpop.permute.xlu1 %2371  ;;  %v2370_v36 = vpop.permute.xlu0 %2369 }
 0x162   : > { %v2788_v14 = vsel %vm1458_vm6, %v2756_v61, %v2372_v16  ;;  %v2786_v23 = vsel %vm1458_vm6, %v2754_v13, %v2370_v36 }
 0x163   : > { %892 = vrot.lane.b32.xlu1 %v5096_v20, %s5209_s18  ;;  %890 = vrot.lane.b32.xlu0 %v5095_v46, %s5209_s18 }
 0x165   : > { %v2376_v44 = vpop.permute.xlu1 %2375  ;;  %v5819_v49 = vpop.permute.xlu0 %2373 }
 0x166   : > { %v2792_v30 = vsel %vm1458_vm6, %v2760_v21, %v2376_v44  ;;  %v2790_v32 = vsel %vm1458_vm6, %v2758_v11, %v5819_v49  ;;  %v5111_v49 = vld [vmem:[#allocation2 + $0x44] ss:$0 sps:$4 sm:$0xff]   ;;  %v5132_v21 = vld [vmem:[#allocation2 + $0x4c] ss:$0 sps:$4 sm:$0xff]   ;;  %v5134_v11 = vld [vmem:[#allocation2 + $0x48] ss:$0 sps:$4 sm:$0xff]  }
 0x167   : > { %968 = vrot.lane.b32.xlu1 %v5098_v48, %s5210_s19  ;;  %966 = vrot.lane.b32.xlu0 %v5097_v37, %s5210_s19  ;;  %v5112_v37 = vld [vmem:[#allocation2 + $0x48] ss:$0 sps:$4 sm:$0xff]  }
 0x169   : > { %v2452_v52 = vpop.permute.xlu1 %2451  ;;  %v2450_v54 = vpop.permute.xlu0 %2449 }
 0x16a   : > { %v2820_v3 = vsel %vm1491_vm7, %v2788_v14, %v2452_v52  ;;  %v2818_v25 = vsel %vm1491_vm7, %v2786_v23, %v2450_v54  ;;  %v5114_v52 = vld [vmem:[#allocation2 + $0x44] ss:$0 sps:$4 sm:$0xff]   ;;  %v5113_v54 = vld [vmem:[#allocation2 + $0x40] ss:$0 sps:$4 sm:$0xff]  }
 0x16b   : > { %972 = vrot.lane.b32.xlu1 %v5100_v45, %s5210_s19  ;;  %970 = vrot.lane.b32.xlu0 %v5099_v43, %s5210_s19  ;;  %v5126_v14 = vld [vmem:[#allocation2 + $0x40] ss:$0 sps:$4 sm:$0xff]  }
 0x16d   : > { %v2456_v38 = vpop.permute.xlu1 %2455  ;;  %v2454_v53 = vpop.permute.xlu0 %2453 }
 0x16e   : > { %v2824_v34 = vsel %vm1491_vm7, %v2792_v30, %v2456_v38  ;;  %v2822_v41 = vsel %vm1491_vm7, %v2790_v32, %v2454_v53  ;;  %v5116_v38 = vld [vmem:[#allocation2 + $0x38] ss:$0 sps:$4 sm:$0xff]   ;;  %v5115_v53 = vld [vmem:[#allocation2 + $0x34] ss:$0 sps:$4 sm:$0xff]   ;;  %v5133_v30 = vld [vmem:[#allocation2 + $0x44] ss:$0 sps:$4 sm:$0xff]  }
 0x16f   : > { %1048 = vrot.lane.b32.xlu1 %v5102_v55, %s5211_s20  ;;  %1046 = vrot.lane.b32.xlu0 %v5101_v28, %s5211_s20  ;;  %v5136_v32 = vld [vmem:[#allocation2 + $0x50] ss:$0 sps:$4 sm:$0xff]  }
 0x171   : > { %v2532_v50 = vpop.permute.xlu1 %2531  ;;  %v2530_v51 = vpop.permute.xlu0 %2529 }
 0x172   : > { %v2852_v17 = vsel %vm1524_vm8, %v2820_v3, %v2532_v50  ;;  %v2850_v27 = vsel %vm1524_vm8, %v2818_v25, %v2530_v51  ;;  %v5128_v3 = vld [vmem:[#allocation2 + $0x48] ss:$0 sps:$4 sm:$0xff]   ;;  %v5130_v25 = vld [vmem:[#allocation2 + $0x44] ss:$0 sps:$4 sm:$0xff]  }
 0x173   : > { %1052 = vrot.lane.b32.xlu1 %v5104_v39, %s5211_s20  ;;  %1050 = vrot.lane.b32.xlu0 %v5103_v62, %s5211_s20  ;;  %v5118_v62 = vld [vmem:[#allocation2 + $0x4c] ss:$0 sps:$4 sm:$0xff]  }
 0x175   : > { %v2536_v7 = vpop.permute.xlu1 %2535  ;;  %v2534_v9 = vpop.permute.xlu0 %2533 }
 0x176   : > { %v2856_v42 = vsel %vm1524_vm8, %v2824_v34, %v2536_v7  ;;  %v2854_v46 = vsel %vm1524_vm8, %v2822_v41, %v2534_v9  ;;  %v5123_v7 = vld [vmem:[#allocation2 + $0x40] ss:$0 sps:$4 sm:$0xff]   ;;  %v520_v34 = vld [vmem:[#allocation2 + $0x14] sm:$0xf] }
 0x177   : > { %1128 = vrot.lane.b32.xlu1 %v5106_v63, %s5212_s21  ;;  %1126 = vrot.lane.b32.xlu0 %v5105_v4, %s5212_s21  ;;  %v5119_v63 = vld [vmem:[#allocation2 + $0x3c] ss:$0 sps:$4 sm:$0xff]   ;;  %v5121_v4 = vld [vmem:[#allocation2 + $0x38] ss:$0 sps:$4 sm:$0xff]  }
 0x179   : > { %v2612_v26 = vpop.permute.xlu1 %2611  ;;  %v2610_v33 = vpop.permute.xlu0 %2609 }
 0x17a   : > { %v2884_v18 = vsel %vm1557_vm9, %v2852_v17, %v2612_v26  ;;  %v2882_v2 = vsel %vm1557_vm9, %v2850_v27, %v2610_v33  ;;  %v5129_v17 = vld [vmem:[#allocation2 + $0x40] ss:$0 sps:$4 sm:$0xff]   ;;  %v5131_v27 = vld [vmem:[#allocation2 + $0x48] ss:$0 sps:$4 sm:$0xff]  }
 0x17b   : > { %1132 = vrot.lane.b32.xlu1 %v5108_v58, %s5212_s21  ;;  %v4681_v35 = vcombine.low %v2882_v2, %v2884_v18  ;;  %1130 = vrot.lane.b32.xlu0 %v5107_v15, %s5212_s21  ;;  %v5127_v15 = vld [vmem:[#allocation2 + $0x44] ss:$0 sps:$4 sm:$0xff]  }
 0x17d   : > { %v2616_v20 = vpop.permute.xlu1 %2615  ;;  %4860 = vmatprep.mubr.msk.bf16.mxu1 %vm1642_vm10, %v4681_v35  ;;  %v2614_v36 = vpop.permute.xlu0 %2613  ;;  %v5135_v35 = vld [vmem:[#allocation2 + $0x4c] ss:$0 sps:$4 sm:$0xff]  }
 0x17e   : > { %v2888_v16 = vsel %vm1557_vm9, %v2856_v42, %v2616_v20  ;;  %v2886_v48 = vsel %vm1557_vm9, %v2854_v46, %v2614_v36  ;;  %v5138_v46 = vld [vmem:[#allocation2 + $0x4c] ss:$0 sps:$4 sm:$0xff]  }
 0x17f   : > { %1208 = vrot.lane.b32.xlu1 %v5110_v31, %s5213_s22  ;;  %v4682_v44 = vcombine.low %v2886_v48, %v2888_v16  ;;  %1206 = vrot.lane.b32.xlu0 %v5109_v40, %s5213_s22  ;;  %v519_v40 = vld [vmem:[#allocation2 + $0x10] sm:$0xf]  ;;  %v5137_v48 = vld [vmem:[#allocation2 + $0x48] ss:$0 sps:$4 sm:$0xff]  }
 0x181   : > { %v5883_v45 = vpop.permute.xlu1 %720  ;;  %4861 = vmatmul.mubr.msk.bf16.gmra.mrb[12].mxu1 %vm1642_vm10, %v4682_v44  ;;  %v5886_v43 = vpop.permute.xlu0 %718 }
 0x182   : > { %v1316_v20 = vsel %vm1310_vm2, %v520_v34, %v5883_v45  ;;  %v1313_v16 = vsel %vm1310_vm2, %v519_v40, %v5886_v43  ;;  %v5149_v40 = vld [vmem:[#allocation2 + $0x44] ss:$0 sps:$4 sm:$0xff]  }
 0x183   : > { %1212 = vrot.lane.b32.xlu1 %v5112_v37, %s5213_s22  ;;  %1210 = vrot.lane.b32.xlu0 %v5111_v49, %s5213_s22 }
 0x185   : > { %v5890_v55 = vpop.permute.xlu1 %724  ;;  %v5892_v28 = vpop.permute.xlu0 %722 }
 0x187   : > { %1288 = vrot.lane.b32.xlu1 %v5114_v52, %s5214_s26  ;;  %1286 = vrot.lane.b32.xlu0 %v5113_v54, %s5214_s26 }
 0x189   : > { %v5896_v39 = vpop.permute.xlu1 %800  ;;  %v5898_v47 = vpop.permute.xlu0 %798 }
 0x18a   : > { %v1363_v36 = vsel %vm1359_vm3, %v1316_v20, %v5896_v39  ;;  %v1361_v37 = vsel %vm1359_vm3, %v1313_v16, %v5898_v47  ;;  %v522_v39 = vld [vmem:[#allocation2 + $0x1c] sm:$0xf] }
 0x18b   : > { %736 = vrot.lane.b32.xlu1 %v5116_v38, %s5207_s16  ;;  %734 = vrot.lane.b32.xlu0 %v5115_v53, %s5207_s16  ;;  %v5140_v53 = vld [vmem:[#allocation2 + $0x54] ss:$0 sps:$4 sm:$0xff]   ;;  %v5152_v20 = vld [vmem:[#allocation2 + $0x5c] ss:$0 sps:$4 sm:$0xff]  }
 0x18d   : > { %v5902_v50 = vpop.permute.xlu1 %804  ;;  %v5904_v51 = vpop.permute.xlu0 %802 }
 0x18f   : > { %1292 = vrot.lane.b32.xlu1 %v5118_v62, %s5214_s26  ;;  %1290 = vrot.lane.b32.xlu0 %v5117_v29, %s5214_s26  ;;  %v5139_v29 = vld [vmem:[#allocation2 + $0x50] ss:$0 sps:$4 sm:$0xff]  }
 0x191   : > { %v5908_v57 = vpop.permute.xlu1 %880  ;;  %v5910_v0 = vpop.permute.xlu0 %878 }
 0x192   : > { %v1396_v44 = vsel %vm1392_vm4, %v1363_v36, %v5908_v57  ;;  %v1394_v45 = vsel %vm1392_vm4, %v1361_v37, %v5910_v0  ;;  %v5153_v37 = vld [vmem:[#allocation2 + $0x4c] ss:$0 sps:$4 sm:$0xff]  }
 0x193   : > { %740 = vrot.lane.b32.xlu1 %v5120_v56, %s5207_s16  ;;  %738 = vrot.lane.b32.xlu0 %v5119_v63, %s5207_s16  ;;  %v521_v56 = vld [vmem:[#allocation2 + $0x18] sm:$0xf] }
 0x195   : > { %v5914_v6 = vpop.permute.xlu1 %884  ;;  %v5916_v5 = vpop.permute.xlu0 %882 }
 0x197   : > { %816 = vrot.lane.b32.xlu1 %v5122_v1, %s5208_s17  ;;  %814 = vrot.lane.b32.xlu0 %v5121_v4, %s5208_s17 }
 0x198   : > { %v5920_v8 = vpop.f32.mrb[0].mxu1 }
 0x199   : > { %v961_v61 = vpop.permute.xlu1 %960  ;;  %v5922_v9 = vpop.f32.mrb[1].mxu1 }
 0x19a   : > { %v959_v12 = vpop.permute.xlu0 %958  ;;  %v5924_v13 = vpop.f32.mrb[2].mxu1  ;;  %v1429_v52 = vsel %vm1425_vm5, %v1396_v44, %v961_v61 }
 0x19b   : > { %820 = vrot.lane.b32.xlu1 %v5124_v60, %s5208_s17  ;;  %v5927_v58 = vpop.f32.mrb[3].mxu1  ;;  %818 = vrot.lane.b32.xlu0 %v5123_v7, %s5208_s17  ;;  %v1427_v43 = vsel %vm1425_vm5, %v1394_v45, %v959_v12  ;;  %v1322_v7 = vsel %vm1310_vm2, %v522_v39, %v5890_v55  ;;  %v5143_v12 = vld [vmem:[#allocation2 + $0x50] ss:$0 sps:$4 sm:$0xff]   ;;  %v5156_v45 = vld [vmem:[#allocation2 + $0x4c] ss:$0 sps:$4 sm:$0xff]  }
 0x19d   : > { %v5930_v59 = vpop.permute.xlu1 %964 }
 0x19e   : > { %v5932_v23 = vpop.permute.xlu0 %962 }
 0x19f   : > { %896 = vrot.lane.b32.xlu1 %v5126_v14, %s5209_s18  ;;  %894 = vrot.lane.b32.xlu0 %v5125_v22, %s5209_s18  ;;  %v1319_v14 = vsel %vm1310_vm2, %v521_v56, %v5892_v28  ;;  %v1367_v22 = vsel %vm1359_vm3, %v1322_v7, %v5902_v50  ;;  %v5161_v7 = vld [vmem:[#allocation2 + $0x54] ss:$0 sps:$4 sm:$0xff]  }
 0x1a0   : > { %v1400_v55 = vsel %vm1392_vm4, %v1367_v22, %v5914_v6  ;;  %v5146_v6 = vld [vmem:[#allocation2 + $0x58] ss:$0 sps:$4 sm:$0xff]   ;;  %v5163_v22 = vld [vmem:[#allocation2 + $0x50] ss:$0 sps:$4 sm:$0xff]  }
 0x1a1   : > { %v1041_v10 = vpop.permute.xlu1 %1040  ;;  %v1433_v28 = vsel %vm1425_vm5, %v1400_v55, %v5930_v59  ;;  %v5145_v59 = vld [vmem:[#allocation2 + $0x54] ss:$0 sps:$4 sm:$0xff]   ;;  %v5165_v55 = vld [vmem:[#allocation2 + $0x58] ss:$0 sps:$4 sm:$0xff]  }
 0x1a2   : > { %v1039_v19 = vpop.permute.xlu0 %1038  ;;  %v1462_v38 = vsel %vm1458_vm6, %v1429_v52, %v1041_v10  ;;  %v1365_v10 = vsel %vm1359_vm3, %v1319_v14, %v5904_v51  ;;  %v5155_v52 = vld [vmem:[#allocation2 + $0x48] ss:$0 sps:$4 sm:$0xff]   ;;  %v5164_v14 = vld [vmem:[#allocation2 + $0x54] ss:$0 sps:$4 sm:$0xff]  }
 0x1a3   : > { %900 = vrot.lane.b32.xlu1 %v5128_v3, %s5209_s18  ;;  %898 = vrot.lane.b32.xlu0 %v5127_v15, %s5209_s18  ;;  %v1460_v47 = vsel %vm1458_vm6, %v1427_v43, %v1039_v19  ;;  %v5142_v15 = vld [vmem:[#allocation2 + $0x4c] ss:$0 sps:$4 sm:$0xff]  }
 0x1a5   : > { %v5938_v26 = vpop.permute.xlu1 %1044 }
 0x1a6   : > { %v5940_v24 = vpop.permute.xlu0 %1042  ;;  %v1466_v51 = vsel %vm1458_vm6, %v1433_v28, %v5938_v26 }
 0x1a7   : > { %976 = vrot.lane.b32.xlu1 %v5130_v25, %s5210_s19  ;;  %974 = vrot.lane.b32.xlu0 %v5129_v17, %s5210_s19  ;;  %v1398_v25 = vsel %vm1392_vm4, %v1365_v10, %v5916_v5  ;;  %v5166_v10 = vld [vmem:[#allocation2 + $0x5c] ss:$0 sps:$4 sm:$0xff]  }
 0x1a8   : > { %v1431_v50 = vsel %vm1425_vm5, %v1398_v25, %v5932_v23 }
 0x1a9   : > { %v1121_v18 = vpop.permute.xlu1 %1120 }
 0x1aa   : > { %v1119_v33 = vpop.permute.xlu0 %1118  ;;  %v1495_v62 = vsel %vm1491_vm7, %v1462_v38, %v1121_v18  ;;  %v5158_v38 = vld [vmem:[#allocation2 + $0x54] ss:$0 sps:$4 sm:$0xff]  }
 0x1ab   : > { %980 = vrot.lane.b32.xlu1 %v5132_v21, %s5210_s19  ;;  %978 = vrot.lane.b32.xlu0 %v5131_v27, %s5210_s19  ;;  %v1493_v63 = vsel %vm1491_vm7, %v1460_v47, %v1119_v33  ;;  %v1464_v21 = vsel %vm1458_vm6, %v1431_v50, %v5940_v24  ;;  %v5148_v24 = vld [vmem:[#allocation2 + $0x54] ss:$0 sps:$4 sm:$0xff]   ;;  %v5168_v50 = vld [vmem:[#allocation2 + $0x58] ss:$0 sps:$4 sm:$0xff]  }
 0x1ad   : > { %v1125_v2 = vpop.permute.xlu1 %1124 }
 0x1ae   : > { %v5946_v31 = vpop.permute.xlu0 %1122  ;;  %v1499_v5 = vsel %vm1491_vm7, %v1466_v51, %v1125_v2  ;;  %v5167_v51 = vld [vmem:[#allocation2 + $0x54] ss:$0 sps:$4 sm:$0xff]  }
 0x1af   : > { %1056 = vrot.lane.b32.xlu1 %v5134_v11, %s5211_s20  ;;  %1054 = vrot.lane.b32.xlu0 %v5133_v30, %s5211_s20  ;;  %v1497_v27 = vsel %vm1491_vm7, %v1464_v21, %v5946_v31 }
 0x1b1   : > { %v1201_v41 = vpop.permute.xlu1 %1200 }
 0x1b2   : > { %v1199_v42 = vpop.permute.xlu0 %1198  ;;  %v1528_v57 = vsel %vm1524_vm8, %v1495_v62, %v1201_v41 }
 0x1b3   : > { %1060 = vrot.lane.b32.xlu1 %v5136_v32, %s5211_s20  ;;  %1058 = vrot.lane.b32.xlu0 %v5135_v35, %s5211_s20  ;;  %v1526_v1 = vsel %vm1524_vm8, %v1493_v63, %v1199_v42  ;;  %v5147_v32 = vld [vmem:[#allocation2 + $0x50] ss:$0 sps:$4 sm:$0xff]   ;;  %v5150_v35 = vld [vmem:[#allocation2 + $0x48] ss:$0 sps:$4 sm:$0xff]  }
 0x1b4   : > { %v5160_v63 = vld [vmem:[#allocation2 + $0x50] ss:$0 sps:$4 sm:$0xff]  }
 0x1b5   : > { %v1205_v49 = vpop.permute.xlu1 %1204 }
 0x1b6   : > { %v1203_v54 = vpop.permute.xlu0 %1202  ;;  %v1532_v18 = vsel %vm1524_vm8, %v1499_v5, %v1205_v49  ;;  %v5170_v5 = vld [vmem:[#allocation2 + $0x60] ss:$0 sps:$4 sm:$0xff]  }
 0x1b7   : > { %1136 = vrot.lane.b32.xlu1 %v5138_v46, %s5212_s21  ;;  %1134 = vrot.lane.b32.xlu0 %v5137_v48, %s5212_s21  ;;  %v1530_v33 = vsel %vm1524_vm8, %v1497_v27, %v1203_v54  ;;  %v5151_v46 = vld [vmem:[#allocation2 + $0x58] ss:$0 sps:$4 sm:$0xff]   ;;  %v5154_v48 = vld [vmem:[#allocation2 + $0x50] ss:$0 sps:$4 sm:$0xff]   ;;  %v5169_v27 = vld [vmem:[#allocation2 + $0x5c] ss:$0 sps:$4 sm:$0xff]  }
 0x1b9   : > { %v1281_v0 = vpop.permute.xlu1 %1280 }
 0x1ba   : > { %v1279_v4 = vpop.permute.xlu0 %1278  ;;  %v1561_v60 = vsel %vm1557_vm9, %v1528_v57, %v1281_v0  ;;  %v5159_v0 = vld [vmem:[#allocation2 + $0x4c] ss:$0 sps:$4 sm:$0xff]  }
 0x1bb   : > { %v1559_v61 = vsel %vm1557_vm9, %v1526_v1, %v1279_v4  ;;  %1140 = vrot.lane.b32.xlu1 %v5140_v53, %s5212_s21  ;;  %1138 = vrot.lane.b32.xlu0 %v5139_v29, %s5212_s21  ;;  %v5157_v53 = vld [vmem:[#allocation2 + $0x50] ss:$0 sps:$4 sm:$0xff]  }
 0x1bc   : > { %v4524_v3 = vcombine.low %v1559_v61, %v1561_v60  ;;  %v5162_v60 = vld [vmem:[#allocation2 + $0x58] ss:$0 sps:$4 sm:$0xff]  }
 0x1bd   : > { %v5988_v19 = vpop.permute.xlu1 %728 }
 0x1be   : > { %v5994_v17 = vpop.permute.xlu0 %726  ;;  %4828 = vmatprep.mubr.msk.bf16.mxu0 %vm1642_vm10, %v4524_v3 }
 0x1bf   : > { %1216 = vrot.lane.b32.xlu1 %v5143_v12, %s5213_s22  ;;  %1214 = vrot.lane.b32.xlu0 %v5142_v15, %s5213_s22 }
 0x1c1   : > { %v1285_v23 = vpop.permute.xlu1 %1284 }
 0x1c2   : > { %v1283_v26 = vpop.permute.xlu0 %1282  ;;  %v1565_v11 = vsel %vm1557_vm9, %v1532_v18, %v1285_v23  ;;  %v523_v18 = vld [vmem:[#allocation2 + $0x20] sm:$0xf] }
 0x1c3   : > { %v1563_v30 = vsel %vm1557_vm9, %v1530_v33, %v1283_v26  ;;  %1220 = vrot.lane.b32.xlu1 %v5146_v6, %s5213_s22  ;;  %1218 = vrot.lane.b32.xlu0 %v5145_v59, %s5213_s22  ;;  %v524_v59 = vld [vmem:[#allocation2 + $0x24] sm:$0xf] }
 0x1c4   : > { %v4525_v2 = vcombine.low %v1563_v30, %v1565_v11  ;;  %v1328_v26 = vsel %vm1310_vm2, %v524_v59, %v5988_v19  ;;  %v5172_v11 = vld [vmem:[#allocation2 + $0x5c] ss:$0 sps:$4 sm:$0xff]   ;;  %v1325_v30 = vsel %vm1310_vm2, %v523_v18, %v5994_v17 }
 0x1c5   : > { %v6014_v34 = vpop.permute.xlu1 %732 }
 0x1c6   : > { %v6016_v31 = vpop.permute.xlu0 %730  ;;  %4829 = vmatmul.mubr.msk.bf16.vlgmr.msra.gmra.mrb[0].mxu0 %vm1642_vm10, %v4525_v2  ;;  %v5171_v2 = vld [vmem:[#allocation2 + $0x58] ss:$0 sps:$4 sm:$0xff]  }
 0x1c7   : > { %1296 = vrot.lane.b32.xlu1 %v5148_v24, %s5214_s26  ;;  %1294 = vrot.lane.b32.xlu0 %v5147_v32, %s5214_s26 }
 0x1c9   : > { %v6021_v41 = vpop.permute.xlu1 %808 }
 0x1ca   : > { %v6023_v42 = vpop.permute.xlu0 %806  ;;  %v1371_v24 = vsel %vm1359_vm3, %v1328_v26, %v6021_v41  ;;  %v5182_v26 = vld [vmem:[#allocation2 + $0x6c] ss:$0 sps:$4 sm:$0xff]  }
 0x1cb   : > { %744 = vrot.lane.b32.xlu1 %v5150_v35, %s5207_s16  ;;  %742 = vrot.lane.b32.xlu0 %v5149_v40, %s5207_s16  ;;  %v1369_v32 = vsel %vm1359_vm3, %v1325_v30, %v6023_v42 }
 0x1cd   : > { %v6027_v16 = vpop.permute.xlu1 %812 }
 0x1ce   : > { %v6029_v36 = vpop.permute.xlu0 %810 }
 0x1cf   : > { %1300 = vrot.lane.b32.xlu1 %v5152_v20, %s5214_s26  ;;  %1298 = vrot.lane.b32.xlu0 %v5151_v46, %s5214_s26 }
 0x1d1   : > { %v6033_v44 = vpop.permute.xlu1 %888 }
 0x1d2   : > { %v6035_v49 = vpop.permute.xlu0 %886  ;;  %v1404_v35 = vsel %vm1392_vm4, %v1371_v24, %v6033_v44  ;;  %v5173_v44 = vld [vmem:[#allocation2 + $0x60] ss:$0 sps:$4 sm:$0xff]  }
 0x1d3   : > { %748 = vrot.lane.b32.xlu1 %v5154_v48, %s5207_s16  ;;  %746 = vrot.lane.b32.xlu0 %v5153_v37, %s5207_s16  ;;  %v1402_v19 = vsel %vm1392_vm4, %v1369_v32, %v6035_v49  ;;  %v5174_v48 = vld [vmem:[#allocation2 + $0x64] ss:$0 sps:$4 sm:$0xff]   ;;  %v526_v37 = vld [vmem:[#allocation2 + $0x2c] sm:$0xf] }
 0x1d5   : > { %v6039_v54 = vpop.permute.xlu1 %892 }
 0x1d6   : > { %v6041_v43 = vpop.permute.xlu0 %890 }
 0x1d7   : > { %824 = vrot.lane.b32.xlu1 %v5156_v45, %s5208_s17  ;;  %822 = vrot.lane.b32.xlu0 %v5155_v52, %s5208_s17  ;;  %v525_v52 = vld [vmem:[#allocation2 + $0x28] sm:$0xf] }
 0x1d8   : > { %v6045_v39 = vpop.f32.mrb[4].mxu1 }
 0x1d9   : > { %v969_v47 = vpop.permute.xlu1 %968  ;;  %v6047_v62 = vpop.f32.mrb[5].mxu1 }
 0x1da   : > { %v967_v29 = vpop.permute.xlu0 %966  ;;  %v6049_v56 = vpop.f32.mrb[6].mxu1  ;;  %v1437_v20 = vsel %vm1425_vm5, %v1404_v35, %v969_v47  ;;  %v6156_v35 = vld [vmem:[%s6710_s3] ss:$0 sm:$0xff] }
 0x1db   : > { %828 = vrot.lane.b32.xlu1 %v5158_v38, %s5208_s17  ;;  %v6052_v57 = vpop.f32.mrb[7].mxu1  ;;  %826 = vrot.lane.b32.xlu0 %v5157_v53, %s5208_s17  ;;  %v1435_v17 = vsel %vm1425_vm5, %v1402_v19, %v967_v29 }
 0x1dd   : > { %v6055_v1 = vpop.permute.xlu1 %972 }
 0x1de   : > { %v6057_v4 = vpop.permute.xlu0 %970 }
 0x1df   : > { %904 = vrot.lane.b32.xlu1 %v5160_v63, %s5209_s18  ;;  %902 = vrot.lane.b32.xlu0 %v5159_v0, %s5209_s18  ;;  %v1334_v0 = vsel %vm1310_vm2, %v526_v37, %v6014_v34 }
 0x1e1   : > { %v1049_v61 = vpop.permute.xlu1 %1048 }
 0x1e2   : > { %v1047_v12 = vpop.permute.xlu0 %1046  ;;  %v1470_v41 = vsel %vm1458_vm6, %v1437_v20, %v1049_v61  ;;  %v1331_v61 = vsel %vm1310_vm2, %v525_v52, %v6016_v31 }
 0x1e3   : > { %908 = vrot.lane.b32.xlu1 %v5162_v60, %s5209_s18  ;;  %906 = vrot.lane.b32.xlu0 %v5161_v7, %s5209_s18  ;;  %v1468_v42 = vsel %vm1458_vm6, %v1435_v17, %v1047_v12  ;;  %v5176_v7 = vld [vmem:[#allocation2 + $0x60] ss:$0 sps:$4 sm:$0xff]   ;;  %v1375_v12 = vsel %vm1359_vm3, %v1334_v0, %v6027_v16  ;;  %s4395_s18 = sshll.u32 %s6722_s27, 3 }
 0x1e4   : > { %v1408_v34 = vsel %vm1392_vm4, %v1375_v12, %v6039_v54  ;;  %v5178_v54 = vld [vmem:[#allocation2 + $0x68] ss:$0 sps:$4 sm:$0xff]   ;;  %v527_v12 = vld [vmem:[#allocation2 + $0x30] sm:$0xf] }
 0x1e5   : > { %v6063_v3 = vpop.permute.xlu1 %1052  ;;  %v1441_v31 = vsel %vm1425_vm5, %v1408_v34, %v6055_v1  ;;  %v5177_v1 = vld [vmem:[#allocation2 + $0x64] ss:$0 sps:$4 sm:$0xff]  }
 0x1e6   : > { %v6065_v15 = vpop.permute.xlu0 %1050 }
 0x1e7   : > { %984 = vrot.lane.b32.xlu1 %v5164_v14, %s5210_s19  ;;  %982 = vrot.lane.b32.xlu0 %v5163_v22, %s5210_s19  ;;  %v5175_v22 = vld [vmem:[#allocation2 + $0x5c] ss:$0 sps:$4 sm:$0xff]  }
 0x1e9   : > { %v1129_v25 = vpop.permute.xlu1 %1128 }
 0x1ea   : > { %v1127_v28 = vpop.permute.xlu0 %1126  ;;  %v1503_v45 = vsel %vm1491_vm7, %v1470_v41, %v1129_v25 }
 0x1eb   : > { %988 = vrot.lane.b32.xlu1 %v5166_v10, %s5210_s19  ;;  %986 = vrot.lane.b32.xlu0 %v5165_v55, %s5210_s19  ;;  %v1501_v49 = vsel %vm1491_vm7, %v1468_v42, %v1127_v28  ;;  %v1373_v10 = vsel %vm1359_vm3, %v1331_v61, %v6029_v36  ;;  %v1474_v36 = vsel %vm1458_vm6, %v1441_v31, %v6063_v3  ;;  %v528_v61 = vld [vmem:[#allocation2 + $0x34] sm:$0xf] }
 0x1ec   : > { %v1406_v25 = vsel %vm1392_vm4, %v1373_v10, %v6041_v43 }
 0x1ed   : > { %v1133_v6 = vpop.permute.xlu1 %1132  ;;  %v1439_v16 = vsel %vm1425_vm5, %v1406_v25, %v6057_v4 }
 0x1ee   : > { %v6071_v21 = vpop.permute.xlu0 %1130  ;;  %v1507_v43 = vsel %vm1491_vm7, %v1474_v36, %v1133_v6 }
 0x1ef   : > { %1064 = vrot.lane.b32.xlu1 %v5168_v50, %s5211_s20  ;;  %1062 = vrot.lane.b32.xlu0 %v5167_v51, %s5211_s20  ;;  %v1472_v50 = vsel %vm1458_vm6, %v1439_v16, %v6065_v15  ;;  %v5180_v15 = vld [vmem:[#allocation2 + $0x64] ss:$0 sps:$4 sm:$0xff]  }
 0x1f0   : > { %v1505_v51 = vsel %vm1491_vm7, %v1472_v50, %v6071_v21 }
 0x1f1   : > { %v1209_v23 = vpop.permute.xlu1 %1208 }
 0x1f2   : > { %v1207_v33 = vpop.permute.xlu0 %1206  ;;  %v1536_v38 = vsel %vm1524_vm8, %v1503_v45, %v1209_v23  ;;  %v5179_v23 = vld [vmem:[#allocation2 + $0x60] ss:$0 sps:$4 sm:$0xff]  }
 0x1f3   : > { %1068 = vrot.lane.b32.xlu1 %v5170_v5, %s5211_s20  ;;  %1066 = vrot.lane.b32.xlu0 %v5169_v27, %s5211_s20  ;;  %v1534_v47 = vsel %vm1524_vm8, %v1501_v49, %v1207_v33  ;;  %s6666_s20 = scalar_lea.vmem %s6720_s13, %s4395_s18 }
 0x1f5   : > { %v1213_v40 = vpop.permute.xlu1 %1212 }
 0x1f6   : > { %v1211_v46 = vpop.permute.xlu0 %1210  ;;  %v1540_v5 = vsel %vm1524_vm8, %v1507_v43, %v1213_v40 }
 0x1f7   : > { %1144 = vrot.lane.b32.xlu1 %v5172_v11, %s5212_s21  ;;  %1142 = vrot.lane.b32.xlu0 %v5171_v2, %s5212_s21  ;;  %v1538_v59 = vsel %vm1524_vm8, %v1505_v51, %v1211_v46  ;;  %v5181_v11 = vld [vmem:[#allocation2 + $0x68] ss:$0 sps:$4 sm:$0xff]   ;;  %v6151_v2 = vld [vmem:[%s6711_s4] ss:$0 sm:$0xff] }
 0x1f9   : > { %v1289_v53 = vpop.permute.xlu1 %1288 }
 0x1fa   : > { %v1287_v29 = vpop.permute.xlu0 %1286  ;;  %v1569_v63 = vsel %vm1557_vm9, %v1536_v38, %v1289_v53 }
 0x1fb   : > { %v1567_v60 = vsel %vm1557_vm9, %v1534_v47, %v1287_v29  ;;  %1148 = vrot.lane.b32.xlu1 %v5174_v48, %s5212_s21  ;;  %1146 = vrot.lane.b32.xlu0 %v5173_v44, %s5212_s21  ;;  %s6389_s21 = scalar_lea.vmem %s6708_s1, %s4391_s28 }
 0x1fc   : > { %v4526_v14 = vcombine.low %v1567_v60, %v1569_v63 }
 0x1fd   : > { %v6113_v55 = vpop.permute.xlu1 %736 }
 0x1fe   : > { %v6119_v28 = vpop.permute.xlu0 %734  ;;  %4832 = vmatprep.mubr.msk.bf16.mxu0 %vm1642_vm10, %v4526_v14  ;;  %v1340_v10 = vsel %vm1310_vm2, %v528_v61, %v6113_v55  ;;  %v530_v55 = vld [vmem:[#allocation2 + $0x3c] sm:$0xf] }
 0x1ff   : > { %1224 = vrot.lane.b32.xlu1 %v5176_v7, %s5213_s22  ;;  %1222 = vrot.lane.b32.xlu0 %v5175_v22, %s5213_s22  ;;  %v1337_v34 = vsel %vm1310_vm2, %v527_v12, %v6119_v28 }
 0x201   : > { %v1293_v4 = vpop.permute.xlu1 %1292 }
 0x202   : > { %v1291_v3 = vpop.permute.xlu0 %1290  ;;  %v1573_v27 = vsel %vm1557_vm9, %v1540_v5, %v1293_v4  ;;  %v529_v4 = vld [vmem:[#allocation2 + $0x38] sm:$0xf] }
 0x203   : > { %v1571_v18 = vsel %vm1557_vm9, %v1538_v59, %v1291_v3  ;;  %1228 = vrot.lane.b32.xlu1 %v5178_v54, %s5213_s22  ;;  %1226 = vrot.lane.b32.xlu0 %v5177_v1, %s5213_s22 }
 0x204   : > { %v4527_v6 = vcombine.low %v1571_v18, %v1573_v27 }
 0x205   : > { %v6139_v33 = vpop.permute.xlu1 %740 }
 0x206   : > { %v6141_v21 = vpop.permute.xlu0 %738  ;;  %4833 = vmatmul.mubr.msk.bf16.gmra.mrb[4].mxu0 %vm1642_vm10, %v4527_v6 }
 0x207   : > { %1304 = vrot.lane.b32.xlu1 %v5180_v15, %s5214_s26  ;;  %1302 = vrot.lane.b32.xlu0 %v5179_v23, %s5214_s26  ;;  %v1346_v23 = vsel %vm1310_vm2, %v530_v55, %v6139_v33 }
 0x209   : > { %v817_v30 = vpop.permute.xlu1 %816 }
 0x20a   : > { %v815_v24 = vpop.permute.xlu0 %814  ;;  %v1379_v25 = vsel %vm1359_vm3, %v1340_v10, %v817_v30 }
 0x20b   : > { %1308 = vrot.lane.b32.xlu1 %v5182_v26, %s5214_s26  ;;  %1306 = vrot.lane.b32.xlu0 %v5181_v11, %s5214_s26  ;;  %v1377_v31 = vsel %vm1359_vm3, %v1337_v34, %v815_v24  ;;  %v1343_v11 = vsel %vm1310_vm2, %v529_v4, %v6141_v21 }
 0x20d   : > { %v821_v32 = vpop.permute.xlu1 %820 }
 0x20e   : > { %v819_v40 = vpop.permute.xlu0 %818  ;;  %v1383_v30 = vsel %vm1359_vm3, %v1346_v23, %v821_v32  ;;  %v531_v23 = vld [vmem:[#allocation2 + $0x40] sm:$0xf] }
 0x20f   : > { %3097 = vrot.lane.b32.xlu1 %v6151_v2, %s5206_s29  ;;  %3072 = vrot.lane.b32.xlu0 %v6156_v35, %s5206_s29 }
 0x211   : > { %v897_v19 = vpop.permute.xlu1 %896 }
 0x212   : > { %v895_v20 = vpop.permute.xlu0 %894  ;;  %v1412_v16 = vsel %vm1392_vm4, %v1379_v25, %v897_v19  ;;  %v1381_v19 = vsel %vm1359_vm3, %v1343_v11, %v819_v40 }
 0x213   : > { %v1410_v54 = vsel %vm1392_vm4, %v1377_v31, %v895_v20 }
 0x215   : > { %v901_v46 = vpop.permute.xlu1 %900 }
 0x216   : > { %v899_v17 = vpop.permute.xlu0 %898  ;;  %v1416_v20 = vsel %vm1392_vm4, %v1383_v30, %v901_v46 }
 0x218   : > { %v6162_v41 = vpop.f32.mrb[8].mxu1 }
 0x219   : > { %v977_v48 = vpop.permute.xlu1 %976  ;;  %v6164_v37 = vpop.f32.mrb[9].mxu1 }
 0x21a   : > { %v975_v42 = vpop.permute.xlu0 %974  ;;  %v6166_v45 = vpop.f32.mrb[10].mxu1  ;;  %v1445_v50 = vsel %vm1425_vm5, %v1412_v16, %v977_v48 }
 0x21b   : > { %v6168_v44 = vpop.f32.mrb[11].mxu1  ;;  %v1443_v1 = vsel %vm1425_vm5, %v1410_v54, %v975_v42  ;;  %v1414_v42 = vsel %vm1392_vm4, %v1381_v19, %v899_v17  ;;  %v534_v19 = vld [vmem:[#allocation2 + $0x4c] sm:$0xf] }
 0x21d   : > { %v981_v52 = vpop.permute.xlu1 %980 }
 0x21e   : > { %v979_v49 = vpop.permute.xlu0 %978 }
 0x21f   : > { %v1447_v33 = vsel %vm1425_vm5, %v1414_v42, %v979_v49  ;;  %v533_v42 = vld [vmem:[#allocation2 + $0x48] sm:$0xf] }
 0x221   : > { %v1057_v38 = vpop.permute.xlu1 %1056 }
 0x222   : > { %v1055_v53 = vpop.permute.xlu0 %1054  ;;  %v1478_v51 = vsel %vm1458_vm6, %v1445_v50, %v1057_v38  ;;  %v1449_v38 = vsel %vm1425_vm5, %v1416_v20, %v981_v52 }
 0x223   : > { %v1476_v5 = vsel %vm1458_vm6, %v1443_v1, %v1055_v53 }
 0x225   : > { %v1061_v47 = vpop.permute.xlu1 %1060 }
 0x226   : > { %v1059_v29 = vpop.permute.xlu0 %1058 }
 0x227   : > { %v1480_v21 = vsel %vm1458_vm6, %v1447_v33, %v1059_v29 }
 0x229   : > { %v1137_v63 = vpop.permute.xlu1 %1136 }
 0x22a   : > { %v1135_v0 = vpop.permute.xlu0 %1134  ;;  %v1511_v28 = vsel %vm1491_vm7, %v1478_v51, %v1137_v63  ;;  %v1482_v63 = vsel %vm1458_vm6, %v1449_v38, %v1061_v47 }
 0x22b   : > { %v1509_v59 = vsel %vm1491_vm7, %v1476_v5, %v1135_v0 }
 0x22d   : > { %v1141_v60 = vpop.permute.xlu1 %1140 }
 0x22e   : > { %v1139_v7 = vpop.permute.xlu0 %1138  ;;  %v1515_v32 = vsel %vm1491_vm7, %v1482_v63, %v1141_v60 }
 0x22f   : > { %v1513_v40 = vsel %vm1491_vm7, %v1480_v21, %v1139_v7 }
 0x231   : > { %v1217_v14 = vpop.permute.xlu1 %1216 }
 0x232   : > { %v1215_v22 = vpop.permute.xlu0 %1214  ;;  %v1544_v3 = vsel %vm1524_vm8, %v1511_v28, %v1217_v14 }
 0x233   : > { %v1542_v18 = vsel %vm1524_vm8, %v1509_v59, %v1215_v22 }
 0x235   : > { %v1221_v36 = vpop.permute.xlu1 %1220 }
 0x236   : > { %v1219_v43 = vpop.permute.xlu0 %1218  ;;  %v1548_v46 = vsel %vm1524_vm8, %v1515_v32, %v1221_v36 }
 0x237   : > { %v1546_v17 = vsel %vm1524_vm8, %v1513_v40, %v1219_v43 }
 0x239   : > { %v1297_v27 = vpop.permute.xlu1 %1296 }
 0x23a   : > { %v1295_v15 = vpop.permute.xlu0 %1294  ;;  %v1577_v6 = vsel %vm1557_vm9, %v1544_v3, %v1297_v27 }
 0x23b   : > { %v1575_v26 = vsel %vm1557_vm9, %v1542_v18, %v1295_v15 }
 0x23c   : > { %v4528_v24 = vcombine.low %v1575_v26, %v1577_v6  ;;  %v532_v6 = vld [vmem:[#allocation2 + $0x44] sm:$0xf] }
 0x23d   : > { %v745_v48 = vpop.permute.xlu1 %744 }
 0x23e   : > { %v743_v53 = vpop.permute.xlu0 %742  ;;  %4836 = vmatprep.mubr.msk.bf16.mxu0 %vm1642_vm10, %v4528_v24  ;;  %v1352_v30 = vsel %vm1310_vm2, %v532_v6, %v745_v48 }
 0x23f   : > { %v1349_v24 = vsel %vm1310_vm2, %v531_v23, %v743_v53 }
 0x241   : > { %v1301_v0 = vpop.permute.xlu1 %1300 }
 0x242   : > { %v1299_v61 = vpop.permute.xlu0 %1298  ;;  %v1581_v52 = vsel %vm1557_vm9, %v1548_v46, %v1301_v0 }
 0x243   : > { %v1579_v12 = vsel %vm1557_vm9, %v1546_v17, %v1299_v61 }
 0x244   : > { %v4529_v14 = vcombine.low %v1579_v12, %v1581_v52 }
 0x245   : > { %v749_v49 = vpop.permute.xlu1 %748 }
 0x246   : > { %v747_v22 = vpop.permute.xlu0 %746  ;;  %4837 = vmatmul.mubr.msk.bf16.gmra.mrb[8].mxu0 %vm1642_vm10, %v4529_v14  ;;  %v1358_v46 = vsel %vm1310_vm2, %v534_v19, %v749_v49 }
 0x247   : > { %v1355_v0 = vsel %vm1310_vm2, %v533_v42, %v747_v22 }
 0x249   : > { %v825_v47 = vpop.permute.xlu1 %824 }
 0x24a   : > { %v823_v29 = vpop.permute.xlu0 %822  ;;  %v1387_v20 = vsel %vm1359_vm3, %v1352_v30, %v825_v47 }
 0x24b   : > { %v1385_v38 = vsel %vm1359_vm3, %v1349_v24, %v823_v29 }
 0x24d   : > { %v829_v60 = vpop.permute.xlu1 %828 }
 0x24e   : > { %v827_v10 = vpop.permute.xlu0 %826  ;;  %v1391_v17 = vsel %vm1359_vm3, %v1358_v46, %v829_v60 }
 0x24f   : > { %v1389_v12 = vsel %vm1359_vm3, %v1355_v0, %v827_v10 }
 0x251   : > { %v905_v7 = vpop.permute.xlu1 %904 }
 0x252   : > { %v903_v34 = vpop.permute.xlu0 %902  ;;  %v1420_v33 = vsel %vm1392_vm4, %v1387_v20, %v905_v7 }
 0x253   : > { %v1418_v21 = vsel %vm1392_vm4, %v1385_v38, %v903_v34 }
 0x254   : > { %v6208_v25 = vpop.f32.mrb[12].mxu1 }
 0x255   : > { %v909_v31 = vpop.permute.xlu1 %908  ;;  %v6210_v16 = vpop.f32.mrb[13].mxu1 }
 0x256   : > { %v907_v36 = vpop.permute.xlu0 %906  ;;  %v6212_v54 = vpop.f32.mrb[14].mxu1  ;;  %v1424_v14 = vsel %vm1392_vm4, %v1391_v17, %v909_v31 }
 0x257   : > { %v6214_v50 = vpop.f32.mrb[15].mxu1  ;;  %v1422_v7 = vsel %vm1392_vm4, %v1389_v12, %v907_v36  ;;  %vm3726_vm4 = vcmask 1044484  }
 0x259   : > { %v985_v43 = vpop.permute.xlu1 %984 }
 0x25a   : > { %v983_v1 = vpop.permute.xlu0 %982  ;;  %v1453_v32 = vsel %vm1425_vm5, %v1420_v33, %v985_v43 }
 0x25b   : > { %v1451_v48 = vsel %vm1425_vm5, %v1418_v21, %v983_v1 }
 0x25d   : > { %v989_v51 = vpop.permute.xlu1 %988 }
 0x25e   : > { %v987_v55 = vpop.permute.xlu0 %986  ;;  %v1457_v34 = vsel %vm1425_vm5, %v1424_v14, %v989_v51 }
 0x25f   : > { %v1455_v1 = vsel %vm1425_vm5, %v1422_v7, %v987_v55 }
 0x261   : > { %v1065_v5 = vpop.permute.xlu1 %1064 }
 0x262   : > { %v1063_v28 = vpop.permute.xlu0 %1062  ;;  %v1486_v53 = vsel %vm1458_vm6, %v1453_v32, %v1065_v5 }
 0x263   : > { %v1484_v61 = vsel %vm1458_vm6, %v1451_v48, %v1063_v28 }
 0x265   : > { %v1069_v4 = vpop.permute.xlu1 %1068 }
 0x266   : > { %v1067_v59 = vpop.permute.xlu0 %1066  ;;  %v1490_v10 = vsel %vm1458_vm6, %v1457_v34, %v1069_v4 }
 0x267   : > { %v1488_v5 = vsel %vm1458_vm6, %v1455_v1, %v1067_v59  ;;  %vm3728_vm6 = vcmask 1045509  }
 0x269   : > { %v1145_v3 = vpop.permute.xlu1 %1144 }
 0x26a   : > { %v1143_v27 = vpop.permute.xlu0 %1142  ;;  %v1519_v52 = vsel %vm1491_vm7, %v1486_v53, %v1145_v3 }
 0x26b   : > { %v1517_v47 = vsel %vm1491_vm7, %v1484_v61, %v1143_v27 }
 0x26d   : > { %v1149_v18 = vpop.permute.xlu1 %1148 }
 0x26e   : > { %v1147_v15 = vpop.permute.xlu0 %1146  ;;  %v1523_v28 = vsel %vm1491_vm7, %v1490_v10, %v1149_v18 }
 0x26f   : > { %v1521_v36 = vsel %vm1491_vm7, %v1488_v5, %v1147_v15  ;;  %vm3730_vm7 = vcmask 1046534  }
 0x271   : > { %v1225_v26 = vpop.permute.xlu1 %1224 }
 0x272   : > { %v1223_v11 = vpop.permute.xlu0 %1222  ;;  %v1552_v49 = vsel %vm1524_vm8, %v1519_v52, %v1225_v26 }
 0x273   : > { %v1550_v22 = vsel %vm1524_vm8, %v1517_v47, %v1223_v11 }
 0x275   : > { %v1229_v63 = vpop.permute.xlu1 %1228 }
 0x276   : > { %v1227_v40 = vpop.permute.xlu0 %1226  ;;  %v1556_v51 = vsel %vm1524_vm8, %v1523_v28, %v1229_v63 }
 0x277   : > { %v1554_v6 = vsel %vm1524_vm8, %v1521_v36, %v1227_v40  ;;  %vm3732_vm8 = vcmask 1047559  }
 0x279   : > { %v1305_v29 = vpop.permute.xlu1 %1304 }
 0x27a   : > { %v1303_v60 = vpop.permute.xlu0 %1302  ;;  %v1585_v43 = vsel %vm1557_vm9, %v1552_v49, %v1305_v29 }
 0x27b   : > { %v1583_v31 = vsel %vm1557_vm9, %v1550_v22, %v1303_v60 }
 0x27c   : > { %v4530_v3 = vcombine.low %v1583_v31, %v1585_v43 }
 0x27d   : > { %v1309_v27 = vpop.permute.xlu1 %1308 }
 0x27e   : > { %v1307_v23 = vpop.permute.xlu0 %1306  ;;  %v1589_v26 = vsel %vm1557_vm9, %v1556_v51, %v1309_v27  ;;  %4840 = vmatprep.mubr.msk.bf16.mxu0 %vm1642_vm10, %v4530_v3 }
 0x27f   : > { %v1587_v55 = vsel %vm1557_vm9, %v1554_v6, %v1307_v23  ;;  %v5215_v23 = vmov 0.0   ;;  %vm3846_vm9 = vcmask 1041408  }
 0x280   : > { %v4531_v4 = vcombine.low %v1587_v55, %v1589_v26  ;;  %4864 = vmatprep.subr.bf16.mxu0 %v5215_v23  ;;  %4870 = vmatprep.subr.bf16.mxu1 %v5215_v23  ;;  %v3198_v26 = vld [vmem:[#allocation2 + $0x20] sm:$0xf]  ;;  %v3214_v55 = vld [vmem:[#allocation2 + $0x24] sm:$0xf] }
 0x281   : > { %v3098_v59 = vpop.permute.xlu1 %3097  ;;  %4872 = vmatprep.mubr.msk.bf16.mxu1 %vm5216_vm14, %v5215_v23 }
 0x282   : > { %v3073_v11 = vpop.permute.xlu0 %3072  ;;  %4841 = vmatmul.mubr.msk.bf16.gmra.mrb[12].mxu0 %vm1642_vm10, %v4531_v4  ;;  %v3197_v4 = vld [vmem:[#allocation2 + $0x1c] sm:$0xf] }
 0x283   : > { %v3076_v18 = vmul.f32 %v3073_v11, %v5927_v58  ;;  %v3075_v15 = vmul.f32 %v3073_v11, %v5922_v9  ;;  %v3078_v19 = vmul.f32 %v5924_v13, %v3073_v11  ;;  %v3077_v20 = vmul.f32 %v5920_v8, %v3073_v11  ;;  %4866 = vmatprep.mubr.msk.bf16.mxu0 %vm5216_vm14, %v5215_v23 }
 0x284   : > { %v3080_v33 = vmul.f32 %v3073_v11, %v6052_v57  ;;  %v3079_v63 = vmul.f32 %v3073_v11, %v6047_v62  ;;  %v3082_v13 = vmul.f32 %v6049_v56, %v3073_v11  ;;  %v3081_v8 = vmul.f32 %v6045_v39, %v3073_v11 }
 0x285   : > { %v3101_v30 = vadd.f32 %v3098_v59, %v3076_v18  ;;  %v3100_v24 = vadd.f32 %v3098_v59, %v3075_v15  ;;  %v3103_v42 = vadd.f32 %v3098_v59, %v3078_v19  ;;  %v3102_v38 = vadd.f32 %v3098_v59, %v3077_v20  ;;  %v3246_v18 = vld [vmem:[#allocation2 + $0x28] sm:$0xf]  ;;  %v3245_v19 = vld [vmem:[#allocation2 + $0x24] sm:$0xf] }
 0x286   : > { %v3105_v9 = vadd.f32 %v3098_v59, %v3080_v33  ;;  %v3104_v58 = vadd.f32 %v3098_v59, %v3079_v63  ;;  %v3107_v21 = vadd.f32 %v3098_v59, %v3082_v13  ;;  %v3106_v32 = vadd.f32 %v3098_v59, %v3081_v8  ;;  %v3199_v20 = vld [vmem:[#allocation2 + $0x24] sm:$0xf]  ;;  %v3202_v13 = vld [vmem:[#allocation2 + $0x30] sm:$0xf]  ;;  %v3218_v8 = vld [vmem:[#allocation2 + $0x34] sm:$0xf] }
 0x287   : > { %3134 = vrot.lane.b32.xlu1 %v3101_v30, %s5207_s16  ;;  %3132 = vrot.lane.b32.xlu0 %v3100_v24, %s5207_s16  ;;  %v3084_v57 = vmul.f32 %v3073_v11, %v6168_v44  ;;  %v3083_v62 = vmul.f32 %v3073_v11, %v6164_v37  ;;  %v3086_v56 = vmul.f32 %v6166_v45, %v3073_v11  ;;  %v3200_v30 = vld [vmem:[#allocation2 + $0x28] sm:$0xf]  ;;  %v3216_v24 = vld [vmem:[#allocation2 + $0x2c] sm:$0xf] }
 0x288   : > { %v3085_v39 = vmul.f32 %v6162_v41, %v3073_v11  ;;  %v3088_v44 = vmul.f32 %v3073_v11, %v6214_v50  ;;  %v3087_v37 = vmul.f32 %v3073_v11, %v6210_v16  ;;  %v3090_v47 = vmul.f32 %v6212_v54, %v3073_v11 }
 0x289   : > { %v3109_v40 = vadd.f32 %v3098_v59, %v3084_v57  ;;  %v3108_v46 = vadd.f32 %v3098_v59, %v3083_v62  ;;  %v3111_v53 = vadd.f32 %v3098_v59, %v3086_v56  ;;  %v3089_v50 = vmul.f32 %v6208_v25, %v3073_v11  ;;  %v3213_v11 = vld [vmem:[#allocation2 + $0x20] sm:$0xf]  ;;  %v3217_v57 = vld [vmem:[#allocation2 + $0x30] sm:$0xf] }
 0x28a   : > { %v3110_v0 = vadd.f32 %v3098_v59, %v3085_v39  ;;  %v3113_v29 = vadd.f32 %v3098_v59, %v3088_v44  ;;  %v3112_v7 = vadd.f32 %v3098_v59, %v3087_v37  ;;  %v3115_v25 = vadd.f32 %v3098_v59, %v3090_v47  ;;  %v3220_v44 = vld [vmem:[#allocation2 + $0x3c] sm:$0xf]  ;;  %v3249_v37 = vld [vmem:[#allocation2 + $0x34] sm:$0xf] }
 0x28b   : > { %3138 = vrot.lane.b32.xlu1 %v3103_v42, %s5207_s16  ;;  %3136 = vrot.lane.b32.xlu0 %v3102_v38, %s5207_s16  ;;  %v3114_v54 = vadd.f32 %v3098_v59, %v3089_v50  ;;  %v3230_v59 = vmax.bf16 %v3214_v55, %v3198_v26  ;;  %v3229_v15 = vmax.bf16 %v3213_v11, %v3197_v4  ;;  %v3215_v42 = vld [vmem:[#allocation2 + $0x28] sm:$0xf] }
 0x28c   : > { %v3232_v33 = vmax.bf16 %v3216_v24, %v3200_v30  ;;  %v4779_v30 = vld [vmem:[#allocation2 + $0x30] sm:$0xff]  }
 0x28d   : > { %v3262_v38 = vmax.bf16 %v3246_v18, %v3230_v59  ;;  %v3261_v63 = vmax.bf16 %v3245_v19, %v3229_v15 }
 0x28f   : > { %3142 = vrot.lane.b32.xlu1 %v3105_v9, %s5207_s16  ;;  %3140 = vrot.lane.b32.xlu0 %v3104_v58, %s5207_s16  ;;  %v3248_v9 = vld [vmem:[#allocation2 + $0x30] sm:$0xf]  ;;  %v3231_v58 = vmax.bf16 %v3215_v42, %v3199_v20  ;;  %v3278_v62 = vunpack.c.l.bf16 %v3262_v38  ;;  %v3277_v56 = vunpack.c.l.bf16 %v3261_v63  ;;  %v4725_v38 = vunpack.c.h.bf16 %v4779_v30 }
 0x293   : > { %3146 = vrot.lane.b32.xlu1 %v3107_v21, %s5207_s16  ;;  %3144 = vrot.lane.b32.xlu0 %v3106_v32, %s5207_s16  ;;  %v3247_v21 = vld [vmem:[#allocation2 + $0x2c] sm:$0xf] }
 0x294   : > { %v3201_v32 = vld [vmem:[#allocation2 + $0x2c] sm:$0xf]  ;;  %v3263_v39 = vmax.bf16 %v3247_v21, %v3231_v58  ;;  %v4780_v58 = vld [vmem:[#allocation2 + $0x38] sm:$0xff]  }
 0x295   : > { %v4729_v21 = vunpack.c.h.bf16 %v4780_v58 }
 0x296   : > { %v3279_v47 = vunpack.c.l.bf16 %v3263_v39  ;;  %v3221_v39 = vld [vmem:[#allocation2 + $0x40] sm:$0xf] }
 0x297   : > { %3150 = vrot.lane.b32.xlu1 %v3109_v40, %s5207_s16  ;;  %3148 = vrot.lane.b32.xlu0 %v3108_v46, %s5207_s16  ;;  %v3264_v40 = vmax.bf16 %v3248_v9, %v3232_v33  ;;  %v3234_v46 = vmax.bf16 %v3218_v8, %v3202_v13  ;;  %v4724_v33 = vunpack.c.l.bf16 %v4779_v30 }
 0x299   : > { %v4830_v48 = vpop.f32.mrb[0].mxu0 }
 0x29a   : > { %v1777_v17 = vmul.f32 %v4830_v48, %v6156_v35  ;;  %v1705_v61 = vpop.f32.mrb[1].mxu0  ;;  %v3250_v48 = vld [vmem:[#allocation2 + $0x38] sm:$0xf] }
 0x29b   : > { %v1775_v52 = vmul.f32 %v6156_v35, %v1705_v61  ;;  %v4831_v12 = vpop.f32.mrb[2].mxu0  ;;  %3154 = vrot.lane.b32.xlu1 %v3111_v53, %s5207_s16  ;;  %3152 = vrot.lane.b32.xlu0 %v3110_v0, %s5207_s16  ;;  %v3233_v53 = vmax.bf16 %v3217_v57, %v3201_v32  ;;  %v3204_v0 = vld [vmem:[#allocation2 + $0x38] sm:$0xf]  ;;  %v4728_v32 = vunpack.c.l.bf16 %v4780_v58 }
 0x29c   : > { %v1800_v41 = vadd.f32 %v6151_v2, %v1777_v17  ;;  %v1778_v45 = vmul.f32 %v4831_v12, %v6156_v35  ;;  %v1708_v14 = vpop.f32.mrb[3].mxu0  ;;  %v3203_v17 = vld [vmem:[#allocation2 + $0x34] sm:$0xf]  ;;  %v3219_v61 = vld [vmem:[#allocation2 + $0x38] sm:$0xf]  ;;  %v3280_v12 = vunpack.c.l.bf16 %v3264_v40 }
 0x29d   : > { %v1798_v16 = vadd.f32 %v6151_v2, %v1775_v52  ;;  %v1776_v49 = vmul.f32 %v6156_v35, %v1708_v14  ;;  %v3301_v52 = vmul.f32 %v6156_v35, %v3278_v62  ;;  %v3300_v14 = vmul.f32 %v6156_v35, %v3277_v56  ;;  %v3207_v40 = vld [vmem:[#allocation2 + $0x44] sm:$0xf]  ;;  %v3205_v56 = vld [vmem:[#allocation2 + $0x3c] sm:$0xf] }
 0x29e   : > { %1816 = vst.msk [vmem:[#allocation3 + $0x10] sm:$0xff] %vm1310_vm2, %v1800_v41  ;;  %v1801_v34 = vadd.f32 %v6151_v2, %v1778_v45  ;;  %v3266_v41 = vmax.bf16 %v3250_v48, %v3234_v46  ;;  %v3236_v45 = vmax.bf16 %v3220_v44, %v3204_v0  ;;  %v3265_v50 = vmax.bf16 %v3249_v37, %v3233_v53  ;;  %v3223_v46 = vld [vmem:[#allocation2 + $0x48] sm:$0xf]  ;;  %v3224_v53 = vld [vmem:[#allocation2 + $0x4c] sm:$0xf] }
 0x29f   : > { %1814 = vst.msk [vmem:[#allocation3] sm:$0xff] %vm1310_vm2, %v1798_v16  ;;  %v1799_v22 = vadd.f32 %v6151_v2, %v1776_v49  ;;  %3158 = vrot.lane.b32.xlu1 %v3113_v29, %s5207_s16  ;;  %3156 = vrot.lane.b32.xlu0 %v3112_v7, %s5207_s16  ;;  %v3252_v16 = vld [vmem:[#allocation2 + $0x40] sm:$0xf]  ;;  %v3235_v49 = vmax.bf16 %v3219_v61, %v3203_v17  ;;  %v3251_v29 = vld [vmem:[#allocation2 + $0x3c] sm:$0xf] }
 0x2a0   : > { %1817 = vst.msk [vmem:[#allocation3 + $0x18] sm:$0xff] %vm1310_vm2, %v1801_v34  ;;  %v4715_v7 = vld [vmem:[#allocation2 + $0x20] sm:$0xff]   ;;  %v3324_v34 = vadd.f32 %v6151_v2, %v3301_v52  ;;  %v3208_v48 = vld [vmem:[#allocation2 + $0x48] sm:$0xf]  ;;  %v3239_v0 = vmax.bf16 %v3223_v46, %v3207_v40  ;;  %v3255_v17 = vld [vmem:[#allocation2 + $0x4c] sm:$0xf]  ;;  %v3237_v61 = vmax.bf16 %v3221_v39, %v3205_v56 }
 0x2a1   : > { %1815 = vst.msk [vmem:[#allocation3 + $0x8] sm:$0xff] %vm1310_vm2, %v1799_v22  ;;  %v3303_v22 = vmul.f32 %v6156_v35, %v3280_v12  ;;  %v3206_v44 = vld [vmem:[#allocation2 + $0x40] sm:$0xf]  ;;  %v3222_v37 = vld [vmem:[#allocation2 + $0x44] sm:$0xf]  ;;  %v3240_v12 = vmax.bf16 %v3224_v53, %v3208_v48 }
 0x2a2   : > { %v3253_v52 = vld [vmem:[#allocation2 + $0x44] sm:$0xf] }
 0x2a3   : > { %3162 = vrot.lane.b32.xlu1 %v3115_v25, %s5207_s16  ;;  %3160 = vrot.lane.b32.xlu0 %v3114_v54, %s5207_s16  ;;  %v3282_v25 = vunpack.c.l.bf16 %v3266_v41  ;;  %v3268_v54 = vmax.bf16 %v3252_v16, %v3236_v45  ;;  %v3256_v41 = vld [vmem:[#allocation2 + $0x50] sm:$0xf]  ;;  %v3238_v45 = vmax.bf16 %v3222_v37, %v3206_v44 }
 0x2a4   : > { %v3272_v16 = vmax.bf16 %v3256_v41, %v3240_v12  ;;  %v4786_v44 = vld [vmem:[%s6389_s21 + $0x10] sm:$0xff]  }
 0x2d9   : > { %v4834_v60 = vpop.f32.mrb[4].mxu0 }
 0x2da   : > { %v1781_v43 = vmul.f32 %v4834_v60, %v6156_v35  ;;  %v1721_v1 = vpop.f32.mrb[5].mxu0  ;;  %v3323_v60 = vadd.f32 %v6151_v2, %v3300_v14  ;;  %v3271_v14 = vmax.bf16 %v3255_v17, %v3239_v0  ;;  %v4756_v17 = vunpack.c.l.bf16 %v4786_v44 }
 0x2db   : > { %v1779_v10 = vmul.f32 %v6156_v35, %v1721_v1  ;;  %v4835_v31 = vpop.f32.mrb[6].mxu0  ;;  %v3281_v1 = vunpack.c.l.bf16 %v3265_v50  ;;  %v3269_v50 = vmax.bf16 %v3253_v52, %v3237_v61 }
 0x2dc   : > { %v1804_v5 = vadd.f32 %v6151_v2, %v1781_v43  ;;  %v1782_v28 = vmul.f32 %v4835_v31, %v6156_v35  ;;  %v1724_v3 = vpop.f32.mrb[7].mxu0  ;;  %v3302_v43 = vmul.f32 %v6156_v35, %v3279_v47  ;;  %v4717_v31 = vunpack.c.h.bf16 %v4715_v7  ;;  %v3254_v47 = vld [vmem:[#allocation2 + $0x48] sm:$0xf] }
 0x2dd   : > { %v1802_v36 = vadd.f32 %v6151_v2, %v1779_v10  ;;  %v1780_v51 = vmul.f32 %v6156_v35, %v1724_v3  ;;  %v3267_v10 = vmax.bf16 %v3251_v29, %v3235_v49  ;;  %v3304_v55 = vmul.f32 %v6156_v35, %v3281_v1 }
 0x2de   : > { %1820 = vst.msk [vmem:[#allocation3 + $0x30] sm:$0xff] %vm1310_vm2, %v1804_v5  ;;  %v1805_v27 = vadd.f32 %v6151_v2, %v1782_v28  ;;  %v4716_v5 = vunpack.c.l.bf16 %v4715_v7  ;;  %v3325_v26 = vadd.f32 %v6151_v2, %v3302_v43  ;;  %v3270_v49 = vmax.bf16 %v3254_v47, %v3238_v45 }
 0x2df   : > { %1818 = vst.msk [vmem:[#allocation3 + $0x20] sm:$0xff] %vm1310_vm2, %v1802_v36  ;;  %v1803_v6 = vadd.f32 %v6151_v2, %v1780_v51  ;;  %v4778_v36 = vld [vmem:[#allocation2 + $0x28] sm:$0xff]   ;;  %v3326_v51 = vadd.f32 %v6151_v2, %v3303_v22  ;;  %v3283_v4 = vunpack.c.l.bf16 %v3267_v10  ;;  %v3327_v19 = vadd.f32 %v6151_v2, %v3304_v55 }
 0x2e0   : > { %1821 = vst.msk [vmem:[#allocation3 + $0x38] sm:$0xff] %vm1310_vm2, %v1805_v27  ;;  %v3305_v27 = vmul.f32 %v6156_v35, %v3282_v25  ;;  %v4721_v11 = vunpack.c.h.bf16 %v4778_v36  ;;  %v4720_v59 = vunpack.c.l.bf16 %v4778_v36  ;;  %v3287_v29 = vunpack.c.l.bf16 %v3271_v14  ;;  %v4781_v36 = vld [vmem:[#allocation2 + $0x40] sm:$0xff]  }
 0x2e1   : > { %1819 = vst.msk [vmem:[#allocation3 + $0x28] sm:$0xff] %vm1310_vm2, %v1803_v6  ;;  %v3284_v6 = vunpack.c.l.bf16 %v3268_v54  ;;  %v3306_v42 = vmul.f32 %v6156_v35, %v3283_v4  ;;  %v3285_v7 = vunpack.c.l.bf16 %v3269_v50  ;;  %v3286_v22 = vunpack.c.l.bf16 %v3270_v49  ;;  %v3209_v49 = vld [vmem:[#allocation2 + $0x4c] sm:$0xf] }
 0x2e2   : > { %v3328_v24 = vadd.f32 %v6151_v2, %v3305_v27  ;;  %v3310_v54 = vmul.f32 %v6156_v35, %v3287_v29  ;;  %v4757_v45 = vunpack.c.h.bf16 %v4786_v44  ;;  %v3211_v29 = vld [vmem:[#allocation2 + $0x54] sm:$0xf]  ;;  %v4789_v44 = vld [vmem:[%s6389_s21 + $0x28] sm:$0xff]  }
 0x2e3   : > { %v3307_v20 = vmul.f32 %v6156_v35, %v3284_v6  ;;  %v3329_v8 = vadd.f32 %v6151_v2, %v3306_v42  ;;  %v3308_v43 = vmul.f32 %v6156_v35, %v3285_v7  ;;  %v3309_v27 = vmul.f32 %v6156_v35, %v3286_v22  ;;  %v3227_v7 = vld [vmem:[#allocation2 + $0x58] sm:$0xf] }
 0x2e5   : > { %v3330_v13 = vadd.f32 %v6151_v2, %v3307_v20 }
 0x2f9   : > { %v3135_v28 = vpop.permute.xlu1 %3134  ;;  %v3133_v3 = vpop.permute.xlu0 %3132 }
 0x2fa   : > { %3182 = vst.msk [vmem:[#allocation3 + $0x8] sm:$0xff] %vm3180_vm11, %v3135_v28  ;;  %3181 = vst.msk [vmem:[#allocation3] sm:$0xff] %vm3180_vm11, %v3133_v3 }
 0x2fb   : > { %3341 = vst.msk [vmem:[#allocation3 + $0x8] sm:$0xff] %vm3339_vm12, %v3324_v34  ;;  %3340 = vst.msk [vmem:[#allocation3] sm:$0xff] %vm3339_vm12, %v3323_v60  ;;  %v3288_v34 = vunpack.c.l.bf16 %v3272_v16  ;;  %v4787_v16 = vld [vmem:[%s6389_s21 + $0x18] sm:$0xff]  }
 0x2fc   : > { %3390 = vst.msk [vmem:[#allocation3 + $0x8] sm:$0xff] %vm3388_vm13, %v4717_v31  ;;  %3389 = vst.msk [vmem:[#allocation3] sm:$0xff] %vm3388_vm13, %v4716_v5  ;;  %v4782_v31 = vld [vmem:[#allocation2 + $0x48] sm:$0xff]  }
 0x2fd   : > { %v3139_v18 = vpop.permute.xlu1 %3138  ;;  %v3137_v15 = vpop.permute.xlu0 %3136  ;;  %v3311_v28 = vmul.f32 %v6156_v35, %v3288_v34  ;;  %v4737_v42 = vunpack.c.h.bf16 %v4782_v31  ;;  %v3225_v34 = vld [vmem:[#allocation2 + $0x50] sm:$0xf] }
 0x2fe   : > { %3184 = vst.msk [vmem:[#allocation3 + $0x18] sm:$0xff] %vm3180_vm11, %v3139_v18  ;;  %3183 = vst.msk [vmem:[#allocation3 + $0x10] sm:$0xff] %vm3180_vm11, %v3137_v15  ;;  %v3331_v18 = vadd.f32 %v6151_v2, %v3308_v43 }
 0x2ff   : > { %3343 = vst.msk [vmem:[#allocation3 + $0x18] sm:$0xff] %vm3339_vm12, %v3326_v51  ;;  %3342 = vst.msk [vmem:[#allocation3 + $0x10] sm:$0xff] %vm3339_vm12, %v3325_v26  ;;  %v3333_v26 = vadd.f32 %v6151_v2, %v3310_v54  ;;  %v3334_v20 = vadd.f32 %v6151_v2, %v3311_v28  ;;  %v3228_v54 = vld [vmem:[#allocation2 + $0x5c] sm:$0xf]  ;;  %v3210_v28 = vld [vmem:[#allocation2 + $0x50] sm:$0xf] }
 0x300   : > { %3392 = vst.msk [vmem:[#allocation3 + $0x18] sm:$0xff] %vm3388_vm13, %v4721_v11  ;;  %3391 = vst.msk [vmem:[#allocation3 + $0x10] sm:$0xff] %vm3388_vm13, %v4720_v59  ;;  %v4736_v11 = vunpack.c.l.bf16 %v4782_v31  ;;  %v3243_v31 = vmax.bf16 %v3227_v7, %v3211_v29 }
 0x301   : > { %v3143_v63 = vpop.permute.xlu1 %3142  ;;  %v3141_v9 = vpop.permute.xlu0 %3140 }
 0x302   : > { %3186 = vst.msk [vmem:[#allocation3 + $0x28] sm:$0xff] %vm3180_vm11, %v3143_v63  ;;  %3185 = vst.msk [vmem:[#allocation3 + $0x20] sm:$0xff] %vm3180_vm11, %v3141_v9  ;;  %v4733_v9 = vunpack.c.h.bf16 %v4781_v36 }
 0x303   : > { %3345 = vst.msk [vmem:[#allocation3 + $0x28] sm:$0xff] %vm3339_vm12, %v3328_v24  ;;  %3344 = vst.msk [vmem:[#allocation3 + $0x20] sm:$0xff] %vm3339_vm12, %v3327_v19  ;;  %v4732_v24 = vunpack.c.l.bf16 %v4781_v36  ;;  %v3259_v36 = vld [vmem:[#allocation2 + $0x5c] sm:$0xf] }
 0x304   : > { %3394 = vst.msk [vmem:[#allocation3 + $0x28] sm:$0xff] %vm3388_vm13, %v4725_v38  ;;  %3393 = vst.msk [vmem:[#allocation3 + $0x20] sm:$0xff] %vm3388_vm13, %v4724_v33  ;;  %v3332_v33 = vadd.f32 %v6151_v2, %v3309_v27 }
 0x305   : > { %v3147_v57 = vpop.permute.xlu1 %3146  ;;  %v3145_v62 = vpop.permute.xlu0 %3144 }
 0x306   : > { %3188 = vst.msk [vmem:[#allocation3 + $0x38] sm:$0xff] %vm3180_vm11, %v3147_v57  ;;  %3187 = vst.msk [vmem:[#allocation3 + $0x30] sm:$0xff] %vm3180_vm11, %v3145_v62 }
 0x307   : > { %3347 = vst.msk [vmem:[#allocation3 + $0x38] sm:$0xff] %vm3339_vm12, %v3330_v13  ;;  %3346 = vst.msk [vmem:[#allocation3 + $0x30] sm:$0xff] %vm3339_vm12, %v3329_v8  ;;  %v3406_v8 = vld [vmem:[#allocation3 + $0x8] sm:$0xff]  ;;  %v3407_v46 = vld [vmem:[#allocation3 + $0x10] sm:$0xff] }
 0x308   : > { %3396 = vst.msk [vmem:[#allocation3 + $0x38] sm:$0xff] %vm3388_vm13, %v4729_v21  ;;  %3395 = vst.msk [vmem:[#allocation3 + $0x30] sm:$0xff] %vm3388_vm13, %v4728_v32  ;;  %v3405_v21 = vld [vmem:[#allocation3] sm:$0xff]  ;;  %v4785_v32 = vld [vmem:[%s6389_s21 + $0x8] sm:$0xff]  }
 0x309   : > { %v3149_v25 = vpop.permute.xlu0 %3148  ;;  %v3151_v1 = vpop.permute.xlu1 %3150  ;;  %v4752_v57 = vunpack.c.l.bf16 %v4785_v32  ;;  %v4753_v56 = vunpack.c.h.bf16 %v4785_v32  ;;  %v3408_v0 = vld [vmem:[#allocation3 + $0x18] sm:$0xff] }
 0x30b   : > { %v6397_v39 = vadd.f32 %v4752_v57, %v3407_v46  ;;  %v6410_v61 = vadd.f32 %v4753_v56, %v3408_v0  ;;  %v3409_v12 = vld [vmem:[#allocation3 + $0x20] sm:$0xff]  ;;  %v3410_v50 = vld [vmem:[#allocation3 + $0x28] sm:$0xff] }
 0x30c   : > { %v6417_v14 = vadd.f32 %v4756_v17, %v3409_v12  ;;  %v6425_v43 = vadd.f32 %v4757_v45, %v3410_v50  ;;  %v4784_v12 = vld [vmem:[#allocation2 + $0x58] sm:$0xff]   ;;  %v4783_v45 = vld [vmem:[#allocation2 + $0x50] sm:$0xff]  }
 0x30d   : > { %v3153_v30 = vpop.permute.xlu0 %3152  ;;  %v3155_v63 = vpop.permute.xlu1 %3154  ;;  %v6414_v52 = vsel %vm1425_vm5, %v6397_v39, 0.0  ;;  %v6421_v47 = vsel %vm1425_vm5, %v6410_v61, 0.0 }
 0x311   : > { %v3159_v29 = vpop.permute.xlu1 %3158 }
 0x319   : > { %v4838_v60 = vpop.f32.mrb[8].mxu0 }
 0x31a   : > { %v1785_v10 = vmul.f32 %v4838_v60, %v6156_v35  ;;  %v1737_v5 = vpop.f32.mrb[9].mxu0  ;;  %v4760_v60 = vunpack.c.l.bf16 %v4787_v16 }
 0x31b   : > { %v1783_v3 = vmul.f32 %v6156_v35, %v1737_v5  ;;  %v4839_v51 = vpop.f32.mrb[10].mxu0  ;;  %v3241_v5 = vmax.bf16 %v3225_v34, %v3209_v49 }
 0x31c   : > { %v1808_v6 = vadd.f32 %v6151_v2, %v1785_v10  ;;  %v1786_v55 = vmul.f32 %v4839_v51, %v6156_v35  ;;  %v1740_v4 = vpop.f32.mrb[11].mxu0  ;;  %v3411_v10 = vld [vmem:[#allocation3 + $0x30] sm:$0xff] }
 0x31d   : > { %v1806_v59 = vadd.f32 %v6151_v2, %v1783_v3  ;;  %v1784_v15 = vmul.f32 %v6156_v35, %v1740_v4  ;;  %v3226_v3 = vld [vmem:[#allocation2 + $0x54] sm:$0xf]  ;;  %v6432_v4 = vadd.f32 %v4760_v60, %v3411_v10  ;;  %v4744_v60 = vunpack.c.l.bf16 %v4784_v12 }
 0x31e   : > { %1824 = vst.msk [vmem:[#allocation3 + $0x50] sm:$0xff] %vm1310_vm2, %v1808_v6  ;;  %v1809_v19 = vadd.f32 %v6151_v2, %v1786_v55  ;;  %v3257_v51 = vld [vmem:[#allocation2 + $0x54] sm:$0xf]  ;;  %v4761_v55 = vunpack.c.h.bf16 %v4787_v16 }
 0x31f   : > { %3191 = vst.msk [vmem:[#allocation3 + $0x50] sm:$0xff] %vm3180_vm11, %v3153_v30  ;;  %v1807_v38 = vadd.f32 %v6151_v2, %v1784_v15  ;;  %v4747_v2 = vld [vmem:[%s6389_s21] sm:$0xff]   ;;  %v3275_v30 = vmax.bf16 %v3259_v36, %v3243_v31  ;;  %v4740_v31 = vunpack.c.l.bf16 %v4783_v45 }
 0x320   : > { %1822 = vst.msk [vmem:[#allocation3 + $0x40] sm:$0xff] %vm1310_vm2, %v1806_v59  ;;  %1825 = vst.msk [vmem:[#allocation3 + $0x58] sm:$0xff] %vm1310_vm2, %v1809_v19  ;;  %v4748_v58 = vunpack.c.l.bf16 %v4747_v2  ;;  %v4749_v13 = vunpack.c.h.bf16 %v4747_v2  ;;  %v3242_v59 = vmax.bf16 %v3226_v3, %v3210_v28  ;;  %v4788_v15 = vld [vmem:[%s6389_s21 + $0x20] sm:$0xff]   ;;  %v3258_v19 = vld [vmem:[#allocation2 + $0x58] sm:$0xf] }
 0x321   : > { %3350 = vst.msk [vmem:[#allocation3 + $0x50] sm:$0xff] %vm3339_vm12, %v3333_v26  ;;  %v3260_v26 = vld [vmem:[#allocation2 + $0x60] sm:$0xf]  ;;  %v4765_v32 = vunpack.c.h.bf16 %v4788_v15 }
 0x322   : > { %3189 = vst.msk [vmem:[#allocation3 + $0x40] sm:$0xff] %vm3180_vm11, %v3149_v25  ;;  %3192 = vst.msk [vmem:[#allocation3 + $0x58] sm:$0xff] %vm3180_vm11, %v3155_v63  ;;  %v6393_v62 = vadd.f32 %v4748_v58, %v3405_v21  ;;  %v6395_v40 = vadd.f32 %v4749_v13, %v3406_v8  ;;  %v3212_v25 = vld [vmem:[#allocation2 + $0x58] sm:$0xf]  ;;  %v6444_v63 = vsel %vm1425_vm5, %v6432_v4, 0.0  ;;  %v3291_v58 = vunpack.c.l.bf16 %v3275_v30 }
 0x323   : > { %3399 = vst.msk [vmem:[#allocation3 + $0x50] sm:$0xff] %vm3388_vm13, %v4736_v11  ;;  %v3244_v27 = vmax.bf16 %v3228_v54, %v3212_v25  ;;  %v6436_v11 = vsel %vm1425_vm5, %v6425_v43, 0.0  ;;  %v5195_v36 = vld [vmem:[%s6711_s4] ss:$0 sm:$0xff] }
 0x324   : > { %3348 = vst.msk [vmem:[#allocation3 + $0x40] sm:$0xff] %vm3339_vm12, %v3331_v18  ;;  %3351 = vst.msk [vmem:[#allocation3 + $0x58] sm:$0xff] %vm3339_vm12, %v3334_v20  ;;  %v6401_v48 = vsel %vm1425_vm5, %v6393_v62, 0.0  ;;  %v6405_v53 = vsel %vm1425_vm5, %v6395_v40, 0.0  ;;  %v3412_v18 = vld [vmem:[#allocation3 + $0x38] sm:$0xff]  ;;  %v3314_v17 = vmul.f32 %v6156_v35, %v3291_v58 }
 0x325   : > { %1823 = vst.msk [vmem:[#allocation3 + $0x48] sm:$0xff] %vm1310_vm2, %v1807_v38  ;;  %v3598_v37 = vadd.f32 %v6405_v53, %v6401_v48  ;;  %v3276_v20 = vmax.bf16 %v3260_v26, %v3244_v27  ;;  %v4764_v38 = vunpack.c.l.bf16 %v4788_v15  ;;  %v5196_v26 = vld [vmem:[%s6710_s3] ss:$0 sm:$0xff] }
 0x326   : > { %3397 = vst.msk [vmem:[#allocation3 + $0x40] sm:$0xff] %vm3388_vm13, %v4732_v24  ;;  %3400 = vst.msk [vmem:[#allocation3 + $0x58] sm:$0xff] %vm3388_vm13, %v4737_v42  ;;  %v3273_v24 = vmax.bf16 %v3257_v51, %v3241_v5  ;;  %v3337_v27 = vadd.f32 %v5195_v36, %v3314_v17 }
 0x327   : > { %3190 = vst.msk [vmem:[#allocation3 + $0x48] sm:$0xff] %vm3180_vm11, %v3151_v1  ;;  %v3599_v41 = vadd.f32 %v3598_v37, %v6414_v52  ;;  %v6429_v1 = vsel %vm1425_vm5, %v6417_v14, 0.0  ;;  %v3292_v8 = vunpack.c.l.bf16 %v3276_v20  ;;  %v3157_v37 = vpop.permute.xlu0 %3156  ;;  %v4769_v20 = vunpack.c.h.bf16 %v4789_v44 }
 0x328   : > { %3349 = vst.msk [vmem:[#allocation3 + $0x48] sm:$0xff] %vm3339_vm12, %v3332_v33  ;;  %v6440_v33 = vadd.f32 %v4761_v55, %v3412_v18  ;;  %v3289_v13 = vunpack.c.l.bf16 %v3273_v24 }
 0x329   : > { %3398 = vst.msk [vmem:[#allocation3 + $0x48] sm:$0xff] %vm3388_vm13, %v4733_v9  ;;  %v3600_v22 = vadd.f32 %v3599_v41, %v6421_v47  ;;  %v3274_v9 = vmax.bf16 %v3258_v19, %v3242_v59  ;;  %v3315_v16 = vmul.f32 %v6156_v35, %v3292_v8  ;;  %v3163_v8 = vpop.permute.xlu1 %3162 }
 0x32a   : > { %v6451_v46 = vsel %vm1425_vm5, %v6440_v33, 0.0  ;;  %v3312_v41 = vmul.f32 %v6156_v35, %v3289_v13  ;;  %v3415_v3 = vld [vmem:[#allocation3 + $0x50] sm:$0xff] }
 0x32b   : > { %v3601_v6 = vadd.f32 %v3600_v22, %v6429_v1  ;;  %v3290_v56 = vunpack.c.l.bf16 %v3274_v9  ;;  %v4768_v22 = vunpack.c.l.bf16 %v4789_v44  ;;  %v3338_v15 = vadd.f32 %v5195_v36, %v3315_v16  ;;  %v4790_v44 = vld [vmem:[%s6389_s21 + $0x30] sm:$0xff]  }
 0x32c   : > { %v4745_v9 = vunpack.c.h.bf16 %v4784_v12  ;;  %v4772_v12 = vunpack.c.l.bf16 %v4790_v44  ;;  %v4773_v16 = vunpack.c.h.bf16 %v4790_v44 }
 0x32d   : > { %v3602_v42 = vadd.f32 %v3601_v6, %v6436_v11  ;;  %v3413_v2 = vld [vmem:[#allocation3 + $0x40] sm:$0xff]  ;;  %v3313_v28 = vmul.f32 %v6156_v35, %v3290_v56  ;;  %v3335_v6 = vadd.f32 %v5195_v36, %v3312_v41  ;;  %v3416_v13 = vld [vmem:[#allocation3 + $0x58] sm:$0xff] }
 0x32e   : > { %v6447_v57 = vadd.f32 %v4764_v38, %v3413_v2  ;;  %v6494_v56 = vadd.f32 %v4769_v20, %v3416_v13 }
 0x32f   : > { %v3603_v21 = vadd.f32 %v3602_v42, %v6444_v63  ;;  %v6475_v42 = vadd.f32 %v4768_v22, %v3415_v3  ;;  %v3336_v58 = vadd.f32 %v5195_v36, %v3313_v28 }
 0x330   : > { %v3414_v0 = vld [vmem:[#allocation3 + $0x48] sm:$0xff]  ;;  %v6463_v54 = vsel %vm1425_vm5, %v6447_v57, 0.0 }
 0x331   : > { %v3604_v49 = vadd.f32 %v3603_v21, %v6451_v46  ;;  %v6459_v25 = vadd.f32 %v4765_v32, %v3414_v0  ;;  %v4741_v21 = vunpack.c.h.bf16 %v4783_v45  ;;  %v3539_v0 = vsel %vm1425_vm5, %v6475_v42, 0.0 }
 0x332   : > { %v3546_v45 = vsel %vm1425_vm5, %v6494_v56, 0.0 }
 0x333   : > { %v3605_v24 = vadd.f32 %v3604_v49, %v6463_v54  ;;  %v6479_v38 = vsel %vm1425_vm5, %v6459_v25, 0.0  ;;  %v3547_v20 = vrot.slane %v3546_v45, 4 }
 0x335   : > { %v3606_v32 = vadd.f32 %v3605_v24, %v6479_v38  ;;  %v3540_v24 = vrot.slane %v3539_v0, 4  ;;  %v3548_v13 = vadd.f32 %v3547_v20, %v3546_v45 }
 0x337   : > { %v3607_v17 = vadd.f32 %v3606_v32, %v3539_v0 }
 0x355   : > { %v4842_v50 = vpop.f32.mrb[12].mxu0 }
 0x356   : > { %v1789_v7 = vmul.f32 %v4842_v50, %v6156_v35  ;;  %v1753_v34 = vpop.f32.mrb[13].mxu0 }
 0x357   : > { %v1787_v10 = vmul.f32 %v6156_v35, %v1753_v34  ;;  %v4843_v5 = vpop.f32.mrb[14].mxu0  ;;  %v3161_v35 = vpop.permute.xlu0 %3160 }
 0x358   : > { %v1812_v51 = vadd.f32 %v5195_v36, %v1789_v7  ;;  %v1790_v55 = vmul.f32 %v5196_v26, %v4843_v5  ;;  %v1756_v59 = vpop.f32.mrb[15].mxu0  ;;  %v3608_v7 = vadd.f32 %v3607_v17, %v3546_v45 }
 0x359   : > { %v1810_v18 = vadd.f32 %v5195_v36, %v1787_v10  ;;  %v1788_v30 = vmul.f32 %v5196_v26, %v1756_v59 }
 0x35a   : > { %1828 = vst.msk [vmem:[#allocation3 + $0x70] sm:$0xff] %vm1310_vm2, %v1812_v51  ;;  %v1813_v19 = vadd.f32 %v5195_v36, %v1790_v55 }
 0x35b   : > { %3195 = vst.msk [vmem:[#allocation3 + $0x70] sm:$0xff] %vm3180_vm11, %v3161_v35  ;;  %v1811_v2 = vadd.f32 %v5195_v36, %v1788_v30  ;;  %v3615_v30 = vld [vmem:[%s6712_s5] sm:$0x3]  ;;  %v3526_v35 = vrot.slane %v6463_v54, 4 }
 0x35c   : > { %1826 = vst.msk [vmem:[#allocation3 + $0x60] sm:$0xff] %vm1310_vm2, %v1810_v18  ;;  %1829 = vst.msk [vmem:[#allocation3 + $0x78] sm:$0xff] %vm1310_vm2, %v1813_v19  ;;  %v3533_v19 = vrot.slane %v6479_v38, 4 }
 0x35d   : > { %3354 = vst.msk [vmem:[#allocation3 + $0x70] sm:$0xff] %vm3339_vm12, %v3337_v27 }
 0x35e   : > { %3193 = vst.msk [vmem:[#allocation3 + $0x60] sm:$0xff] %vm3180_vm11, %v3157_v37  ;;  %3196 = vst.msk [vmem:[#allocation3 + $0x78] sm:$0xff] %vm3180_vm11, %v3163_v8  ;;  %v4791_v37 = vld [vmem:[%s6389_s21 + $0x38] sm:$0xff]  }
 0x35f   : > { %3403 = vst.msk [vmem:[#allocation3 + $0x70] sm:$0xff] %vm3388_vm13, %v4744_v60  ;;  %v4776_v41 = vunpack.c.l.bf16 %v4791_v37  ;;  %v4777_v49 = vunpack.c.h.bf16 %v4791_v37 }
 0x360   : > { %3352 = vst.msk [vmem:[#allocation3 + $0x60] sm:$0xff] %vm3339_vm12, %v3335_v6  ;;  %3355 = vst.msk [vmem:[#allocation3 + $0x78] sm:$0xff] %vm3339_vm12, %v3338_v15 }
 0x361   : > { %1827 = vst.msk [vmem:[#allocation3 + $0x68] sm:$0xff] %vm1310_vm2, %v1811_v2  ;;  %v3527_v2 = vadd.f32 %v3526_v35, %v6463_v54  ;;  %vm3724_vm2 = vcmask 1043459  }
 0x362   : > { %3401 = vst.msk [vmem:[#allocation3 + $0x60] sm:$0xff] %vm3388_vm13, %v4740_v31  ;;  %3404 = vst.msk [vmem:[#allocation3 + $0x78] sm:$0xff] %vm3388_vm13, %v4745_v9  ;;  %v3541_v9 = vadd.f32 %v3540_v24, %v3539_v0 }
 0x363   : > { %3194 = vst.msk [vmem:[#allocation3 + $0x68] sm:$0xff] %vm3180_vm11, %v3159_v29  ;;  %v3528_v37 = vrot.slane %v3527_v2, 2 }
 0x364   : > { %3353 = vst.msk [vmem:[#allocation3 + $0x68] sm:$0xff] %vm3339_vm12, %v3336_v58  ;;  %v3534_v58 = vadd.f32 %v3533_v19, %v6479_v38  ;;  %v3542_v44 = vrot.slane %v3541_v9, 2  ;;  %v3470_v19 = vrot.slane %v6401_v48, 4 }
 0x365   : > { %3402 = vst.msk [vmem:[#allocation3 + $0x68] sm:$0xff] %vm3388_vm13, %v4741_v21 }
 0x366   : > { %v3419_v50 = vld [vmem:[#allocation3 + $0x70] sm:$0xff]  ;;  %v3535_v17 = vrot.slane %v3534_v58, 2 }
 0x367   : > { %v6507_v60 = vadd.f32 %v4776_v41, %v3419_v50 }
 0x369   : > { %v3417_v29 = vld [vmem:[#allocation3 + $0x60] sm:$0xff]  ;;  %v3420_v34 = vld [vmem:[#allocation3 + $0x78] sm:$0xff]  ;;  %v3567_v51 = vsel %vm1425_vm5, %v6507_v60, 0.0 }
 0x36a   : > { %v6505_v22 = vadd.f32 %v4772_v12, %v3417_v29  ;;  %v6511_v5 = vadd.f32 %v4777_v49, %v3420_v34  ;;  %v3568_v32 = vrot.slane %v3567_v51, 4  ;;  %v3549_v12 = vrot.slane %v3548_v13, 2 }
 0x36b   : > { %v3543_v29 = vadd.f32 %v3542_v44, %v3541_v9  ;;  %v3536_v34 = vadd.f32 %v3535_v17, %v3534_v58  ;;  %v3484_v58 = vrot.slane %v6414_v52, 4 }
 0x36c   : > { %v3418_v10 = vld [vmem:[#allocation3 + $0x68] sm:$0xff]  ;;  %v3553_v28 = vsel %vm1425_vm5, %v6505_v22, 0.0  ;;  %v3574_v6 = vsel %vm1425_vm5, %v6511_v5, 0.0  ;;  %v3569_v49 = vadd.f32 %v3568_v32, %v3567_v51  ;;  %v3550_v0 = vadd.f32 %v3549_v12, %v3548_v13 }
 0x36d   : > { %v6509_v31 = vadd.f32 %v4773_v16, %v3418_v10  ;;  %v3609_v3 = vadd.f32 %v3608_v7, %v3553_v28  ;;  %v3554_v8 = vrot.slane %v3553_v28, 4  ;;  %v3575_v41 = vrot.slane %v3574_v6, 4 }
 0x36e   : > { %v3529_v7 = vadd.f32 %v3528_v37, %v3527_v2  ;;  %v3570_v38 = vrot.slane %v3569_v49, 2  ;;  %v3544_v45 = vrot.slane %v3543_v29, 1  ;;  %v3477_v2 = vrot.slane %v6405_v53, 4 }
 0x36f   : > { %v3560_v36 = vsel %vm1425_vm5, %v6509_v31, 0.0  ;;  %v3555_v50 = vadd.f32 %v3554_v8, %v3553_v28  ;;  %v3576_v10 = vadd.f32 %v3575_v41, %v3574_v6  ;;  %v3491_v13 = vrot.slane %v6421_v47, 4 }
 0x370   : > { %v3610_v27 = vadd.f32 %v3609_v3, %v3560_v36  ;;  %v3561_v21 = vrot.slane %v3560_v36, 4  ;;  %v3545_v24 = vadd.f32 %v3544_v45, %v3543_v29  ;;  %v3498_v8 = vrot.slane %v6429_v1, 4 }
 0x371   : > { %v3556_v54 = vrot.slane %v3555_v50, 2  ;;  %v3471_v12 = vadd.f32 %v3470_v19, %v6401_v48  ;;  %v3485_v29 = vadd.f32 %v3484_v58, %v6414_v52 }
 0x372   : > { %v3611_v26 = vadd.f32 %v3610_v27, %v3567_v51  ;;  %v3562_v16 = vadd.f32 %v3561_v21, %v3560_v36  ;;  %v3530_v27 = vrot.slane %v3529_v7, 1  ;;  %v3592_v21 = vmul.f32 0.125, %v3545_v24 }
 0x374   : > { %v3612_v55 = vadd.f32 %v3611_v26, %v3574_v6  ;;  %v3563_v3 = vrot.slane %v3562_v16, 2  ;;  %v3537_v26 = vrot.slane %v3536_v34, 1  ;;  %v3531_v28 = vadd.f32 %v3530_v27, %v3529_v7 }
 0x375   : > { %v3492_v7 = vadd.f32 %v3491_v13, %v6421_v47 }
 0x376   : > { %v3614_v59 = vmul.f32 0.0625, %v3612_v55  ;;  %v3551_v55 = vrot.slane %v3550_v0, 1  ;;  %v3538_v36 = vadd.f32 %v3537_v26, %v3536_v34  ;;  %v3590_v44 = vmul.f32 0.125, %v3531_v28 }
 0x377   : > { %v3505_v34 = vrot.slane %v6436_v11, 4  ;;  %v3472_v26 = vrot.slane %v3471_v12, 2 }
 0x378   : > { %v3616_v18 = vpack.c.bf16 %v3614_v59, %v3614_v59  ;;  %v3577_v59 = vrot.slane %v3576_v10, 2  ;;  %v3552_v51 = vadd.f32 %v3551_v55, %v3550_v0  ;;  %v3591_v37 = vmul.f32 0.125, %v3538_v36 }
 0x379   : > { %v3499_v0 = vadd.f32 %v3498_v8, %v6429_v1  ;;  %v3672_v48 = vpack.c.bf16 %v3590_v44, %v3590_v44  ;;  %v3506_v1 = vadd.f32 %v3505_v34, %v6436_v11 }
 0x37a   : > { %v3622_v15 = vsel %vm3620_vm15, %v3616_v18, 0  ;;  %v3557_v18 = vadd.f32 %v3556_v54, %v3555_v50  ;;  %v3578_v35 = vadd.f32 %v3577_v59, %v3576_v10  ;;  %v3593_v17 = vmul.f32 0.125, %v3552_v51 }
 0x37b   : > { %4865 = vmatpush3.bf16.msra.mxu0 %v3622_v15  ;;  %v3564_v15 = vadd.f32 %v3563_v3, %v3562_v16  ;;  %v3512_v10 = vrot.slane %v6444_v63, 4  ;;  %v3519_v54 = vrot.slane %v6451_v46, 4  ;;  %v3674_v3 = vpack.c.bf16 %v3592_v21, %v3592_v21 }
 0x37c   : > { %4876 = vmatprep.subr.bf16.mxu0 %v5215_v23  ;;  %v3558_v20 = vrot.slane %v3557_v18, 1  ;;  %v3579_v32 = vrot.slane %v3578_v35, 1  ;;  %v3673_v45 = vpack.c.bf16 %v3591_v37, %v3591_v37  ;;  %v3675_v27 = vpack.c.bf16 %v3593_v17, %v3593_v17 }
 0x37d   : > { %v3565_v6 = vrot.slane %v3564_v15, 1  ;;  %v3486_v59 = vrot.slane %v3485_v29, 2  ;;  %v3520_v24 = vadd.f32 %v3519_v54, %v6451_v46  ;;  %v6555_v28 = vunpack.c.l.b16 %v3674_v3 }
 0x37e   : > { %4867 = vmatmul.mubr.msk.bf16.vlgmr.msra.gmra.mrb[16].mxu0 %vm1425_vm5, %v3615_v30  ;;  %v3571_v30 = vadd.f32 %v3570_v38, %v3569_v49  ;;  %v3559_v41 = vadd.f32 %v3558_v20, %v3557_v18  ;;  %v3478_v49 = vadd.f32 %v3477_v2, %v6405_v53  ;;  %v3580_v38 = vadd.f32 %v3579_v32, %v3578_v35  ;;  %v3680_v20 = vld [vmem:[%s6713_s6] sm:$0xf] }
 0x37f   : > { %4878 = vmatprep.mubr.msk.bf16.mxu0 %vm5216_vm14, %v5215_v23  ;;  %v3566_v50 = vadd.f32 %v3565_v6, %v3564_v15  ;;  %v3493_v18 = vrot.slane %v3492_v7, 2  ;;  %v3500_v15 = vrot.slane %v3499_v0, 2  ;;  %v6559_v51 = vunpack.c.l.b16 %v3672_v48 }
 0x380   : > { %v3572_v9 = vrot.slane %v3571_v30, 1  ;;  %v6546_v55 = vmul.f32 0.125, %v3559_v41  ;;  %v3479_v47 = vrot.slane %v3478_v49, 2  ;;  %v6557_v36 = vmul.f32 0.125, %v3580_v38 }
 0x381   : > { %v6548_v53 = vmul.f32 0.125, %v3566_v50  ;;  %v6561_v35 = vunpack.c.l.b16 %v3673_v45  ;;  %v6563_v19 = vunpack.c.l.b16 %v3675_v27  ;;  %v3746_v6 = vsel %vm3620_vm15, %v3680_v20, 0 }
 0x382   : > { %v3573_v16 = vadd.f32 %v3572_v9, %v3571_v30  ;;  %v3513_v30 = vadd.f32 %v3512_v10, %v6444_v63  ;;  %v3676_v11 = vpack.c.bf16 %v6546_v55, %v6546_v55  ;;  %4877 = vmatpush3.bf16.msra.mxu0 %v3746_v6  ;;  %4871 = vmatpush3.bf16.msra.mxu1 %v3746_v6  ;;  %v3507_v13 = vrot.slane %v3506_v1, 2 }
 0x383   : > { %v3677_v63 = vpack.c.bf16 %v6548_v53, %v6548_v53  ;;  %v3473_v9 = vadd.f32 %v3472_v26, %v3471_v12  ;;  %v3480_v2 = vadd.f32 %v3479_v47, %v3478_v49  ;;  %v3487_v58 = vadd.f32 %v3486_v59, %v3485_v29  ;;  %4888 = vmatprep.subr.bf16.mxu0 %v5215_v23 }
 0x384   : > { %v6550_v52 = vmul.f32 0.125, %v3573_v16  ;;  %v3494_v8 = vadd.f32 %v3493_v18, %v3492_v7  ;;  %v3501_v21 = vadd.f32 %v3500_v15, %v3499_v0  ;;  %v3514_v32 = vrot.slane %v3513_v30, 2  ;;  %4882 = vmatprep.subr.bf16.mxu1 %v5215_v23 }
 0x385   : > { %v3521_v44 = vrot.slane %v3520_v24, 2  ;;  %v3474_v37 = vrot.slane %v3473_v9, 1  ;;  %v3481_v17 = vrot.slane %v3480_v2, 1  ;;  %v3488_v41 = vrot.slane %v3487_v58, 1 }
 0x386   : > { %v3678_v46 = vpack.c.bf16 %v6550_v52, %v6550_v52  ;;  %v3508_v50 = vadd.f32 %v3507_v13, %v3506_v1  ;;  %v3495_v16 = vrot.slane %v3494_v8, 1  ;;  %v3502_v34 = vrot.slane %v3501_v21, 1 }
 0x387   : > { %v3515_v10 = vadd.f32 %v3514_v32, %v3513_v30  ;;  %v3522_v54 = vadd.f32 %v3521_v44, %v3520_v24  ;;  %v3475_v12 = vadd.f32 %v3474_v37, %v3473_v9  ;;  %v3482_v49 = vadd.f32 %v3481_v17, %v3480_v2 }
 0x388   : > { %v3489_v29 = vadd.f32 %v3488_v41, %v3487_v58  ;;  %v3509_v3 = vrot.slane %v3508_v50, 1  ;;  %v3496_v7 = vadd.f32 %v3495_v16, %v3494_v8  ;;  %v3503_v0 = vadd.f32 %v3502_v34, %v3501_v21 }
 0x389   : > { %v3516_v38 = vrot.slane %v3515_v10, 1  ;;  %v3523_v48 = vrot.slane %v3522_v54, 1  ;;  %v3582_v27 = vmul.f32 0.125, %v3475_v12  ;;  %v3583_v26 = vmul.f32 0.125, %v3482_v49 }
 0x38a   : > { %v3510_v45 = vadd.f32 %v3509_v3, %v3508_v50  ;;  %v3584_v55 = vmul.f32 0.125, %v3489_v29  ;;  %v3585_v18 = vmul.f32 0.125, %v3496_v7  ;;  %v3586_v1 = vmul.f32 0.125, %v3503_v0 }
 0x38b   : > { %v3517_v47 = vadd.f32 %v3516_v38, %v3515_v10  ;;  %v3524_v59 = vadd.f32 %v3523_v48, %v3522_v54  ;;  %v3664_v20 = vpack.c.bf16 %v3582_v27, %v3582_v27  ;;  %v3665_v30 = vpack.c.bf16 %v3583_v26, %v3583_v26 }
 0x38c   : > { %v3587_v15 = vmul.f32 0.125, %v3510_v45  ;;  %v3666_v24 = vpack.c.bf16 %v3584_v55, %v3584_v55  ;;  %v3667_v2 = vpack.c.bf16 %v3585_v18, %v3585_v18  ;;  %v3668_v58 = vpack.c.bf16 %v3586_v1, %v3586_v1  ;;  %v3837_v1 = vld [vmem:[%s6715_s8] sm:$0x3] }
 0x38d   : > { %v3588_v6 = vmul.f32 0.125, %v3517_v47  ;;  %v3589_v9 = vmul.f32 0.125, %v3524_v59  ;;  %v3704_v8 = vunpack.c.l.b16 %v3664_v20  ;;  %v3705_v21 = vunpack.c.l.b16 %v3665_v30  ;;  %v4705_v59 = vld [vmem:[%s6715_s8 + $0x2] sm:$0x3]  ;;  %v4698_v20 = vld [vmem:[%s6714_s7] ss:$0 sm:$0xff] }
 0x38e   : > { %v3669_v13 = vpack.c.bf16 %v3587_v15, %v3587_v15  ;;  %v3706_v32 = vunpack.c.l.b16 %v3666_v24  ;;  %v3679_v44 = vpack.c.bf16 %v6557_v36, %v6557_v36  ;;  %v3707_v41 = vunpack.c.l.b16 %v3667_v2 }
 0x38f   : > { %v3670_v37 = vpack.c.bf16 %v3588_v6, %v3588_v6  ;;  %v3671_v17 = vpack.c.bf16 %v3589_v9, %v3589_v9  ;;  %v3708_v50 = vunpack.c.l.b16 %v3668_v58  ;;  %v3716_v16 = vunpack.c.l.b16 %v3676_v11 }
 0x390   : > { %v3709_v34 = vunpack.c.l.b16 %v3669_v13  ;;  %v3721_v10 = vsel %vm3720_vm0, %v3705_v21, %v3704_v8  ;;  %v3717_v54 = vunpack.c.l.b16 %v3677_v63  ;;  %v3734_v3 = vsel %vm3720_vm0, %v6561_v35, %v6559_v51 }
 0x391   : > { %v3710_v12 = vunpack.c.l.b16 %v3670_v37  ;;  %v3723_v49 = vsel %vm3722_vm1, %v3706_v32, %v3721_v10  ;;  %v3711_v36 = vunpack.c.l.b16 %v3671_v17  ;;  %v3718_v11 = vunpack.c.l.b16 %v3678_v46 }
 0x392   : > { %v3725_v29 = vsel %vm3724_vm2, %v3707_v41, %v3723_v49  ;;  %v3735_v53 = vsel %vm3722_vm1, %v6555_v28, %v3734_v3  ;;  %v3719_v63 = vunpack.c.l.b16 %v3679_v44  ;;  %v3915_v18 = vsel %vm3846_vm9, %v4705_v59, 0  ;;  %v4706_v49 = vld [vmem:[%s6716_s9 + $0x1] ss:$0 sm:$0xff] }
 0x393   : > { %v3727_v7 = vsel %vm3726_vm4, %v3708_v50, %v3725_v29  ;;  %v3736_v38 = vsel %vm3724_vm2, %v6563_v19, %v3735_v53  ;;  %v3848_v15 = vsel %vm3846_vm9, %v3837_v1, 0 }
 0x394   : > { %v3729_v0 = vsel %vm3728_vm6, %v3709_v34, %v3727_v7  ;;  %v3737_v45 = vsel %vm3726_vm4, %v3716_v16, %v3736_v38 }
 0x395   : > { %v3731_v48 = vsel %vm3730_vm7, %v3710_v12, %v3729_v0  ;;  %v3738_v51 = vsel %vm3728_vm6, %v3717_v54, %v3737_v45  ;;  %v3963_v45 = vld [vmem:[%s6717_s10] sm:$0xf] }
 0x396   : > { %v3733_v27 = vsel %vm3732_vm8, %v3711_v36, %v3731_v48  ;;  %v3739_v35 = vsel %vm3730_vm7, %v3718_v11, %v3738_v51 }
 0x397   : > { %v3740_v26 = vsel %vm3732_vm8, %v3719_v63, %v3739_v35 }
 0x398   : > { %v3741_v52 = vpack.c.b16 %v3740_v26, %v3733_v27  ;;  %v4701_v27 = vld [vmem:[%s6716_s9] ss:$0 sm:$0xff] }
 0x39a   : > { %4873 = vmatmul.mubr.msk.bf16.vlgmr.msra.gmra.mrb[16].mxu1 %vm1425_vm5, %v3741_v52 }
 0x39b   : > { %4884 = vmatprep.mubr.msk.bf16.mxu1 %vm5216_vm14, %v5215_v23  ;;  %4883 = vmatpush3.bf16.msra.mxu1 %v3848_v15 }
 0x39c   : > { %4894 = vmatprep.subr.bf16.mxu1 %v5215_v23 }
 0x451   : > { %v3658_v46 = vpop.f32.mrb[16].mxu0 }
 0x452   : > { %v3791_v28 = vpack.c.bf16 %v3658_v46, %v3658_v46  ;;  %v4868_v55 = vpop.f32.mrb[17].mxu0 }
 0x453   : > { %v3661_v47 = vpop.f32.mrb[18].mxu0 }
 0x454   : > { %4879 = vmatmul.mubr.msk.bf16.vlgmr.msra.gmra.mrb[20].mxu0 %vm1425_vm5, %v3791_v28  ;;  %v4869_v19 = vpop.f32.mrb[19].mxu0 }
 0x455   : > { %4890 = vmatprep.mubr.msk.bf16.mxu0 %vm5216_vm14, %v5215_v23  ;;  %4889 = vmatpush3.bf16.msra.mxu0 %v3915_v18  ;;  %v5217_v19 = vmov 1966171168   ;;  %v4017_v18 = vlaneseq }
 0x456   : > { %v4015_v59 = vunpack.c.l.s4 %v5217_v19 }
 0x457   : > { %v4018_v15 = vshrl.u32 %v4017_v18, 7 }
 0x458   : > { %v4016_v1 = vunpack.c.0.s8 %v4015_v59 }
 0x46d   : > { %v3782_v30 = vpop.f32.mrb[16].mxu1 }
 0x46e   : > { %v3783_v24 = vadd.f32 %v4698_v20, %v3782_v30  ;;  %v4874_v6 = vpop.f32.mrb[17].mxu1 }
 0x46f   : > { %v3785_v9 = vpop.f32.mrb[18].mxu1  ;;  %v4019_v6 = vsub.s32 %v4016_v1, %v4018_v15 }
 0x470   : > { %v3789_v2 = vmax.f32 %v3783_v24, 0.0  ;;  %v3786_v58 = vadd.f32 %v4698_v20, %v3785_v9  ;;  %v4875_v13 = vpop.f32.mrb[19].mxu1 }
 0x472   : > { %v3790_v8 = vmax.f32 %v3786_v58, 0.0 }
 0x474   : > { %v3836_v21 = vpack.c.bf16 %v3790_v8, %v3789_v2 }
 0x476   : > { %4885 = vmatmul.mubr.msk.bf16.vlgmr.msra.gmra.mrb[20].mxu1 %vm1359_vm3, %v3836_v21 }
 0x477   : > { %4896 = vmatprep.mubr.msk.bf16.mxu1 %vm5216_vm14, %v5215_v23 }
 0x527   : > { %v3829_v32 = vpop.f32.mrb[20].mxu0 }
 0x528   : > { %v3830_v44 = vadd.f32 %v4698_v20, %v3829_v32  ;;  %v4880_v37 = vpop.f32.mrb[21].mxu0 }
 0x529   : > { %v3832_v17 = vpop.f32.mrb[22].mxu0 }
 0x52a   : > { %v3835_v41 = vmax.f32 %v3830_v44, 0.0  ;;  %v4881_v50 = vpop.f32.mrb[23].mxu0 }
 0x52c   : > { %v3903_v16 = vpack.c.bf16 %v3835_v41, %v3835_v41 }
 0x52e   : > { %4891 = vmatmul.mubr.msk.bf16.vlgmr.msra.gmra.mrb[24].mxu0 %vm1359_vm3, %v3903_v16 }
 0x549   : > { %v3884_v34 = vpop.f32.mrb[20].mxu1 }
 0x54a   : > { %v4886_v10 = vpop.f32.mrb[21].mxu1  ;;  %v3885_v51 = vadd.f32 %v4701_v27, %v3884_v34 }
 0x54b   : > { %v3887_v54 = vpop.f32.mrb[22].mxu1 }
 0x54c   : > { %v4887_v12 = vpop.f32.mrb[23].mxu1  ;;  %v3888_v35 = vadd.f32 %v4701_v27, %v3887_v54  ;;  %v4703_v26 = vmul.f32 -1.442695, %v3885_v51 }
 0x54e   : > { %v4704_v52 = vmul.f32 -1.442695, %v3888_v35 }
 0x601   : > { %v3951_v36 = vpop.f32.mrb[24].mxu0 }
 0x602   : > { %v3952_v29 = vadd.f32 %v4706_v49, %v3951_v36  ;;  %v4892_v23 = vpop.f32.mrb[25].mxu0  ;;  %v4113_v36 = vsub.s32 0, %v4018_v15 }
 0x603   : > { %v3954_v3 = vpop.f32.mrb[26].mxu0 }
 0x604   : > { %v4708_v11 = vmul.f32 -1.442695, %v3952_v29  ;;  %v4893_v7 = vpop.f32.mrb[27].mxu0 }
 0x606   : > { %5183 = vpow2.f32 %v4708_v11 }
 0x610   : > { %v5184_v53 = vpop.eup %5183 }
 0x611   : > { %v3960_v63 = vadd.f32 1.0, %v5184_v53 }
 0x613   : > { %5185 = vrcp.f32 %v3960_v63 }
 0x614   : > { %5187 = vpow2.f32 %v4703_v26 }
 0x615   : > { %5189 = vpow2.f32 %v4704_v52 }
 0x61d   : > { %v5186_v0 = vpop.eup %5185 }
 0x61e   : > { %v3964_v38 = vpack.c.bf16 %v5186_v0, %v5186_v0  ;;  %v5188_v46 = vpop.eup %5187 }
 0x61f   : > { %v5190_v28 = vpop.eup %5189  ;;  %v3897_v55 = vadd.f32 1.0, %v5188_v46 }
 0x620   : > { %v3969_v48 = vsel %vm3846_vm9, %v3964_v38, 0  ;;  %v3898_v47 = vadd.f32 1.0, %v5190_v28 }
 0x621   : > { %4895 = vmatpush3.bf16.msra.mxu1 %v3969_v48  ;;  %5191 = vrcp.f32 %v3897_v55 }
 0x622   : > { %5193 = vrcp.f32 %v3898_v47 }
 0x624   : > { %4897 = vmatmul.mubr.msk.bf16.vlgmr.msra.gmra.mrb[24].mxu1 %vm1359_vm3, %v3963_v45 }
 0x62b   : > { %v5192_v20 = vpop.eup %5191 }
 0x62c   : > { %v5194_v30 = vpop.eup %5193  ;;  %v4013_v24 = vcombine.high %v5192_v20, %v5192_v20  ;;  %v4020_v2 = vrot.slane %v5192_v20, %v4019_v6 }
 0x62d   : > { %v4062_v9 = vcombine.high %v5194_v30, %v5194_v30  ;;  %v4069_v13 = vrot.slane %v5194_v30, %v4019_v6 }
 0x62e   : > { %v4027_v58 = vrot.slane %v4013_v24, %v4019_v6  ;;  %v4028_v21 = vcombine.high %v4020_v2, %v4020_v2  ;;  %v4036_v17 = vrot.slane %v4020_v2, %v4019_v6 }
 0x62f   : > { %v4076_v8 = vrot.slane %v4062_v9, %v4019_v6  ;;  %v4077_v44 = vcombine.high %v4069_v13, %v4069_v13  ;;  %v4085_v34 = vrot.slane %v4069_v13, %v4019_v6 }
 0x630   : > { %v4029_v32 = vcombine.high %v4027_v58, %v4027_v58  ;;  %v4043_v41 = vrot.slane %v4027_v58, %v4019_v6  ;;  %v4050_v50 = vrot.slane %v4028_v21, %v4019_v6  ;;  %v4058_v49 = vcombine.high %v4036_v17, %v4036_v17 }
 0x631   : > { %v4078_v37 = vcombine.high %v4076_v8, %v4076_v8  ;;  %v4092_v10 = vrot.slane %v4076_v8, %v4019_v6  ;;  %v4099_v54 = vrot.slane %v4077_v44, %v4019_v6  ;;  %v4107_v11 = vcombine.high %v4085_v34, %v4085_v34 }
 0x632   : > { %v4057_v16 = vrot.slane %v4029_v32, %v4019_v6  ;;  %v4059_v29 = vcombine.high %v4043_v41, %v4043_v41  ;;  %v4060_v23 = vcombine.high %v4050_v50, %v4050_v50  ;;  %v4114_v0 = vrot.slane %v4036_v17, %v4113_v36 }
 0x633   : > { %v4106_v12 = vrot.slane %v4078_v37, %v4019_v6  ;;  %v4108_v7 = vcombine.high %v4092_v10, %v4092_v10  ;;  %v4109_v53 = vcombine.high %v4099_v54, %v4099_v54  ;;  %v4118_v38 = vrot.slane %v4050_v50, %v4113_v36 }
 0x634   : > { %v4061_v3 = vcombine.high %v4057_v16, %v4057_v16  ;;  %v4122_v48 = vrot.slane %v4058_v49, %v4113_v36  ;;  %v4130_v45 = vrot.slane %v4043_v41, %v4113_v36  ;;  %v4126_v27 = vrot.slane %v4060_v23, %v4113_v36 }
 0x635   : > { %v4110_v63 = vcombine.high %v4106_v12, %v4106_v12  ;;  %v4134_v51 = vrot.slane %v4057_v16, %v4113_v36  ;;  %v4138_v35 = vrot.slane %v4059_v29, %v4113_v36  ;;  %v4146_v52 = vrot.slane %v4085_v34, %v4113_v36 }
 0x636   : > { %v4142_v26 = vrot.slane %v4061_v3, %v4113_v36  ;;  %v4150_v46 = vrot.slane %v4099_v54, %v4113_v36  ;;  %v4154_v28 = vrot.slane %v4107_v11, %v4113_v36  ;;  %v4162_v55 = vrot.slane %v4092_v10, %v4113_v36  ;;  %v4710_v11 = vld [vmem:[%s6718_s11] ss:$0 sm:$0xff] }
 0x637   : > { %v4158_v47 = vrot.slane %v4109_v53, %v4113_v36  ;;  %v4166_v19 = vrot.slane %v4106_v12, %v4113_v36  ;;  %v4170_v59 = vrot.slane %v4108_v7, %v4113_v36  ;;  %v4174_v18 = vrot.slane %v4110_v63, %v4113_v36 }
 0x6f7   : > { %v4005_v1 = vpop.f32.mrb[24].mxu1 }
 0x6f8   : > { %v4191_v15 = vmul.f32 %v4114_v0, %v4005_v1  ;;  %v4192_v20 = vmul.f32 %v4118_v38, %v4005_v1  ;;  %v4193_v30 = vmul.f32 %v4122_v48, %v4005_v1  ;;  %v4194_v24 = vmul.f32 %v4126_v27, %v4005_v1  ;;  %v4898_v6 = vpop.f32.mrb[25].mxu1 }
 0x6f9   : > { %v4195_v9 = vmul.f32 %v4130_v45, %v4005_v1  ;;  %v4196_v2 = vmul.f32 %v4134_v51, %v4005_v1  ;;  %v4197_v58 = vmul.f32 %v4138_v35, %v4005_v1  ;;  %v4198_v13 = vmul.f32 %v4142_v26, %v4005_v1  ;;  %v4008_v8 = vpop.f32.mrb[26].mxu1 }
 0x6fa   : > { %v4199_v21 = vmul.f32 %v4146_v52, %v4005_v1  ;;  %v4200_v32 = vmul.f32 %v4150_v46, %v4005_v1  ;;  %v4201_v44 = vmul.f32 %v4154_v28, %v4005_v1  ;;  %v4202_v37 = vmul.f32 %v4158_v47, %v4005_v1  ;;  %v4899_v17 = vpop.f32.mrb[27].mxu1 }
 0x6fb   : > { %v4203_v41 = vmul.f32 %v4162_v55, %v4005_v1  ;;  %v4204_v50 = vmul.f32 %v4166_v19, %v4005_v1  ;;  %v4205_v16 = vmul.f32 %v4170_v59, %v4005_v1  ;;  %v4206_v34 = vmul.f32 %v4174_v18, %v4005_v1  ;;  %v4711_v19 = vld [vmem:[%s6719_s12] ss:$0 sm:$0xff] }
 0x6fc   : > { %v4207_v10 = vmul.f32 %v4191_v15, %v6393_v62  ;;  %v4208_v54 = vmul.f32 %v4192_v20, %v6395_v40  ;;  %v4209_v12 = vmul.f32 %v4193_v30, %v6397_v39  ;;  %v4210_v49 = vmul.f32 %v4194_v24, %v6410_v61 }
 0x6fd   : > { %v4211_v36 = vmul.f32 %v4195_v9, %v6417_v14  ;;  %v4212_v29 = vmul.f32 %v4196_v2, %v6425_v43  ;;  %v4213_v23 = vmul.f32 %v4197_v58, %v6432_v4  ;;  %v4214_v3 = vmul.f32 %v4198_v13, %v6440_v33 }
 0x6fe   : > { %v4215_v7 = vmul.f32 %v4199_v21, %v6447_v57  ;;  %v4216_v53 = vmul.f32 %v4200_v32, %v6459_v25  ;;  %v4217_v63 = vmul.f32 %v4201_v44, %v6475_v42  ;;  %v4218_v0 = vmul.f32 %v4202_v37, %v6494_v56 }
 0x6ff   : > { %v4219_v38 = vmul.f32 %v4203_v41, %v6505_v22  ;;  %v4220_v48 = vmul.f32 %v4204_v50, %v6509_v31  ;;  %v4221_v45 = vmul.f32 %v4205_v16, %v6507_v60  ;;  %v4222_v27 = vmul.f32 %v4206_v34, %v6511_v5 }
 0x700   : > { %v4230_v51 = vmul.f32 %v4710_v11, %v4207_v10  ;;  %v4231_v35 = vmul.f32 %v4710_v11, %v4208_v54  ;;  %v4232_v26 = vmul.f32 %v4710_v11, %v4209_v12  ;;  %v4233_v52 = vmul.f32 %v4710_v11, %v4210_v49 }
 0x701   : > { %v4234_v46 = vmul.f32 %v4710_v11, %v4211_v36  ;;  %v4235_v28 = vmul.f32 %v4710_v11, %v4212_v29  ;;  %v4236_v55 = vmul.f32 %v4710_v11, %v4213_v23  ;;  %v4237_v47 = vmul.f32 %v4710_v11, %v4214_v3 }
 0x702   : > { %v4238_v59 = vmul.f32 %v4710_v11, %v4215_v7  ;;  %v4239_v18 = vmul.f32 %v4710_v11, %v4216_v53  ;;  %v4240_v1 = vmul.f32 %v4710_v11, %v4217_v63  ;;  %v4241_v15 = vmul.f32 %v4710_v11, %v4218_v0 }
 0x703   : > { %v4242_v20 = vmul.f32 %v4710_v11, %v4219_v38  ;;  %v4243_v30 = vmul.f32 %v4710_v11, %v4220_v48  ;;  %v4244_v24 = vmul.f32 %v4710_v11, %v4221_v45  ;;  %v4245_v6 = vmul.f32 %v4710_v11, %v4222_v27 }
 0x704   : > { %v4253_v9 = vadd.f32 %v4711_v19, %v4230_v51  ;;  %v4254_v2 = vadd.f32 %v4711_v19, %v4231_v35  ;;  %v4255_v58 = vadd.f32 %v4711_v19, %v4232_v26  ;;  %v4256_v13 = vadd.f32 %v4711_v19, %v4233_v52 }
 0x705   : > { %v4257_v8 = vadd.f32 %v4711_v19, %v4234_v46  ;;  %v4258_v21 = vadd.f32 %v4711_v19, %v4235_v28  ;;  %v4259_v32 = vadd.f32 %v4711_v19, %v4236_v55  ;;  %v4260_v44 = vadd.f32 %v4711_v19, %v4237_v47 }
 0x706   : > { %v4261_v37 = vadd.f32 %v4711_v19, %v4238_v59  ;;  %v4262_v17 = vadd.f32 %v4711_v19, %v4239_v18  ;;  %v4263_v41 = vadd.f32 %v4711_v19, %v4240_v1  ;;  %v4264_v50 = vadd.f32 %v4711_v19, %v4241_v15 }
 0x707   : > { %v4265_v16 = vadd.f32 %v4711_v19, %v4242_v20  ;;  %v4266_v34 = vadd.f32 %v4711_v19, %v4243_v30  ;;  %v4267_v10 = vadd.f32 %v4711_v19, %v4244_v24  ;;  %v4268_v54 = vadd.f32 %v4711_v19, %v4245_v6 }
 0x708   : > { %v4269_v12 = vadd.f32 %v4253_v9, %v6393_v62  ;;  %v4270_v49 = vadd.f32 %v4254_v2, %v6395_v40  ;;  %v4271_v36 = vadd.f32 %v4255_v58, %v6397_v39  ;;  %v4272_v29 = vadd.f32 %v4256_v13, %v6410_v61 }
 0x709   : > { %v4273_v23 = vadd.f32 %v4257_v8, %v6417_v14  ;;  %v4274_v3 = vadd.f32 %v4258_v21, %v6425_v43  ;;  %v4275_v11 = vadd.f32 %v4259_v32, %v6432_v4  ;;  %v4276_v7 = vadd.f32 %v4260_v44, %v6440_v33 }
 0x70a   : > { %v4277_v53 = vadd.f32 %v4261_v37, %v6447_v57  ;;  %v4278_v63 = vadd.f32 %v4262_v17, %v6459_v25  ;;  %v4279_v62 = vadd.f32 %v4263_v41, %v6475_v42  ;;  %v4280_v40 = vadd.f32 %v4264_v50, %v6494_v56 }
 0x70b   : > { %v4281_v39 = vadd.f32 %v4265_v16, %v6505_v22  ;;  %v4282_v61 = vadd.f32 %v4266_v34, %v6509_v31  ;;  %v4283_v14 = vadd.f32 %v4267_v10, %v6507_v60  ;;  %v4284_v43 = vadd.f32 %v4268_v54, %v6511_v5 }
 0x70c   : > { %v4285_v4 = vmax.f32 %v4269_v12, 0.0  ;;  %v4286_v33 = vmax.f32 %v4270_v49, 0.0  ;;  %v4287_v57 = vmax.f32 %v4271_v36, 0.0  ;;  %v4288_v25 = vmax.f32 %v4272_v29, 0.0 }
 0x70d   : > { %v4289_v42 = vmax.f32 %v4273_v23, 0.0  ;;  %v4290_v56 = vmax.f32 %v4274_v3, 0.0  ;;  %v4291_v0 = vmax.f32 %v4275_v11, 0.0  ;;  %v4292_v22 = vmax.f32 %v4276_v7, 0.0 }
 0x70e   : > { %v4293_v31 = vmax.f32 %v4277_v53, 0.0  ;;  %v4294_v38 = vmax.f32 %v4278_v63, 0.0  ;;  %v4295_v60 = vmax.f32 %v4279_v62, 0.0  ;;  %v4296_v5 = vmax.f32 %v4280_v40, 0.0  ;;  %4301 = vst.msk [vmem:[%s6666_s20] sm:$0xff] %vm1425_vm5, %v4285_v4  ;;  %4302 = vst.msk [vmem:[%s6666_s20 + $0x8] sm:$0xff] %vm1425_vm5, %v4286_v33 }
 0x70f   : > { %4303 = vst.msk [vmem:[%s6666_s20 + $0x10] sm:$0xff] %vm1425_vm5, %v4287_v57  ;;  %4304 = vst.msk [vmem:[%s6666_s20 + $0x18] sm:$0xff] %vm1425_vm5, %v4288_v25  ;;  %v4297_v48 = vmax.f32 %v4281_v39, 0.0  ;;  %v4298_v45 = vmax.f32 %v4282_v61, 0.0  ;;  %v4299_v27 = vmax.f32 %v4283_v14, 0.0  ;;  %v4300_v51 = vmax.f32 %v4284_v43, 0.0 }
 0x710   : > { %4305 = vst.msk [vmem:[%s6666_s20 + $0x20] sm:$0xff] %vm1425_vm5, %v4289_v42  ;;  %4306 = vst.msk [vmem:[%s6666_s20 + $0x28] sm:$0xff] %vm1425_vm5, %v4290_v56 }
 0x711   : > { %4307 = vst.msk [vmem:[%s6666_s20 + $0x30] sm:$0xff] %vm1425_vm5, %v4291_v0  ;;  %4308 = vst.msk [vmem:[%s6666_s20 + $0x38] sm:$0xff] %vm1425_vm5, %v4292_v22 }
 0x712   : > { %4309 = vst.msk [vmem:[%s6666_s20 + $0x40] sm:$0xff] %vm1425_vm5, %v4293_v31  ;;  %4310 = vst.msk [vmem:[%s6666_s20 + $0x48] sm:$0xff] %vm1425_vm5, %v4294_v38 }
 0x713   : > { %4311 = vst.msk [vmem:[%s6666_s20 + $0x50] sm:$0xff] %vm1425_vm5, %v4295_v60  ;;  %4312 = vst.msk [vmem:[%s6666_s20 + $0x58] sm:$0xff] %vm1425_vm5, %v4296_v5 }
 0x714   : > { %4313 = vst.msk [vmem:[%s6666_s20 + $0x60] sm:$0xff] %vm1425_vm5, %v4297_v48  ;;  %4314 = vst.msk [vmem:[%s6666_s20 + $0x68] sm:$0xff] %vm1425_vm5, %v4298_v45 }
 0x715   : > { %4315 = vst.msk [vmem:[%s6666_s20 + $0x70] sm:$0xff] %vm1425_vm5, %v4299_v27  ;;  %4316 = vst.msk [vmem:[%s6666_s20 + $0x78] sm:$0xff] %vm1425_vm5, %v4300_v51 }
 0x716 PF: > { %s23_s25 = sadd.s32 1, %s5203_s25  }
 0x717   : > { %p20_p4 = scmp.ge.s32.totalorder %s23_s25, 4  }
 0x719   :  { %22 = sbr.rel (!%p20_p4) target bundleno = 1 (0x1), region = 120 }

</bundles_post_ra>
